<compile_context>
chip_gen: v5e
topology: v5e:2x2
jax: 0.10.0
libtpu: 0.0.40
codegen_flags: <defaults>
</compile_context>

<pallas_src>
import jax
import jax.numpy as jnp
from jax.experimental import pallas as pl
from jax.experimental.pallas import tpu as pltpu

HIDDEN = 3
IN_DIM = 784
MID_DIM = 500
HP = 128            # padded latent width (lane-dense)
DEC_PAD = 896       # 7 * 128, lane-dense decoder output width


def _round_up(x, m):
    return (x + m - 1) // m * m


def vae_forward_kernel(
    x_ref,                      # (tb, 784)  f32
    eps_ref,                    # (tb, 128)  f32 (zero past column HIDDEN)
    w1_ref, b1_ref,             # (784, 500) bf16, (1, 500) f32
    wml_ref, bml_ref,           # (500, 256) bf16, (1, 256) f32  (fused fc21|fc22)
    w3_ref, b3_ref,             # (128, 500) bf16, (1, 500) f32  (fc3, rows >= H are 0)
    w4_ref, b4_ref,             # (500, 896) bf16, (1, 896) f32  (fc4, cols >= 784 are 0)
    dec_ref,                    # out (tb, 896) f32
    mulv_ref,                   # out (tb, 256) f32 : [:, :128]=mu_pad, [:, 128:]=logvar_pad
):
    x = x_ref[...].astype(jnp.bfloat16)

    # encode
    h1 = jnp.dot(x, w1_ref[...], preferred_element_type=jnp.float32) + b1_ref[...]
    h1 = jnp.maximum(h1, 0.0)                                            # relu
    mulv = jnp.dot(h1.astype(jnp.bfloat16), wml_ref[...],
                   preferred_element_type=jnp.float32) + bml_ref[...]
    mulv_ref[...] = mulv                                                 # lane-dense mu|logvar slab

    mu_p = mulv[:, :HP]
    logvar_p = mulv[:, HP:]

    # reparameterize (eps ~ U[0,1), matching torch.rand_like in the reference).
    # Padded lanes: mu=0, logvar=0 -> std=1, eps=0 -> z=0; w3 rows there are zero.
    std = jnp.exp(0.5 * logvar_p)
    z = mu_p + eps_ref[...] * std

    # decode
    h3 = jnp.dot(z.astype(jnp.bfloat16), w3_ref[...],
                 preferred_element_type=jnp.float32) + b3_ref[...]
    h3 = jnp.maximum(h3, 0.0)                                            # relu
    logits = jnp.dot(h3.astype(jnp.bfloat16), w4_ref[...],
                     preferred_element_type=jnp.float32) + b4_ref[...]

    # sigmoid: exp on EUP + approx reciprocal on EUP; clamp keeps dec <= 1 exactly.
    dec = pl.reciprocal(1.0 + jnp.exp(-logits), approx=True)
    dec_ref[...] = jnp.minimum(dec, 1.0)


def init_params(key, hidden_size=HIDDEN):
    """Deterministic Linear params, stored PyTorch-style as (out, in) + (out,)."""
    dims = [
        ("fc1", IN_DIM, MID_DIM),
        ("fc21", MID_DIM, hidden_size),
        ("fc22", MID_DIM, hidden_size),
        ("fc3", hidden_size, MID_DIM),
        ("fc4", MID_DIM, IN_DIM),
    ]
    params = {}
    for name, fan_in, fan_out in dims:
        key, kw, kb = jax.random.split(key, 3)
        bound = 1.0 / jnp.sqrt(jnp.float32(fan_in))
        params[name + "_w"] = jax.random.uniform(
            kw, (fan_out, fan_in), jnp.float32, -bound, bound)
        params[name + "_b"] = jax.random.uniform(
            kb, (fan_out,), jnp.float32, -bound, bound)
    return params


def prepare_params(params):
    """One-time transform (outside the forward hot path): transpose to (in,out),
    fuse fc21/fc22, zero-pad to lane-dense widths, cast matmul weights to bf16."""
    H = params["fc21_w"].shape[0]
    assert H <= HP

    w1 = params["fc1_w"].T.astype(jnp.bfloat16)                           # (784, 500)
    b1 = params["fc1_b"].reshape(1, -1).astype(jnp.float32)               # (1, 500)

    wml = jnp.zeros((MID_DIM, 2 * HP), jnp.float32)
    wml = wml.at[:, :H].set(params["fc21_w"].T)
    wml = wml.at[:, HP:HP + H].set(params["fc22_w"].T)
    bml = jnp.zeros((1, 2 * HP), jnp.float32)
    bml = bml.at[0, :H].set(params["fc21_b"])
    bml = bml.at[0, HP:HP + H].set(params["fc22_b"])

    w3 = jnp.zeros((HP, MID_DIM), jnp.float32).at[:H, :].set(params["fc3_w"].T)
    b3 = params["fc3_b"].reshape(1, -1).astype(jnp.float32)

    w4 = jnp.zeros((MID_DIM, DEC_PAD), jnp.float32).at[:, :IN_DIM].set(params["fc4_w"].T)
    b4 = jnp.zeros((1, DEC_PAD), jnp.float32).at[0, :IN_DIM].set(params["fc4_b"])

    return dict(
        hidden=H,
        w1=w1, b1=b1,
        wml=wml.astype(jnp.bfloat16), bml=bml,
        w3=w3.astype(jnp.bfloat16), b3=b3,
        w4=w4.astype(jnp.bfloat16), b4=b4,
    )


def vae_encoder_forward(x_nchw, prepped, eps, *, block_b=256):
    H = prepped["hidden"]
    B = x_nchw.shape[0]
    x = x_nchw.reshape(B, IN_DIM).astype(jnp.float32)          # x.view(-1, 784)

    # Batch tiling (sublane-aligned). 256-row tiles keep VMEM well under limits
    # on all generations (v7x has only 64 MiB physical VMEM).
    tb = min(_round_up(B, 8), _round_up(block_b, 8))
    Bp = _round_up(B, tb)
    x_p = jnp.zeros((Bp, IN_DIM), jnp.float32).at[:B].set(x)
    eps_p = jnp.zeros((Bp, HP), jnp.float32).at[:B, :H].set(eps.astype(jnp.float32))

    grid = (Bp // tb,)

    def tile_spec(cols):
        return pl.BlockSpec((tb, cols), lambda i: (i, 0))

    def resident_spec(shape):   # weights: same block every step -> stays in VMEM
        return pl.BlockSpec(shape, lambda i: (0, 0))

    weights = (prepped["w1"], prepped["b1"], prepped["wml"], prepped["bml"],
               prepped["w3"], prepped["b3"], prepped["w4"], prepped["b4"])

    in_specs = [tile_spec(IN_DIM), tile_spec(HP)] + \
               [resident_spec(w.shape) for w in weights]
    out_specs = (tile_spec(DEC_PAD), tile_spec(2 * HP))
    out_shape = (jax.ShapeDtypeStruct((Bp, DEC_PAD), jnp.float32),
                 jax.ShapeDtypeStruct((Bp, 2 * HP), jnp.float32))

    flops = 2 * Bp * (IN_DIM * MID_DIM + MID_DIM * 2 * HP
                      + HP * MID_DIM + MID_DIM * DEC_PAD)
    bytes_accessed = (x_p.size * 4 + eps_p.size * 4
                      + sum(int(w.size) * w.dtype.itemsize for w in weights)
                      + Bp * DEC_PAD * 4 + Bp * 2 * HP * 4)
    cost = pl.CostEstimate(flops=flops,
                           transcendentals=Bp * (HP + 2 * DEC_PAD),
                           bytes_accessed=bytes_accessed)

    dec_p, mulv_p = pl.pallas_call(
        vae_forward_kernel,
        grid=grid,
        in_specs=in_specs,
        out_specs=out_specs,
        out_shape=out_shape,
        compiler_params=pltpu.CompilerParams(
            dimension_semantics=("parallel",),
            vmem_limit_bytes=32 * 1024 * 1024),
        cost_estimate=cost,
    )(x_p, eps_p, *weights)

    dec = dec_p[:B, :IN_DIM]
    mu = mulv_p[:B, :H]
    logvar = mulv_p[:B, HP:HP + H]
    return dec, mu, logvar


if __name__ == "__main__":
    key = jax.random.PRNGKey(0)
    key, kx, keps, kp = jax.random.split(key, 4)

    B = 2
    x = jax.random.uniform(kx, (B, 1, 28, 28), jnp.float32)      # NCHW, 1*28*28 = 784
    params = init_params(kp, hidden_size=HIDDEN)
    prepped = prepare_params(params)                             # one-time weight prep
    # TODO(synk): eps is kept as an explicit U[0,1) input (matches torch.rand_like,
    # deterministic for testing) rather than generated in-kernel via pltpu.prng_*.
    eps = jax.random.uniform(keps, (B, HIDDEN), jnp.float32)

    dec, mu, logvar = vae_encoder_forward(x, prepped, eps)
    jax.block_until_ready((dec, mu, logvar))

    assert dec.shape == (B, IN_DIM) and mu.shape == (B, HIDDEN) and logvar.shape == (B, HIDDEN)
    assert bool(jnp.all(jnp.isfinite(dec))) and bool(jnp.all((dec >= 0) & (dec <= 1)))
    assert bool(jnp.all(jnp.isfinite(mu))) and bool(jnp.all(jnp.isfinite(logvar)))
    print("KERNEL_OK")
</pallas_src>

<mosaic_0001>
module attributes {stable_mosaic.version = 11 : i64} {
  func.func @vae_forward_kernel(%arg0: i32, %arg1: memref<8x784xf32, #tpu.memory_space<vmem>>, %arg2: memref<8x128xf32, #tpu.memory_space<vmem>>, %arg3: memref<784x500xbf16, #tpu.memory_space<vmem>>, %arg4: memref<1x500xf32, #tpu.memory_space<vmem>>, %arg5: memref<500x256xbf16, #tpu.memory_space<vmem>>, %arg6: memref<1x256xf32, #tpu.memory_space<vmem>>, %arg7: memref<128x500xbf16, #tpu.memory_space<vmem>>, %arg8: memref<1x500xf32, #tpu.memory_space<vmem>>, %arg9: memref<500x896xbf16, #tpu.memory_space<vmem>>, %arg10: memref<1x896xf32, #tpu.memory_space<vmem>>, %arg11: memref<8x896xf32, #tpu.memory_space<vmem>>, %arg12: memref<8x256xf32, #tpu.memory_space<vmem>>) attributes {dimension_semantics = [#tpu.dimension_semantics<parallel>], iteration_bounds = array<i64: 1>, scalar_prefetch = 0 : i64, scratch_operands = 0 : i64, tpu.core_type = #tpu.core_type<tc>, window_params = [{transform_indices = @transform_0, window_bounds = array<i64: 8, 784>}, {transform_indices = @transform_1, window_bounds = array<i64: 8, 128>}, {pipeline_mode = #tpu.pipeline_mode<synchronous>, transform_indices = @transform_2, window_bounds = array<i64: 784, 500>}, {pipeline_mode = #tpu.pipeline_mode<synchronous>, transform_indices = @transform_3, window_bounds = array<i64: 1, 500>}, {pipeline_mode = #tpu.pipeline_mode<synchronous>, transform_indices = @transform_4, window_bounds = array<i64: 500, 256>}, {pipeline_mode = #tpu.pipeline_mode<synchronous>, transform_indices = @transform_5, window_bounds = array<i64: 1, 256>}, {pipeline_mode = #tpu.pipeline_mode<synchronous>, transform_indices = @transform_6, window_bounds = array<i64: 128, 500>}, {pipeline_mode = #tpu.pipeline_mode<synchronous>, transform_indices = @transform_7, window_bounds = array<i64: 1, 500>}, {pipeline_mode = #tpu.pipeline_mode<synchronous>, transform_indices = @transform_8, window_bounds = array<i64: 500, 896>}, {pipeline_mode = #tpu.pipeline_mode<synchronous>, transform_indices = @transform_9, window_bounds = array<i64: 1, 896>}, {transform_indices = @transform_10, window_bounds = array<i64: 8, 896>}, {transform_indices = @transform_11, window_bounds = array<i64: 8, 256>}]} {
    %c0 = arith.constant 0 : index
    %c0_0 = arith.constant 0 : index
    %0 = vector.load %arg1[%c0, %c0_0] : memref<8x784xf32, #tpu.memory_space<vmem>>, vector<8x784xf32>
    %1 = arith.truncf %0 : vector<8x784xf32> to vector<8x784xbf16>
    %c0_1 = arith.constant 0 : index
    %c0_2 = arith.constant 0 : index
    %2 = vector.load %arg3[%c0_1, %c0_2] : memref<784x500xbf16, #tpu.memory_space<vmem>>, vector<784x500xbf16>
    %cst = arith.constant dense<0.000000e+00> : vector<8x500xf32>
    %3 = tpu.matmul %1, %2, %cst {dimension_numbers = #tpu.dot_dimension_numbers<[1], [0], [0], [1], [0, 0, 1, 1], [], []>} : vector<8x784xbf16>, vector<784x500xbf16>, vector<8x500xf32> -> vector<8x500xf32>
    %c0_3 = arith.constant 0 : index
    %c0_4 = arith.constant 0 : index
    %4 = vector.load %arg4[%c0_3, %c0_4] : memref<1x500xf32, #tpu.memory_space<vmem>>, vector<1x500xf32>
    %5 = vector.broadcast %4 : vector<1x500xf32> to vector<8x500xf32>
    %6 = arith.addf %3, %5 : vector<8x500xf32>
    %cst_5 = arith.constant 0.000000e+00 : f32
    %7 = vector.broadcast %cst_5 : f32 to vector<8x500xf32>
    %8 = arith.maximumf %6, %7 : vector<8x500xf32>
    %9 = arith.truncf %8 : vector<8x500xf32> to vector<8x500xbf16>
    %c0_6 = arith.constant 0 : index
    %c0_7 = arith.constant 0 : index
    %10 = vector.load %arg5[%c0_6, %c0_7] : memref<500x256xbf16, #tpu.memory_space<vmem>>, vector<500x256xbf16>
    %cst_8 = arith.constant dense<0.000000e+00> : vector<8x256xf32>
    %11 = tpu.matmul %9, %10, %cst_8 {dimension_numbers = #tpu.dot_dimension_numbers<[1], [0], [0], [1], [0, 0, 1, 1], [], []>} : vector<8x500xbf16>, vector<500x256xbf16>, vector<8x256xf32> -> vector<8x256xf32>
    %c0_9 = arith.constant 0 : index
    %c0_10 = arith.constant 0 : index
    %12 = vector.load %arg6[%c0_9, %c0_10] : memref<1x256xf32, #tpu.memory_space<vmem>>, vector<1x256xf32>
    %13 = vector.broadcast %12 : vector<1x256xf32> to vector<8x256xf32>
    %14 = arith.addf %11, %13 : vector<8x256xf32>
    %c0_11 = arith.constant 0 : index
    %c0_12 = arith.constant 0 : index
    %15 = vector.load %arg12[%c0_11, %c0_12] : memref<8x256xf32, #tpu.memory_space<vmem>>, vector<8x256xf32>
    tpu.vector_store %arg12[%c0_11, %c0_12], %14 {strides = array<i32>} : memref<8x256xf32, #tpu.memory_space<vmem>>, vector<8x256xf32>,
    %16 = vector.extract_strided_slice %14 {offsets = [0, 0], sizes = [8, 128], strides = [1, 1]} : vector<8x256xf32> to vector<8x128xf32>
    %17 = vector.extract_strided_slice %14 {offsets = [0, 128], sizes = [8, 128], strides = [1, 1]} : vector<8x256xf32> to vector<8x128xf32>
    %cst_13 = arith.constant 5.000000e-01 : f32
    %18 = vector.broadcast %cst_13 : f32 to vector<8x128xf32>
    %19 = arith.mulf %18, %17 : vector<8x128xf32>
    %20 = math.exp %19 : vector<8x128xf32>
    %c0_14 = arith.constant 0 : index
    %c0_15 = arith.constant 0 : index
    %21 = vector.load %arg2[%c0_14, %c0_15] : memref<8x128xf32, #tpu.memory_space<vmem>>, vector<8x128xf32>
    %22 = arith.mulf %21, %20 : vector<8x128xf32>
    %23 = arith.addf %16, %22 : vector<8x128xf32>
    %24 = arith.truncf %23 : vector<8x128xf32> to vector<8x128xbf16>
    %c0_16 = arith.constant 0 : index
    %c0_17 = arith.constant 0 : index
    %25 = vector.load %arg7[%c0_16, %c0_17] : memref<128x500xbf16, #tpu.memory_space<vmem>>, vector<128x500xbf16>
    %cst_18 = arith.constant dense<0.000000e+00> : vector<8x500xf32>
    %26 = tpu.matmul %24, %25, %cst_18 {dimension_numbers = #tpu.dot_dimension_numbers<[1], [0], [0], [1], [0, 0, 1, 1], [], []>} : vector<8x128xbf16>, vector<128x500xbf16>, vector<8x500xf32> -> vector<8x500xf32>
    %c0_19 = arith.constant 0 : index
    %c0_20 = arith.constant 0 : index
    %27 = vector.load %arg8[%c0_19, %c0_20] : memref<1x500xf32, #tpu.memory_space<vmem>>, vector<1x500xf32>
    %28 = vector.broadcast %27 : vector<1x500xf32> to vector<8x500xf32>
    %29 = arith.addf %26, %28 : vector<8x500xf32>
    %cst_21 = arith.constant 0.000000e+00 : f32
    %30 = vector.broadcast %cst_21 : f32 to vector<8x500xf32>
    %31 = arith.maximumf %29, %30 : vector<8x500xf32>
    %32 = arith.truncf %31 : vector<8x500xf32> to vector<8x500xbf16>
    %c0_22 = arith.constant 0 : index
    %c0_23 = arith.constant 0 : index
    %33 = vector.load %arg9[%c0_22, %c0_23] : memref<500x896xbf16, #tpu.memory_space<vmem>>, vector<500x896xbf16>
    %cst_24 = arith.constant dense<0.000000e+00> : vector<8x896xf32>
    %34 = tpu.matmul %32, %33, %cst_24 {dimension_numbers = #tpu.dot_dimension_numbers<[1], [0], [0], [1], [0, 0, 1, 1], [], []>} : vector<8x500xbf16>, vector<500x896xbf16>, vector<8x896xf32> -> vector<8x896xf32>
    %c0_25 = arith.constant 0 : index
    %c0_26 = arith.constant 0 : index
    %35 = vector.load %arg10[%c0_25, %c0_26] : memref<1x896xf32, #tpu.memory_space<vmem>>, vector<1x896xf32>
    %36 = vector.broadcast %35 : vector<1x896xf32> to vector<8x896xf32>
    %37 = arith.addf %34, %36 : vector<8x896xf32>
    %cst_27 = arith.constant 0.000000e+00 : f32
    %38 = vector.broadcast %cst_27 : f32 to vector<8x896xf32>
    %39 = arith.subf %38, %37 : vector<8x896xf32>
    %40 = math.exp %39 : vector<8x896xf32>
    %cst_28 = arith.constant 1.000000e+00 : f32
    %41 = vector.broadcast %cst_28 : f32 to vector<8x896xf32>
    %42 = arith.addf %41, %40 : vector<8x896xf32>
    %43 = tpu.reciprocal %42 {approx = true} : vector<8x896xf32> -> vector<8x896xf32>
    %cst_29 = arith.constant 1.000000e+00 : f32
    %44 = vector.broadcast %cst_29 : f32 to vector<8x896xf32>
    %45 = arith.minimumf %43, %44 : vector<8x896xf32>
    %c0_30 = arith.constant 0 : index
    %c0_31 = arith.constant 0 : index
    %46 = vector.load %arg11[%c0_30, %c0_31] : memref<8x896xf32, #tpu.memory_space<vmem>>, vector<8x896xf32>
    tpu.vector_store %arg11[%c0_30, %c0_31], %45 {strides = array<i32>} : memref<8x896xf32, #tpu.memory_space<vmem>>, vector<8x896xf32>,
    return
  }
  func.func @transform_0(%arg0: i32) -> (i32, i32) {
    %c0_i32 = arith.constant 0 : i32
    %c0_i32_0 = arith.constant 0 : i32
    return %arg0, %c0_i32 : i32, i32
  }
  func.func @transform_1(%arg0: i32) -> (i32, i32) {
    %c0_i32 = arith.constant 0 : i32
    %c0_i32_0 = arith.constant 0 : i32
    return %arg0, %c0_i32 : i32, i32
  }
  func.func @transform_2(%arg0: i32) -> (i32, i32) {
    %c0_i32 = arith.constant 0 : i32
    %c0_i32_0 = arith.constant 0 : i32
    %c0_i32_1 = arith.constant 0 : i32
    return %c0_i32, %c0_i32_0 : i32, i32
  }
  func.func @transform_3(%arg0: i32) -> (i32, i32) {
    %c0_i32 = arith.constant 0 : i32
    %c0_i32_0 = arith.constant 0 : i32
    %c0_i32_1 = arith.constant 0 : i32
    return %c0_i32, %c0_i32_0 : i32, i32
  }
  func.func @transform_4(%arg0: i32) -> (i32, i32) {
    %c0_i32 = arith.constant 0 : i32
    %c0_i32_0 = arith.constant 0 : i32
    %c0_i32_1 = arith.constant 0 : i32
    return %c0_i32, %c0_i32_0 : i32, i32
  }
  func.func @transform_5(%arg0: i32) -> (i32, i32) {
    %c0_i32 = arith.constant 0 : i32
    %c0_i32_0 = arith.constant 0 : i32
    %c0_i32_1 = arith.constant 0 : i32
    return %c0_i32, %c0_i32_0 : i32, i32
  }
  func.func @transform_6(%arg0: i32) -> (i32, i32) {
    %c0_i32 = arith.constant 0 : i32
    %c0_i32_0 = arith.constant 0 : i32
    %c0_i32_1 = arith.constant 0 : i32
    return %c0_i32, %c0_i32_0 : i32, i32
  }
  func.func @transform_7(%arg0: i32) -> (i32, i32) {
    %c0_i32 = arith.constant 0 : i32
    %c0_i32_0 = arith.constant 0 : i32
    %c0_i32_1 = arith.constant 0 : i32
    return %c0_i32, %c0_i32_0 : i32, i32
  }
  func.func @transform_8(%arg0: i32) -> (i32, i32) {
    %c0_i32 = arith.constant 0 : i32
    %c0_i32_0 = arith.constant 0 : i32
    %c0_i32_1 = arith.constant 0 : i32
    return %c0_i32, %c0_i32_0 : i32, i32
  }
  func.func @transform_9(%arg0: i32) -> (i32, i32) {
    %c0_i32 = arith.constant 0 : i32
    %c0_i32_0 = arith.constant 0 : i32
    %c0_i32_1 = arith.constant 0 : i32
    return %c0_i32, %c0_i32_0 : i32, i32
  }
  func.func @transform_10(%arg0: i32) -> (i32, i32) {
    %c0_i32 = arith.constant 0 : i32
    %c0_i32_0 = arith.constant 0 : i32
    return %arg0, %c0_i32 : i32, i32
  }
  func.func @transform_11(%arg0: i32) -> (i32, i32) {
    %c0_i32 = arith.constant 0 : i32
    %c0_i32_0 = arith.constant 0 : i32
    return %arg0, %c0_i32 : i32, i32
  }
}

</mosaic_0001>

<bundles_post_ra>
// kernel: tpu_custom_call.1
= control target key start
LH: loop header
LB: loop body
LE: loop exit
PB: predicated region body
PF: predicated region fallthrough
CT: control target
= control target key end

     0   :  { %17 = vsyncpa [#allocation3], 0  ;;  %s8027_s0 = inlined_call_operand.hbm [shape: f32[8,784], index: 0, kind: input, shape index: {}]   ;;  %s8028_s1 = inlined_call_operand.hbm [shape: f32[8,128], index: 1, kind: input, shape index: {}]   ;;  %s8029_s2 = inlined_call_operand.hbm [shape: bf16[784,500], index: 2, kind: input, shape index: {}]   ;;  %s8030_s3 = inlined_call_operand.hbm [shape: f32[1,500], index: 3, kind: input, shape index: {}]   ;;  %s8031_s4 = inlined_call_operand.vmem [shape: bf16[500,256], index: 4, kind: input, shape index: {}]   ;;  %s8032_s5 = inlined_call_operand.hbm [shape: f32[1,256], index: 5, kind: input, shape index: {}]   ;;  %s8033_s6 = inlined_call_operand.vmem [shape: bf16[128,500], index: 6, kind: input, shape index: {}]   ;;  %s8034_s7 = inlined_call_operand.hbm [shape: f32[1,500], index: 7, kind: input, shape index: {}]   ;;  %s8035_s8 = inlined_call_operand.hbm [shape: bf16[500,896], index: 8, kind: input, shape index: {}]   ;;  %s8036_s9 = inlined_call_operand.vmem [shape: f32[1,896], index: 9, kind: input, shape index: {}]   ;;  %s8037_s10 = inlined_call_operand.hbm [shape: f32[8,896], index: 10, kind: output, shape index: {0}]   ;;  %s8038_s11 = inlined_call_operand.hbm [shape: f32[8,256], index: 11, kind: output, shape index: {1}]  }
   0x1   :  { %18 = vsyncpa [#allocation6], 0 }
   0x2   :  { %19 = vsyncpa [#allocation9], 0 }
   0x3   :  { %20 = vsyncpa [#allocation12], 0 }
   0x4   :  { %21 = vsyncpa [#allocation4], 0  ;;  %s39_s19 = sshll.u32 %s8028_s1, 4  ;;  %s40_s19 = int_to_ptr.hbm [resolvable:$true] %s39_s19 }
   0x5   :  { %22 = vsyncpa [#allocation16], 0  ;;  %s7179_s20 = smov [#allocation5]   ;;  %s63_s24 = sshll.u32 %s8030_s3, 4  ;;  %s64_s24 = int_to_ptr.hbm [resolvable:$true] %s63_s24 }
   0x6   :  { %s41_s21 = sshll.u32 %s7179_s20, 4  ;;  %s7180_s25 = smov [#allocation8]   ;;  %s42_s21 = int_to_ptr.vmem [resolvable:$true] %s41_s21 }
   0x7   :  { %44 = dma.hbm_to_vmem [thread:$0]  %s40_s19, 128, %s42_s21, [#allocation6]  }
   0x8   :  { %s65_s26 = sshll.u32 %s7180_s25, 4  ;;  %s89_s29 = sshll.u32 %s8034_s7, 4  ;;  %s66_s26 = int_to_ptr.vmem [resolvable:$true] %s65_s26  ;;  %s90_s29 = int_to_ptr.hbm [resolvable:$true] %s89_s29 }
   0x9   :  { %68 = dma.hbm_to_vmem [thread:$0]  %s64_s24, 64, %s66_s26, [#allocation9]  }
   0xa   :  { %s28_s12 = sshll.u32 %s8027_s0, 4  ;;  %s7181_s13 = smov [#allocation11]   ;;  %s29_s12 = int_to_ptr.hbm [resolvable:$true] %s28_s12 }
   0xb   :  { %s91_s14 = sshll.u32 %s7181_s13, 4  ;;  %s7182_s3 = smov [#allocation2]   ;;  %s92_s14 = int_to_ptr.vmem [resolvable:$true] %s91_s14 }
   0xc   :  { %94 = dma.hbm_to_vmem [thread:$0]  %s90_s29, 64, %s92_s14, [#allocation12]  }
   0xd   :  { %s30_s15 = sshll.u32 %s7182_s3, 4  ;;  %s49_s18 = sshll.u32 %s8029_s2, 4  ;;  %s31_s15 = int_to_ptr.vmem [resolvable:$true] %s30_s15  ;;  %s50_s18 = int_to_ptr.hbm [resolvable:$true] %s49_s18 }
   0xe   :  { %33 = dma.hbm_to_vmem [thread:$0]  %s29_s12, 896, %s31_s15, [#allocation3]  }
   0xf   :  { %s7183_s7 = smov [#allocation7]   ;;  %s76_s0 = sshll.u32 %s8032_s5, 4  ;;  %s77_s0 = int_to_ptr.hbm [resolvable:$true] %s76_s0 }
  0x10   :  { %s51_s19 = sshll.u32 %s7183_s7, 4  ;;  %s7184_s22 = smov 256   ;;  %s52_s19 = int_to_ptr.vmem [resolvable:$true] %s51_s19 }
  0x11   :  { %s7185_s23 = smov 16   ;;  %s7186_s24 = smov [#allocation10]  }
  0x12   :  { %57 = dma.hbm_to_vmem [thread:$0]  %s50_s18, 25088, %s52_s19, [#allocation6], %s7184_s22, %s7184_s22, %s7185_s23  }
  0x13   :  { %s78_s25 = sshll.u32 %s7186_s24, 4  ;;  %s99_s2 = sshll.u32 %s8035_s8, 4  ;;  %s79_s25 = int_to_ptr.vmem [resolvable:$true] %s78_s25  ;;  %s100_s2 = int_to_ptr.hbm [resolvable:$true] %s99_s2 }
  0x14   :  { %81 = dma.hbm_to_vmem [thread:$0]  %s77_s0, 32, %s79_s25, [#allocation9]  }
  0x15   :  { %s7187_s28 = smov [#allocation13]   ;;  %s7188_s1 = smov 448  }
  0x16   :  { %s101_s29 = sshll.u32 %s7187_s28, 4  ;;  %s7189_s30 = smov 28   ;;  %s102_s29 = int_to_ptr.vmem [resolvable:$true] %s101_s29 }
  0x17   :  { %107 = dma.hbm_to_vmem [thread:$0]  %s100_s2, 28224, %s102_s29, [#allocation12], %s7188_s1, %s7188_s1, %s7189_s30  }
  0x18   :  { %7167 = dma.done.wait [#allocation3], 896  }
  0x19   :  { %7168 = vsyncadd [#allocation3], 4294966400 }
  0x1a   :  { %7169 = dma.done.wait [#allocation6], 25216  }
  0x1b   :  { %7170 = vsyncadd [#allocation6], 4294942080 }
  0x1c   :  { %7171 = dma.done.wait [#allocation9], 96  }
  0x1d   :  { %7172 = vsyncadd [#allocation9], 4294967200 }
  0x1e   :  { %7173 = dma.done.wait [#allocation12], 28288  }
  0x1f   :  { %7174 = vsyncadd [#allocation12], 4294939008  ;;  %v4474_v0 = vld [vmem:[#allocation7 + $0xe0] sm:$0xf]  ;;  %v6431_v1 = vld [vmem:[#allocation7 + $0xec] sm:$0xf0] }
  0x20   :  { %v4602_v2 = vld [vmem:[#allocation7 + $0x1e0] sm:$0xf]  ;;  %v4475_v3 = vor.u32 %v6431_v1, %v4474_v0  ;;  %v6463_v4 = vld [vmem:[#allocation7 + $0x1ec] sm:$0xf0]  ;;  %vm1339_vm0 = vcmask 130048   ;;  %vm2103_vm1 = vcmask 1041408  }
  0x21   :  { %v4730_v5 = vld [vmem:[#allocation7 + $0x2e0] sm:$0xf]  ;;  %v6495_v6 = vld [vmem:[#allocation7 + $0x2ec] sm:$0xf0]  ;;  %v4603_v7 = vor.u32 %v6463_v4, %v4602_v2  ;;  %vm2099_vm2 = vcmask 949248   ;;  %s4342_s21 = sshll.u32 %s8038_s11, 4  ;;  %s4343_s21 = int_to_ptr.hbm [resolvable:$true] %s4342_s21 }
  0x22   :  { %v4731_v8 = vor.u32 %v6495_v6, %v4730_v5  ;;  %v4858_v9 = vld [vmem:[#allocation7 + $0x3e0] sm:$0xf]  ;;  %v6527_v10 = vld [vmem:[#allocation7 + $0x3ec] sm:$0xf0]  ;;  %1343 = vmatpush.bf16.msra.mxu0 %v4475_v3  ;;  %s7191_s11 = smov [#allocation14]   ;;  %s4331_s23 = sshll.u32 %s8037_s10, 4  ;;  %s4332_s23 = int_to_ptr.hbm [resolvable:$true] %s4331_s23 }
  0x23   :  { %v4458_v11 = vld [vmem:[#allocation7 + $0xc0] sm:$0xf]  ;;  %v4859_v12 = vor.u32 %v6527_v10, %v4858_v9  ;;  %v6427_v13 = vld [vmem:[#allocation7 + $0xcc] sm:$0xf0]  ;;  %1356 = vmatpush.bf16.msra.mxu1 %v4603_v7  ;;  %s4329_s0 = sshll.u32 %s7191_s11, 4  ;;  %s4330_s0 = int_to_ptr.vmem [resolvable:$true] %s4329_s0 }
  0x24   :  { %v4586_v14 = vld [vmem:[#allocation7 + $0x1c0] sm:$0xf]  ;;  %v6459_v15 = vld [vmem:[#allocation7 + $0x1cc] sm:$0xf0]  ;;  %1369 = vmatpush.bf16.msra.mxu2 %v4731_v8  ;;  %v4459_v16 = vor.u32 %v6427_v13, %v4458_v11 }
  0x25   :  { %v4587_v17 = vor.u32 %v6459_v15, %v4586_v14  ;;  %v4714_v18 = vld [vmem:[#allocation7 + $0x2c0] sm:$0xf]  ;;  %v6491_v19 = vld [vmem:[#allocation7 + $0x2cc] sm:$0xf0]  ;;  %1382 = vmatpush.bf16.msra.mxu3 %v4859_v12 }
  0x26   :  { %v4842_v20 = vld [vmem:[#allocation7 + $0x3c0] sm:$0xf]  ;;  %v4715_v21 = vor.u32 %v6491_v19, %v4714_v18  ;;  %v6523_v22 = vld [vmem:[#allocation7 + $0x3cc] sm:$0xf0]  ;;  %1344 = vmatpush.bf16.msra.mxu0 %v4459_v16 }
  0x27   :  { %v4442_v23 = vld [vmem:[#allocation7 + $0xa0] sm:$0xf]  ;;  %v6423_v24 = vld [vmem:[#allocation7 + $0xac] sm:$0xf0]  ;;  %v4843_v25 = vor.u32 %v6523_v22, %v4842_v20  ;;  %1357 = vmatpush.bf16.msra.mxu1 %v4587_v17 }
  0x28   :  { %v4570_v26 = vld [vmem:[#allocation7 + $0x1a0] sm:$0xf]  ;;  %v6455_v27 = vld [vmem:[#allocation7 + $0x1ac] sm:$0xf0]  ;;  %v4443_v29 = vor.u32 %v6423_v24, %v4442_v23  ;;  %1370 = vmatpush.bf16.msra.mxu2 %v4715_v21 }
  0x29   :  { %v4698_v28 = vld [vmem:[#allocation7 + $0x2a0] sm:$0xf]  ;;  %v6487_v30 = vld [vmem:[#allocation7 + $0x2ac] sm:$0xf0]  ;;  %v4571_v33 = vor.u32 %v6455_v27, %v4570_v26  ;;  %1383 = vmatpush.bf16.msra.mxu3 %v4843_v25 }
  0x2a   :  { %v4826_v31 = vld [vmem:[#allocation7 + $0x3a0] sm:$0xf]  ;;  %v6519_v32 = vld [vmem:[#allocation7 + $0x3ac] sm:$0xf0]  ;;  %v4699_v34 = vor.u32 %v6487_v30, %v4698_v28  ;;  %1345 = vmatpush.bf16.msra.mxu0 %v4443_v29 }
  0x2b   :  { %v4426_v35 = vld [vmem:[#allocation7 + $0x80] sm:$0xf]  ;;  %v6419_v36 = vld [vmem:[#allocation7 + $0x8c] sm:$0xf0]  ;;  %v4827_v38 = vor.u32 %v6519_v32, %v4826_v31  ;;  %1358 = vmatpush.bf16.msra.mxu1 %v4571_v33  ;;  %v6429_v33 = vld [vmem:[#allocation7 + $0xe4] sm:$0xf] }
  0x2c   :  { %v4554_v37 = vld [vmem:[#allocation7 + $0x180] sm:$0xf]  ;;  %v6451_v39 = vld [vmem:[#allocation7 + $0x18c] sm:$0xf0]  ;;  %v4427_v44 = vor.u32 %v6419_v36, %v4426_v35  ;;  %1371 = vmatpush.bf16.msra.mxu2 %v4699_v34  ;;  %v4476_v34 = vld [vmem:[#allocation7 + $0xf0] sm:$0xf0] }
  0x2d   :  { %v4682_v40 = vld [vmem:[#allocation7 + $0x280] sm:$0xf]  ;;  %v6483_v41 = vld [vmem:[#allocation7 + $0x28c] sm:$0xf0]  ;;  %v4555_v45 = vor.u32 %v6451_v39, %v4554_v37  ;;  %1384 = vmatpush.bf16.msra.mxu3 %v4827_v38 }
  0x2e   :  { %v4810_v42 = vld [vmem:[#allocation7 + $0x380] sm:$0xf]  ;;  %v6515_v43 = vld [vmem:[#allocation7 + $0x38c] sm:$0xf0]  ;;  %v4683_v46 = vor.u32 %v6483_v41, %v4682_v40  ;;  %1346 = vmatpush.bf16.msra.mxu0 %v4427_v44  ;;  %v4604_v44 = vld [vmem:[#allocation7 + $0x1f0] sm:$0xf0] }
  0x2f   :  { %v4410_v47 = vld [vmem:[#allocation7 + $0x60] sm:$0xf]  ;;  %v6415_v48 = vld [vmem:[#allocation7 + $0x6c] sm:$0xf0]  ;;  %v4811_v50 = vor.u32 %v6515_v43, %v4810_v42  ;;  %1359 = vmatpush.bf16.msra.mxu1 %v4555_v45  ;;  %v6461_v43 = vld [vmem:[#allocation7 + $0x1e4] sm:$0xf] }
  0x30   :  { %v4538_v49 = vld [vmem:[#allocation7 + $0x160] sm:$0xf]  ;;  %v6447_v51 = vld [vmem:[#allocation7 + $0x16c] sm:$0xf0]  ;;  %v4411_v56 = vor.u32 %v6415_v48, %v4410_v47  ;;  %1372 = vmatpush.bf16.msra.mxu2 %v4683_v46  ;;  %v142_v45 = vld [vmem:[#allocation2 + $0x18] sm:$0xff]  ;;  %v4479_v47 = vor.u32 %v6429_v33, %v4476_v34 }
  0x31   :  { %v4666_v52 = vld [vmem:[#allocation7 + $0x260] sm:$0xf]  ;;  %v6479_v53 = vld [vmem:[#allocation7 + $0x26c] sm:$0xf0]  ;;  %v4539_v57 = vor.u32 %v6447_v51, %v4538_v49  ;;  %1385 = vmatpush.bf16.msra.mxu3 %v4811_v50 }
  0x32   :  { %v4794_v54 = vld [vmem:[#allocation7 + $0x360] sm:$0xf]  ;;  %v6511_v55 = vld [vmem:[#allocation7 + $0x36c] sm:$0xf0]  ;;  %v4667_v58 = vor.u32 %v6479_v53, %v4666_v52  ;;  %1347 = vmatpush.bf16.msra.mxu0 %v4411_v56  ;;  %v6425_v53 = vld [vmem:[#allocation7 + $0xc4] sm:$0xf] }
  0x33   :  { %v4394_v59 = vld [vmem:[#allocation7 + $0x40] sm:$0xf]  ;;  %v6411_v60 = vld [vmem:[#allocation7 + $0x4c] sm:$0xf0]  ;;  %v4795_v62 = vor.u32 %v6511_v55, %v4794_v54  ;;  %1360 = vmatpush.bf16.msra.mxu1 %v4539_v57  ;;  %v4460_v54 = vld [vmem:[#allocation7 + $0xd0] sm:$0xf0]  ;;  %v7277_v57 = vpack.c.bf16 %v142_v45, %v142_v45 }
  0x34   :  { %v4522_v61 = vld [vmem:[#allocation7 + $0x140] sm:$0xf]  ;;  %v6443_v63 = vld [vmem:[#allocation7 + $0x14c] sm:$0xf0]  ;;  %v4395_v4 = vor.u32 %v6411_v60, %v4394_v59  ;;  %1373 = vmatpush.bf16.msra.mxu2 %v4667_v58  ;;  %v140_v58 = vld [vmem:[#allocation2 + $0x8] sm:$0xff]  ;;  %v4607_v59 = vor.u32 %v6461_v43, %v4604_v44 }
  0x35   :  { %v4650_v0 = vld [vmem:[#allocation7 + $0x240] sm:$0xf]  ;;  %v6475_v1 = vld [vmem:[#allocation7 + $0x24c] sm:$0xf0]  ;;  %v4523_v5 = vor.u32 %v6443_v63, %v4522_v61  ;;  %1386 = vmatpush.bf16.msra.mxu3 %v4795_v62  ;;  %v6457_v61 = vld [vmem:[#allocation7 + $0x1c4] sm:$0xf] }
  0x36   :  { %v4778_v2 = vld [vmem:[#allocation7 + $0x340] sm:$0xf]  ;;  %v6507_v3 = vld [vmem:[#allocation7 + $0x34c] sm:$0xf0]  ;;  %v4651_v6 = vor.u32 %v6475_v1, %v4650_v0  ;;  %1348 = vmatpush.bf16.msra.mxu0 %v4395_v4  ;;  %v4588_v62 = vld [vmem:[#allocation7 + $0x1d0] sm:$0xf0]  ;;  %v4463_v0 = vor.u32 %v6425_v53, %v4460_v54 }
  0x37   :  { %v4378_v7 = vld [vmem:[#allocation7 + $0x20] sm:$0xf]  ;;  %v6407_v8 = vld [vmem:[#allocation7 + $0x2c] sm:$0xf0]  ;;  %v4779_v10 = vor.u32 %v6507_v3, %v4778_v2  ;;  %1361 = vmatpush.bf16.msra.mxu1 %v4523_v5  ;;  %v6421_v5 = vld [vmem:[#allocation7 + $0xa4] sm:$0xf] }
  0x38   :  { %v4506_v9 = vld [vmem:[#allocation7 + $0x120] sm:$0xf]  ;;  %v6439_v11 = vld [vmem:[#allocation7 + $0x12c] sm:$0xf0]  ;;  %v4379_v16 = vor.u32 %v6407_v8, %v4378_v7  ;;  %1374 = vmatpush.bf16.msra.mxu2 %v4651_v6  ;;  %v4444_v6 = vld [vmem:[#allocation7 + $0xb0] sm:$0xf0]  ;;  %v7281_v7 = vpack.c.bf16 %v140_v58, %v140_v58  ;;  %v4591_v8 = vor.u32 %v6457_v61, %v4588_v62 }
  0x39   :  { %v4634_v12 = vld [vmem:[#allocation7 + $0x220] sm:$0xf]  ;;  %v6471_v13 = vld [vmem:[#allocation7 + $0x22c] sm:$0xf0]  ;;  %v4507_v20 = vor.u32 %v6439_v11, %v4506_v9  ;;  %1387 = vmatpush.bf16.msra.mxu3 %v4779_v10  ;;  %v6453_v10 = vld [vmem:[#allocation7 + $0x1a4] sm:$0xf] }
  0x3a   :  { %v4762_v14 = vld [vmem:[#allocation7 + $0x320] sm:$0xf]  ;;  %v6503_v15 = vld [vmem:[#allocation7 + $0x32c] sm:$0xf0]  ;;  %v4635_v21 = vor.u32 %v6471_v13, %v4634_v12  ;;  %1349 = vmatpush.bf16.msra.mxu0 %v4379_v16  ;;  %v4572_v11 = vld [vmem:[#allocation7 + $0x1b0] sm:$0xf0]  ;;  %v4447_v13 = vor.u32 %v6421_v5, %v4444_v6 }
  0x3b   :  { %v4362_v17 = vld [vmem:[#allocation7] sm:$0xf]  ;;  %v6403_v18 = vld [vmem:[#allocation7 + $0xc] sm:$0xf0]  ;;  %v4763_v25 = vor.u32 %v6503_v15, %v4762_v14  ;;  %1362 = vmatpush.bf16.msra.mxu1 %v4507_v20  ;;  %v4575_v20 = vor.u32 %v6453_v10, %v4572_v11  ;;  %v6409_v43 = vld [vmem:[#allocation7 + $0x44] sm:$0xf] }
  0x3c   :  { %v4490_v19 = vld [vmem:[#allocation7 + $0x100] sm:$0xf]  ;;  %v6435_v22 = vld [vmem:[#allocation7 + $0x10c] sm:$0xf0]  ;;  %v4363_v32 = vor.u32 %v6403_v18, %v4362_v17  ;;  %1375 = vmatpush.bf16.msra.mxu2 %v4635_v21  ;;  %v6417_v18 = vld [vmem:[#allocation7 + $0x84] sm:$0xf] }
  0x3d   :  { %v4618_v23 = vld [vmem:[#allocation7 + $0x200] sm:$0xf]  ;;  %v6467_v24 = vld [vmem:[#allocation7 + $0x20c] sm:$0xf0]  ;;  %v4491_v36 = vor.u32 %v6435_v22, %v4490_v19  ;;  %1388 = vmatpush.bf16.msra.mxu3 %v4763_v25  ;;  %v4428_v19 = vld [vmem:[#allocation7 + $0x90] sm:$0xf0] }
  0x3e   :  { %v4746_v26 = vld [vmem:[#allocation7 + $0x300] sm:$0xf]  ;;  %v6499_v27 = vld [vmem:[#allocation7 + $0x30c] sm:$0xf0]  ;;  %v4619_v37 = vor.u32 %v6467_v24, %v4618_v23  ;;  %1350 = vmatpush.bf16.msra.mxu0 %v4363_v32  ;;  %v6449_v22 = vld [vmem:[#allocation7 + $0x184] sm:$0xf]  ;;  %v4431_v25 = vor.u32 %v6417_v18, %v4428_v19 }
  0x3f   :  { %v4986_v28 = vld [vmem:[#allocation7 + $0x4e0] sm:$0xf]  ;;  %v6559_v29 = vld [vmem:[#allocation7 + $0x4ec] sm:$0xf0]  ;;  %v4747_v41 = vor.u32 %v6499_v27, %v4746_v26  ;;  %1363 = vmatpush.bf16.msra.mxu1 %v4491_v36  ;;  %v4556_v23 = vld [vmem:[#allocation7 + $0x190] sm:$0xf0] }
  0x40   :  { %v5114_v30 = vld [vmem:[#allocation7 + $0x5e0] sm:$0xf]  ;;  %v6591_v31 = vld [vmem:[#allocation7 + $0x5ec] sm:$0xf0]  ;;  %v4987_v42 = vor.u32 %v6559_v29, %v4986_v28  ;;  %1376 = vmatpush.bf16.msra.mxu2 %v4619_v37  ;;  %v4559_v33 = vor.u32 %v6449_v22, %v4556_v23  ;;  %v4540_v36 = vld [vmem:[#allocation7 + $0x170] sm:$0xf0] }
  0x41   :  { %v141_v35 = vld [vmem:[#allocation2 + $0x10] sm:$0xff]  ;;  %v5130_v38 = vld [vmem:[#allocation7 + $0x600] sm:$0xf]  ;;  %v5115_v46 = vor.u32 %v6591_v31, %v5114_v30  ;;  %1389 = vmatpush.bf16.msra.mxu3 %v4747_v41  ;;  %v6413_v30 = vld [vmem:[#allocation7 + $0x64] sm:$0xf] }
  0x42   :  { %v6595_v39 = vld [vmem:[#allocation7 + $0x60c] sm:$0xf0]  ;;  %v139_v40 = vld [vmem:[#allocation2] sm:$0xff]  ;;  %v7273_v51 = vpack.c.bf16 %v141_v35, %v141_v35  ;;  %1395 = vmatpush.bf16.msrb.mxu0 %v4987_v42  ;;  %1364 = vmatmul.bf16.vlgmr.msra.gmra.mxu1 %v7281_v7  ;;  %v4412_v31 = vld [vmem:[#allocation7 + $0x70] sm:$0xf0] }
  0x43   :  { %v4970_v48 = vld [vmem:[#allocation7 + $0x4c0] sm:$0xf]  ;;  %v6555_v49 = vld [vmem:[#allocation7 + $0x4cc] sm:$0xf0]  ;;  %v7275_v55 = vpack.c.bf16 %v139_v40, %v139_v40  ;;  %v5131_v56 = vor.u32 %v6595_v39, %v5130_v38  ;;  %1408 = vmatpush.bf16.msrb.mxu1 %v5115_v46  ;;  %v6445_v35 = vld [vmem:[#allocation7 + $0x164] sm:$0xf]  ;;  %v4415_v38 = vor.u32 %v6413_v30, %v4412_v31 }
  0x44   :  { %v5098_v50 = vld [vmem:[#allocation7 + $0x5c0] sm:$0xf]  ;;  %v6587_v52 = vld [vmem:[#allocation7 + $0x5cc] sm:$0xf0]  ;;  %v4971_v60 = vor.u32 %v6555_v49, %v4970_v48  ;;  %1377 = vmatmul.bf16.vlgmr.msra.gmra.mxu2 %v7273_v51  ;;  %1390 = vmatmul.bf16.vlgmr.msra.gmra.mxu3 %v7277_v57  ;;  %v4396_v44 = vld [vmem:[#allocation7 + $0x50] sm:$0xf0]  ;;  %v4543_v46 = vor.u32 %v6445_v35, %v4540_v36 }
  0x45   :  { %1434 = vmatpush.bf16.msrb.mxu3 %v4479_v47  ;;  %v5099_v63 = vor.u32 %v6587_v52, %v5098_v50  ;;  %v4954_v1 = vld [vmem:[#allocation7 + $0x4a0] sm:$0xf]  ;;  %v6551_v2 = vld [vmem:[#allocation7 + $0x4ac] sm:$0xf0]  ;;  %1351 = vmatmul.bf16.vlgmr.msra.gmra.mxu0 %v7275_v55  ;;  %v6441_v48 = vld [vmem:[#allocation7 + $0x144] sm:$0xf]  ;;  %v4399_v52 = vor.u32 %v6409_v43, %v4396_v44 }
  0x46   :  { %v5082_v3 = vld [vmem:[#allocation7 + $0x5a0] sm:$0xf]  ;;  %v6583_v4 = vld [vmem:[#allocation7 + $0x5ac] sm:$0xf0]  ;;  %1428 = vmatpush.bf16.msrb.mxu2 %v5131_v56  ;;  %1396 = vmatpush.bf16.msrb.mxu0 %v4971_v60  ;;  %v4955_v9 = vor.u32 %v6551_v2, %v4954_v1  ;;  %v4524_v49 = vld [vmem:[#allocation7 + $0x150] sm:$0xf0] }
  0x47   :  { %1409 = vmatpush.bf16.msrb.mxu1 %v5099_v63  ;;  %v5083_v12 = vor.u32 %v6583_v4, %v5082_v3  ;;  %v4938_v14 = vld [vmem:[#allocation7 + $0x480] sm:$0xf]  ;;  %v6547_v15 = vld [vmem:[#allocation7 + $0x48c] sm:$0xf0]  ;;  %v4380_v60 = vld [vmem:[#allocation7 + $0x30] sm:$0xf0]  ;;  %v4527_v61 = vor.u32 %v6441_v48, %v4524_v49 }
  0x48   :  { %v5066_v16 = vld [vmem:[#allocation7 + $0x580] sm:$0xf]  ;;  %v6579_v17 = vld [vmem:[#allocation7 + $0x58c] sm:$0xf0]  ;;  %v4939_v21 = vor.u32 %v6547_v15, %v4938_v14  ;;  %v6437_v63 = vld [vmem:[#allocation7 + $0x124] sm:$0xf] }
  0x49   :  { %1435 = vmatpush.bf16.msrb.mxu3 %v4463_v0  ;;  %v5067_v24 = vor.u32 %v6579_v17, %v5066_v16  ;;  %v4922_v26 = vld [vmem:[#allocation7 + $0x460] sm:$0xf]  ;;  %v6543_v27 = vld [vmem:[#allocation7 + $0x46c] sm:$0xf0]  ;;  %v4508_v0 = vld [vmem:[#allocation7 + $0x130] sm:$0xf0] }
  0x4a   :  { %1447 = vmatpush.bf16.msra.mxu2 %v4607_v59  ;;  %1397 = vmatpush.bf16.msrb.mxu0 %v4955_v9  ;;  %v5050_v28 = vld [vmem:[#allocation7 + $0x560] sm:$0xf]  ;;  %v6575_v29 = vld [vmem:[#allocation7 + $0x56c] sm:$0xf0]  ;;  %v4923_v34 = vor.u32 %v6543_v27, %v4922_v26  ;;  %v6405_v59 = vld [vmem:[#allocation7 + $0x24] sm:$0xf]  ;;  %v4511_v14 = vor.u32 %v6437_v63, %v4508_v0 }
  0x4b   :  { %1410 = vmatpush.bf16.msrb.mxu1 %v5083_v12  ;;  %v145_v32 = vld [vmem:[#allocation2 + $0x30] sm:$0xff]  ;;  %v5051_v37 = vor.u32 %v6575_v29, %v5050_v28  ;;  %v4906_v39 = vld [vmem:[#allocation7 + $0x440] sm:$0xf]  ;;  %v4383_v3 = vor.u32 %v6405_v59, %v4380_v60  ;;  %v6493_v10 = vld [vmem:[#allocation7 + $0x2e4] sm:$0xf] }
  0x4c   :  { %v6539_v40 = vld [vmem:[#allocation7 + $0x44c] sm:$0xf0]  ;;  %v5034_v41 = vld [vmem:[#allocation7 + $0x540] sm:$0xf]  ;;  %v7285_v45 = vpack.c.bf16 %v145_v32, %v145_v32  ;;  %v4364_v9 = vld [vmem:[#allocation7 + $0x10] sm:$0xf0] }
  0x4d   :  { %1436 = vmatpush.bf16.msrb.mxu3 %v4447_v13  ;;  %v6571_v42 = vld [vmem:[#allocation7 + $0x54c] sm:$0xf0]  ;;  %v4907_v47 = vor.u32 %v6539_v40, %v4906_v39  ;;  %v4890_v53 = vld [vmem:[#allocation7 + $0x420] sm:$0xf]  ;;  %v4732_v11 = vld [vmem:[#allocation7 + $0x2f0] sm:$0xf0] }
  0x4e   :  { %1448 = vmatpush.bf16.msra.mxu2 %v4591_v8  ;;  %1398 = vmatpush.bf16.msrb.mxu0 %v4939_v21  ;;  %v5035_v50 = vor.u32 %v6571_v42, %v5034_v41  ;;  %v6535_v54 = vld [vmem:[#allocation7 + $0x42c] sm:$0xf0]  ;;  %v5018_v56 = vld [vmem:[#allocation7 + $0x520] sm:$0xf]  ;;  %v6401_v8 = vld [vmem:[#allocation7 + $0x4] sm:$0xf] }
  0x4f   :  { %1411 = vmatpush.bf16.msrb.mxu1 %v5067_v24  ;;  %v6567_v58 = vld [vmem:[#allocation7 + $0x52c] sm:$0xf0]  ;;  %v4891_v62 = vor.u32 %v6535_v54, %v4890_v53  ;;  %v4874_v1 = vld [vmem:[#allocation7 + $0x400] sm:$0xf]  ;;  %v6525_v12 = vld [vmem:[#allocation7 + $0x3e4] sm:$0xf]  ;;  %v4735_v24 = vor.u32 %v6493_v10, %v4732_v11 }
  0x50   :  { %v5019_v2 = vor.u32 %v6567_v58, %v5018_v56  ;;  %v6531_v4 = vld [vmem:[#allocation7 + $0x40c] sm:$0xf0]  ;;  %v5002_v5 = vld [vmem:[#allocation7 + $0x500] sm:$0xf]  ;;  %v4860_v13 = vld [vmem:[#allocation7 + $0x3f0] sm:$0xf0] }
  0x51   :  { %1437 = vmatpush.bf16.msrb.mxu3 %v4431_v25  ;;  %v6563_v6 = vld [vmem:[#allocation7 + $0x50c] sm:$0xf0]  ;;  %v4875_v15 = vor.u32 %v6531_v4, %v4874_v1  ;;  %v6557_v16 = vld [vmem:[#allocation7 + $0x4e4] sm:$0xf]  ;;  %v4988_v17 = vld [vmem:[#allocation7 + $0x4f0] sm:$0xf0]  ;;  %v4863_v25 = vor.u32 %v6525_v12, %v4860_v13 }
  0x52   :  { %1449 = vmatpush.bf16.msra.mxu2 %v4575_v20  ;;  %1399 = vmatpush.bf16.msrb.mxu0 %v4923_v34  ;;  %v143_v18 = vld [vmem:[#allocation2 + $0x20] sm:$0xff]  ;;  %v5003_v19 = vor.u32 %v6563_v6, %v5002_v5  ;;  %v4367_v20 = vor.u32 %v6401_v8, %v4364_v9  ;;  %v4492_v22 = vld [vmem:[#allocation7 + $0x110] sm:$0xf0]  ;;  %v144_v23 = vld [vmem:[#allocation2 + $0x28] sm:$0xff]  ;;  %v4991_v29 = vor.u32 %v6557_v16, %v4988_v17 }
  0x53   :  { %1412 = vmatpush.bf16.msrb.mxu1 %v5051_v37  ;;  %v6433_v21 = vld [vmem:[#allocation7 + $0x104] sm:$0xf]  ;;  %v5116_v27 = vld [vmem:[#allocation7 + $0x5f0] sm:$0xf0]  ;;  %v7289_v30 = vpack.c.bf16 %v143_v18, %v143_v18  ;;  %v7291_v35 = vpack.c.bf16 %v144_v23, %v144_v23 }
  0x54   :  { %5144 = vmatmul.msk.bf16.vlgmr.msrb.gmra.mxu2 %vm1339_vm0, %v7285_v45  ;;  %v6589_v26 = vld [vmem:[#allocation7 + $0x5e4] sm:$0xf]  ;;  %v4716_v31 = vld [vmem:[#allocation7 + $0x2d0] sm:$0xf0]  ;;  %v4495_v34 = vor.u32 %v6433_v21, %v4492_v22 }
  0x55   :  { %1438 = vmatpush.bf16.msrb.mxu3 %v4415_v38  ;;  %v6489_v28 = vld [vmem:[#allocation7 + $0x2c4] sm:$0xf]  ;;  %v4972_v37 = vld [vmem:[#allocation7 + $0x4d0] sm:$0xf0]  ;;  %v5119_v38 = vor.u32 %v6589_v26, %v5116_v27 }
  0x56   :  { %1450 = vmatpush.bf16.msra.mxu2 %v4559_v33  ;;  %1400 = vmatpush.bf16.msrb.mxu0 %v4907_v47  ;;  %v6521_v32 = vld [vmem:[#allocation7 + $0x3c4] sm:$0xf]  ;;  %v4844_v33 = vld [vmem:[#allocation7 + $0x3d0] sm:$0xf0]  ;;  %v4719_v39 = vor.u32 %v6489_v28, %v4716_v31 }
  0x57   :  { %1413 = vmatpush.bf16.msrb.mxu1 %v5035_v50  ;;  %v6553_v36 = vld [vmem:[#allocation7 + $0x4c4] sm:$0xf]  ;;  %v4847_v40 = vor.u32 %v6521_v32, %v4844_v33  ;;  %v5100_v42 = vld [vmem:[#allocation7 + $0x5d0] sm:$0xf0] }
  0x58   :  { %v6585_v41 = vld [vmem:[#allocation7 + $0x5c4] sm:$0xf]  ;;  %v4975_v44 = vor.u32 %v6553_v36, %v4972_v37  ;;  %v4828_v48 = vld [vmem:[#allocation7 + $0x3b0] sm:$0xf0] }
  0x59   :  { %1439 = vmatpush.bf16.msrb.mxu3 %v4399_v52  ;;  %v6485_v43 = vld [vmem:[#allocation7 + $0x2a4] sm:$0xf]  ;;  %v4956_v50 = vld [vmem:[#allocation7 + $0x4b0] sm:$0xf0]  ;;  %v5103_v52 = vor.u32 %v6585_v41, %v5100_v42 }
  0x5a   :  { %1451 = vmatpush.bf16.msra.mxu2 %v4543_v46  ;;  %1401 = vmatpush.bf16.msrb.mxu0 %v4891_v62  ;;  %v4700_v46 = vld [vmem:[#allocation7 + $0x2b0] sm:$0xf0]  ;;  %v6517_v47 = vld [vmem:[#allocation7 + $0x3a4] sm:$0xf] }
  0x5b   :  { %1414 = vmatpush.bf16.msrb.mxu1 %v5019_v2  ;;  %v6549_v49 = vld [vmem:[#allocation7 + $0x4a4] sm:$0xf]  ;;  %v4703_v53 = vor.u32 %v6485_v43, %v4700_v46  ;;  %v4831_v54 = vor.u32 %v6517_v47, %v4828_v48  ;;  %v5084_v58 = vld [vmem:[#allocation7 + $0x5b0] sm:$0xf0] }
  0x5c   :  { %v6581_v56 = vld [vmem:[#allocation7 + $0x5a4] sm:$0xf]  ;;  %v4959_v60 = vor.u32 %v6549_v49, %v4956_v50  ;;  %v4812_v63 = vld [vmem:[#allocation7 + $0x390] sm:$0xf0] }
  0x5d   :  { %1440 = vmatpush.bf16.msrb.mxu3 %v4383_v3  ;;  %v6481_v59 = vld [vmem:[#allocation7 + $0x284] sm:$0xf]  ;;  %v4940_v1 = vld [vmem:[#allocation7 + $0x490] sm:$0xf0]  ;;  %v5087_v2 = vor.u32 %v6581_v56, %v5084_v58  ;;  %v4482_v56 = vld [vmem:[#allocation7 + $0xe8] sm:$0xf] }
  0x5e   :  { %1452 = vmatpush.bf16.msra.mxu2 %v4527_v61  ;;  %1402 = vmatpush.bf16.msrb.mxu0 %v4875_v15  ;;  %v4684_v61 = vld [vmem:[#allocation7 + $0x290] sm:$0xf0]  ;;  %v6513_v62 = vld [vmem:[#allocation7 + $0x384] sm:$0xf]  ;;  %v6432_v58 = vld [vmem:[#allocation7 + $0xf4] sm:$0xf0] }
  0x5f   :  { %1415 = vmatpush.bf16.msrb.mxu1 %v5003_v19  ;;  %v6545_v0 = vld [vmem:[#allocation7 + $0x484] sm:$0xf]  ;;  %v4687_v3 = vor.u32 %v6481_v59, %v4684_v61  ;;  %v4815_v4 = vor.u32 %v6513_v62, %v4812_v63  ;;  %v5068_v6 = vld [vmem:[#allocation7 + $0x590] sm:$0xf0]  ;;  %v4738_v62 = vld [vmem:[#allocation7 + $0x2e8] sm:$0xf] }
  0x60   :  { %v6577_v5 = vld [vmem:[#allocation7 + $0x584] sm:$0xf]  ;;  %v4943_v9 = vor.u32 %v6545_v0, %v4940_v1  ;;  %v4668_v10 = vld [vmem:[#allocation7 + $0x270] sm:$0xf0]  ;;  %v6496_v63 = vld [vmem:[#allocation7 + $0x2f4] sm:$0xf0] }
  0x61   :  { %1441 = vmatpush.bf16.msrb.mxu3 %v4367_v20  ;;  %1403 = vmatmul.bf16.vlgmr.msrb.gmra.mxu0 %v7289_v30  ;;  %v6477_v8 = vld [vmem:[#allocation7 + $0x264] sm:$0xf]  ;;  %v4796_v12 = vld [vmem:[#allocation7 + $0x370] sm:$0xf0]  ;;  %v5071_v15 = vor.u32 %v6577_v5, %v5068_v6  ;;  %v4483_v5 = vor.u32 %v6432_v58, %v4482_v56  ;;  %v4866_v6 = vld [vmem:[#allocation7 + $0x3e8] sm:$0xf] }
  0x62   :  { %1453 = vmatpush.bf16.msra.mxu2 %v4511_v14  ;;  %1460 = vmatpush.bf16.msra.mxu0 %v4735_v24  ;;  %v6509_v11 = vld [vmem:[#allocation7 + $0x364] sm:$0xf]  ;;  %v4924_v14 = vld [vmem:[#allocation7 + $0x470] sm:$0xf0]  ;;  %v4671_v16 = vor.u32 %v6477_v8, %v4668_v10  ;;  %v6528_v8 = vld [vmem:[#allocation7 + $0x3f4] sm:$0xf0] }
  0x63   :  { %1473 = vmatpush.bf16.msra.mxu1 %v4863_v25  ;;  %v6541_v13 = vld [vmem:[#allocation7 + $0x464] sm:$0xf]  ;;  %v4799_v17 = vor.u32 %v6509_v11, %v4796_v12  ;;  %v5052_v19 = vld [vmem:[#allocation7 + $0x570] sm:$0xf0]  ;;  %v4610_v10 = vld [vmem:[#allocation7 + $0x1e8] sm:$0xf]  ;;  %v4739_v12 = vor.u32 %v6496_v63, %v4738_v62 }
  0x64   :  { %1416 = vmatmul.bf16.vlgmr.msrb.gmra.mxu1 %v7291_v35  ;;  %1442 = vmatmul.bf16.vlgmr.msrb.gmra.mxu3 %v7275_v55  ;;  %v6573_v18 = vld [vmem:[#allocation7 + $0x564] sm:$0xf]  ;;  %v4927_v21 = vor.u32 %v6541_v13, %v4924_v14  ;;  %v4652_v22 = vld [vmem:[#allocation7 + $0x250] sm:$0xf0]  ;;  %v6464_v11 = vld [vmem:[#allocation7 + $0x1f4] sm:$0xf0] }
  0x65   :  { %1486 = vmatpush.bf16.msra.mxu3 %v4991_v29  ;;  %v6473_v20 = vld [vmem:[#allocation7 + $0x244] sm:$0xf]  ;;  %v4780_v24 = vld [vmem:[#allocation7 + $0x350] sm:$0xf0]  ;;  %v5055_v27 = vor.u32 %v6573_v18, %v5052_v19  ;;  %v4466_v14 = vld [vmem:[#allocation7 + $0xc8] sm:$0xf]  ;;  %v4611_v19 = vor.u32 %v6464_v11, %v4610_v10 }
  0x66   :  { %1454 = vmatpush.bf16.msra.mxu2 %v4495_v34  ;;  %1461 = vmatpush.bf16.msra.mxu0 %v4719_v39  ;;  %v6505_v23 = vld [vmem:[#allocation7 + $0x344] sm:$0xf]  ;;  %v4908_v26 = vld [vmem:[#allocation7 + $0x450] sm:$0xf0]  ;;  %v4655_v28 = vor.u32 %v6473_v20, %v4652_v22  ;;  %v6492_v18 = vld [vmem:[#allocation7 + $0x2d4] sm:$0xf0] }
  0x67   :  { %1474 = vmatpush.bf16.msra.mxu1 %v4847_v40  ;;  %v6537_v25 = vld [vmem:[#allocation7 + $0x444] sm:$0xf]  ;;  %v4783_v29 = vor.u32 %v6505_v23, %v4780_v24  ;;  %v5036_v32 = vld [vmem:[#allocation7 + $0x550] sm:$0xf0]  ;;  %v4850_v20 = vld [vmem:[#allocation7 + $0x3c8] sm:$0xf] }
  0x68   :  { %v6569_v31 = vld [vmem:[#allocation7 + $0x544] sm:$0xf]  ;;  %v4911_v34 = vor.u32 %v6537_v25, %v4908_v26  ;;  %v4636_v36 = vld [vmem:[#allocation7 + $0x230] sm:$0xf0]  ;;  %v4594_v23 = vld [vmem:[#allocation7 + $0x1c8] sm:$0xf] }
  0x69   :  { %1487 = vmatpush.bf16.msra.mxu3 %v4975_v44  ;;  %1455 = vmatmul.bf16.vlgmr.msra.gmra.mxu2 %v7281_v7  ;;  %v6469_v33 = vld [vmem:[#allocation7 + $0x224] sm:$0xf]  ;;  %v4892_v40 = vld [vmem:[#allocation7 + $0x430] sm:$0xf0]  ;;  %v5039_v41 = vor.u32 %v6569_v31, %v5036_v32  ;;  %v6460_v24 = vld [vmem:[#allocation7 + $0x1d4] sm:$0xf0] }
  0x6a   :  { %1499 = vmatpush.bf16.msrb.mxu2 %v5119_v38  ;;  %1462 = vmatpush.bf16.msra.mxu0 %v4703_v53  ;;  %v6501_v37 = vld [vmem:[#allocation7 + $0x324] sm:$0xf]  ;;  %v4764_v38 = vld [vmem:[#allocation7 + $0x330] sm:$0xf0]  ;;  %v4639_v44 = vor.u32 %v6469_v33, %v4636_v36  ;;  %v4450_v26 = vld [vmem:[#allocation7 + $0xa8] sm:$0xf]  ;;  %v4595_v32 = vor.u32 %v6460_v24, %v4594_v23 }
  0x6b   :  { %1475 = vmatpush.bf16.msra.mxu1 %v4831_v54  ;;  %v6533_v39 = vld [vmem:[#allocation7 + $0x424] sm:$0xf]  ;;  %v5020_v43 = vld [vmem:[#allocation7 + $0x530] sm:$0xf0]  ;;  %v4767_v46 = vor.u32 %v6501_v37, %v4764_v38  ;;  %v6488_v31 = vld [vmem:[#allocation7 + $0x2b4] sm:$0xf0] }
  0x6c   :  { %v6565_v42 = vld [vmem:[#allocation7 + $0x524] sm:$0xf]  ;;  %v4620_v48 = vld [vmem:[#allocation7 + $0x210] sm:$0xf0]  ;;  %v4895_v50 = vor.u32 %v6533_v39, %v4892_v40  ;;  %v4834_v33 = vld [vmem:[#allocation7 + $0x3a8] sm:$0xf] }
  0x6d   :  { %1488 = vmatpush.bf16.msra.mxu3 %v4959_v60  ;;  %v6465_v47 = vld [vmem:[#allocation7 + $0x204] sm:$0xf]  ;;  %v4876_v54 = vld [vmem:[#allocation7 + $0x410] sm:$0xf0]  ;;  %v5023_v60 = vor.u32 %v6565_v42, %v5020_v43  ;;  %v4578_v37 = vld [vmem:[#allocation7 + $0x1a8] sm:$0xf] }
  0x6e   :  { %1500 = vmatpush.bf16.msrb.mxu2 %v5103_v52  ;;  %1463 = vmatpush.bf16.msra.mxu0 %v4687_v3  ;;  %v6497_v49 = vld [vmem:[#allocation7 + $0x304] sm:$0xf]  ;;  %v4748_v52 = vld [vmem:[#allocation7 + $0x310] sm:$0xf0]  ;;  %v4623_v0 = vor.u32 %v6465_v47, %v4620_v48  ;;  %v6456_v38 = vld [vmem:[#allocation7 + $0x1b4] sm:$0xf0] }
  0x6f   :  { %1476 = vmatpush.bf16.msra.mxu1 %v4815_v4  ;;  %v6529_v53 = vld [vmem:[#allocation7 + $0x404] sm:$0xf]  ;;  %v5132_v61 = vld [vmem:[#allocation7 + $0x610] sm:$0xf0]  ;;  %v4751_v1 = vor.u32 %v6497_v49, %v4748_v52  ;;  %v4434_v40 = vld [vmem:[#allocation7 + $0x88] sm:$0xf] }
  0x70   :  { %v6593_v59 = vld [vmem:[#allocation7 + $0x604] sm:$0xf]  ;;  %v5004_v3 = vld [vmem:[#allocation7 + $0x510] sm:$0xf0]  ;;  %v4879_v4 = vor.u32 %v6529_v53, %v4876_v54  ;;  %v4690_v43 = vld [vmem:[#allocation7 + $0x288] sm:$0xf] }
  0x71   :  { %1489 = vmatpush.bf16.msra.mxu3 %v4943_v9  ;;  %v5135_v9 = vor.u32 %v6593_v59, %v5132_v61  ;;  %v4818_v47 = vld [vmem:[#allocation7 + $0x388] sm:$0xf]  ;;  %v6516_v48 = vld [vmem:[#allocation7 + $0x394] sm:$0xf0] }
  0x72   :  { %1501 = vmatpush.bf16.msrb.mxu2 %v5087_v2  ;;  %1464 = vmatpush.bf16.msra.mxu0 %v4671_v16  ;;  %v6561_v2 = vld [vmem:[#allocation7 + $0x504] sm:$0xf]  ;;  %v4867_v16 = vor.u32 %v6528_v8, %v4866_v6  ;;  %v6452_v52 = vld [vmem:[#allocation7 + $0x194] sm:$0xf0]  ;;  %v4418_v54 = vld [vmem:[#allocation7 + $0x68] sm:$0xf]  ;;  %v4819_v58 = vor.u32 %v6516_v48, %v4818_v47 }
  0x73   :  { %1477 = vmatpush.bf16.msra.mxu1 %v4799_v17  ;;  %v5007_v13 = vor.u32 %v6561_v2, %v5004_v3  ;;  %v4722_v17 = vld [vmem:[#allocation7 + $0x2c8] sm:$0xf]  ;;  %v6416_v56 = vld [vmem:[#allocation7 + $0x74] sm:$0xf0]  ;;  %v6430_v47 = vld [vmem:[#allocation7 + $0xec] sm:$0xf] }
  0x74   :  { %v4723_v25 = vor.u32 %v6492_v18, %v4722_v17  ;;  %v4674_v59 = vld [vmem:[#allocation7 + $0x268] sm:$0xf]  ;;  %v6512_v63 = vld [vmem:[#allocation7 + $0x374] sm:$0xf0]  ;;  %v4484_v48 = vld [vmem:[#allocation7 + $0xf8] sm:$0xf0] }
  0x75   :  { %1490 = vmatpush.bf16.msra.mxu3 %v4927_v21  ;;  %v6524_v21 = vld [vmem:[#allocation7 + $0x3d4] sm:$0xf0]  ;;  %v4802_v62 = vld [vmem:[#allocation7 + $0x368] sm:$0xf] }
  0x76   :  { %1502 = vmatpush.bf16.msrb.mxu2 %v5071_v15  ;;  %1465 = vmatpush.bf16.msra.mxu0 %v4655_v28  ;;  %v6428_v15 = vld [vmem:[#allocation7 + $0xd4] sm:$0xf0]  ;;  %v4851_v28 = vor.u32 %v6524_v21, %v4850_v20  ;;  %v4803_v6 = vor.u32 %v6512_v63, %v4802_v62  ;;  %v4658_v8 = vld [vmem:[#allocation7 + $0x248] sm:$0xf]  ;;  %v4487_v63 = vor.u32 %v6430_v47, %v4484_v48 }
  0x77   :  { %1478 = vmatpush.bf16.msra.mxu1 %v4783_v29  ;;  %v4467_v22 = vor.u32 %v6428_v15, %v4466_v14  ;;  %v4706_v29 = vld [vmem:[#allocation7 + $0x2a8] sm:$0xf]  ;;  %v6448_v2 = vld [vmem:[#allocation7 + $0x174] sm:$0xf0] }
  0x78   :  { %v4707_v39 = vor.u32 %v6488_v31, %v4706_v29  ;;  %v4786_v11 = vld [vmem:[#allocation7 + $0x348] sm:$0xf]  ;;  %v6444_v15 = vld [vmem:[#allocation7 + $0x154] sm:$0xf0] }
  0x79   :  { %1491 = vmatpush.bf16.msra.mxu3 %v4911_v34  ;;  %v6520_v34 = vld [vmem:[#allocation7 + $0x3b4] sm:$0xf0]  ;;  %v4530_v14 = vld [vmem:[#allocation7 + $0x148] sm:$0xf] }
  0x7a   :  { %1503 = vmatpush.bf16.msrb.mxu2 %v5055_v27  ;;  %1466 = vmatpush.bf16.msra.mxu0 %v4639_v44  ;;  %v6424_v27 = vld [vmem:[#allocation7 + $0xb4] sm:$0xf0]  ;;  %v4835_v42 = vor.u32 %v6520_v34, %v4834_v33  ;;  %v4386_v17 = vld [vmem:[#allocation7 + $0x28] sm:$0xf] }
  0x7b   :  { %1479 = vmatpush.bf16.msra.mxu1 %v4767_v46  ;;  %v4451_v36 = vor.u32 %v6424_v27, %v4450_v26  ;;  %v6484_v44 = vld [vmem:[#allocation7 + $0x294] sm:$0xf0]  ;;  %v4579_v46 = vor.u32 %v6456_v38, %v4578_v37  ;;  %v4642_v20 = vld [vmem:[#allocation7 + $0x228] sm:$0xf] }
  0x7c   :  { %v4691_v53 = vor.u32 %v6484_v44, %v4690_v43  ;;  %v6408_v18 = vld [vmem:[#allocation7 + $0x34] sm:$0xf0]  ;;  %v4770_v23 = vld [vmem:[#allocation7 + $0x328] sm:$0xf] }
  0x7d   :  { %1492 = vmatpush.bf16.msra.mxu3 %v4895_v50  ;;  %v4562_v50 = vld [vmem:[#allocation7 + $0x188] sm:$0xf]  ;;  %v6472_v21 = vld [vmem:[#allocation7 + $0x234] sm:$0xf0] }
  0x7e   :  { %1504 = vmatpush.bf16.msrb.mxu2 %v5039_v41  ;;  %1467 = vmatpush.bf16.msra.mxu0 %v4623_v0  ;;  %v6420_v41 = vld [vmem:[#allocation7 + $0x94] sm:$0xf0]  ;;  %v4563_v61 = vor.u32 %v6452_v52, %v4562_v50  ;;  %v4419_v0 = vor.u32 %v6416_v56, %v4418_v54  ;;  %v4514_v26 = vld [vmem:[#allocation7 + $0x128] sm:$0xf]  ;;  %v4643_v29 = vor.u32 %v6472_v21, %v4642_v20 }
  0x7f   :  { %1480 = vmatpush.bf16.msra.mxu1 %v4751_v1  ;;  %v4435_v49 = vor.u32 %v6420_v41, %v4434_v40  ;;  %v4546_v1 = vld [vmem:[#allocation7 + $0x168] sm:$0xf]  ;;  %v6504_v24 = vld [vmem:[#allocation7 + $0x334] sm:$0xf0] }
  0x80   :  { %v4547_v10 = vor.u32 %v6448_v2, %v4546_v1  ;;  %v6440_v27 = vld [vmem:[#allocation7 + $0x134] sm:$0xf0]  ;;  %v4771_v34 = vor.u32 %v6504_v24, %v4770_v23  ;;  %v4626_v37 = vld [vmem:[#allocation7 + $0x208] sm:$0xf]  ;;  %v6426_v1 = vld [vmem:[#allocation7 + $0xcc] sm:$0xf] }
  0x81   :  { %1493 = vmatpush.bf16.msra.mxu3 %v4879_v4  ;;  %1468 = vmatmul.bf16.vlgmr.msra.gmra.mxu0 %v7273_v51  ;;  %v4402_v4 = vld [vmem:[#allocation7 + $0x48] sm:$0xf]  ;;  %v6404_v31 = vld [vmem:[#allocation7 + $0x14] sm:$0xf0]  ;;  %v4515_v40 = vor.u32 %v6440_v27, %v4514_v26  ;;  %v4468_v2 = vld [vmem:[#allocation7 + $0xd8] sm:$0xf0] }
  0x82   :  { %1505 = vmatpush.bf16.msrb.mxu2 %v5023_v60  ;;  %1551 = vmatpush.bf16.msrb.mxu0 %v4739_v12  ;;  %v6480_v60 = vld [vmem:[#allocation7 + $0x274] sm:$0xf0]  ;;  %v5122_v52 = vld [vmem:[#allocation7 + $0x5e8] sm:$0xf]  ;;  %v4580_v23 = vld [vmem:[#allocation7 + $0x1b8] sm:$0xf0] }
  0x83   :  { %1525 = vmatpush.bf16.msrb.mxu1 %v4483_v5  ;;  %v4675_v3 = vor.u32 %v6480_v60, %v4674_v59  ;;  %v6412_v5 = vld [vmem:[#allocation7 + $0x54] sm:$0xf0]  ;;  %v4978_v54 = vld [vmem:[#allocation7 + $0x4c8] sm:$0xf]  ;;  %v6462_v60 = vld [vmem:[#allocation7 + $0x1ec] sm:$0xf] }
  0x84   :  { %1494 = vmatmul.bf16.vlgmr.msra.gmra.mxu3 %v7289_v30  ;;  %1481 = vmatmul.bf16.vlgmr.msra.gmra.mxu1 %v7277_v57  ;;  %v6508_v12 = vld [vmem:[#allocation7 + $0x354] sm:$0xf0]  ;;  %v4946_v20 = vld [vmem:[#allocation7 + $0x488] sm:$0xf]  ;;  %v6418_v26 = vld [vmem:[#allocation7 + $0x8c] sm:$0xf] }
  0x85   :  { %1519 = vmatpush.bf16.msrb.mxu3 %v5135_v9  ;;  %v6476_v9 = vld [vmem:[#allocation7 + $0x254] sm:$0xf0]  ;;  %v4436_v27 = vld [vmem:[#allocation7 + $0x98] sm:$0xf0]  ;;  %v4914_v47 = vld [vmem:[#allocation7 + $0x448] sm:$0xf] }
  0x86   :  { %1506 = vmatpush.bf16.msrb.mxu2 %v5007_v13  ;;  %1552 = vmatpush.bf16.msrb.mxu0 %v4723_v25  ;;  %v4403_v13 = vor.u32 %v6412_v5, %v4402_v4  ;;  %v4387_v25 = vor.u32 %v6408_v18, %v4386_v17  ;;  %v6560_v33 = vld [vmem:[#allocation7 + $0x4f4] sm:$0xf0]  ;;  %v5106_v5 = vld [vmem:[#allocation7 + $0x5c8] sm:$0xf] }
  0x87   :  { %1526 = vmatpush.bf16.msrb.mxu1 %v4467_v22  ;;  %v4531_v22 = vor.u32 %v6444_v15, %v4530_v14  ;;  %v6468_v38 = vld [vmem:[#allocation7 + $0x214] sm:$0xf0]  ;;  %v6422_v14 = vld [vmem:[#allocation7 + $0xac] sm:$0xf]  ;;  %v4452_v15 = vld [vmem:[#allocation7 + $0xb8] sm:$0xf0] }
  0x88   :  { %v6500_v41 = vld [vmem:[#allocation7 + $0x314] sm:$0xf0]  ;;  %v4627_v50 = vor.u32 %v6468_v38, %v4626_v37  ;;  %v5090_v18 = vld [vmem:[#allocation7 + $0x5a8] sm:$0xf]  ;;  %v4455_v24 = vor.u32 %v6422_v14, %v4452_v15  ;;  %v4564_v37 = vld [vmem:[#allocation7 + $0x198] sm:$0xf0]  ;;  %v4439_v38 = vor.u32 %v6418_v26, %v4436_v27 }
  0x89   :  { %1538 = vmatpush.bf16.msra.mxu3 %v4611_v19  ;;  %1507 = vmatmul.bf16.vlgmr.msrb.gmra.mxu2 %v7291_v35  ;;  %v4787_v19 = vor.u32 %v6508_v12, %v4786_v11  ;;  %v6596_v43 = vld [vmem:[#allocation7 + $0x614] sm:$0xf0]  ;;  %v4596_v11 = vld [vmem:[#allocation7 + $0x1d8] sm:$0xf0]  ;;  %v4471_v12 = vor.u32 %v6426_v1, %v4468_v2 }
  0x8a   :  { %1564 = vmatpush.bf16.msra.mxu2 %v4867_v16  ;;  %1553 = vmatpush.bf16.msrb.mxu0 %v4707_v39  ;;  %v4659_v16 = vor.u32 %v6476_v9, %v4658_v8  ;;  %v4754_v39 = vld [vmem:[#allocation7 + $0x308] sm:$0xf]  ;;  %v6552_v9 = vld [vmem:[#allocation7 + $0x4b4] sm:$0xf0]  ;;  %v4532_v1 = vld [vmem:[#allocation7 + $0x158] sm:$0xf0] }
  0x8b   :  { %1527 = vmatpush.bf16.msrb.mxu1 %v4451_v36  ;;  %v4498_v36 = vld [vmem:[#allocation7 + $0x108] sm:$0xf]  ;;  %v4755_v56 = vor.u32 %v6500_v41, %v4754_v39  ;;  %v6548_v21 = vld [vmem:[#allocation7 + $0x494] sm:$0xf0]  ;;  %v4420_v41 = vld [vmem:[#allocation7 + $0x78] sm:$0xf0] }
  0x8c   :  { %v4962_v8 = vld [vmem:[#allocation7 + $0x4a8] sm:$0xf]  ;;  %v6540_v48 = vld [vmem:[#allocation7 + $0x454] sm:$0xf0]  ;;  %v4516_v14 = vld [vmem:[#allocation7 + $0x138] sm:$0xf0] }
  0x8d   :  { %1539 = vmatpush.bf16.msra.mxu3 %v4595_v32  ;;  %v4994_v32 = vld [vmem:[#allocation7 + $0x4e8] sm:$0xf]  ;;  %v4868_v26 = vld [vmem:[#allocation7 + $0x3f8] sm:$0xf0] }
  0x8e   :  { %1565 = vmatpush.bf16.msra.mxu2 %v4851_v28  ;;  %1554 = vmatpush.bf16.msrb.mxu0 %v4691_v53  ;;  %v4370_v28 = vld [vmem:[#allocation7 + $0x8] sm:$0xf]  ;;  %v6592_v53 = vld [vmem:[#allocation7 + $0x5f4] sm:$0xf0] }
  0x8f   :  { %1528 = vmatpush.bf16.msrb.mxu1 %v4435_v49  ;;  %v4371_v44 = vor.u32 %v6404_v31, %v4370_v28  ;;  %v4995_v49 = vor.u32 %v6560_v33, %v4994_v32  ;;  %v4947_v28 = vor.u32 %v6548_v21, %v4946_v20  ;;  %v5074_v31 = vld [vmem:[#allocation7 + $0x588] sm:$0xf]  ;;  %v6580_v32 = vld [vmem:[#allocation7 + $0x594] sm:$0xf0]  ;;  %v6402_v20 = vld [vmem:[#allocation7 + $0xc] sm:$0xf] }
  0x90   :  { %v4930_v33 = vld [vmem:[#allocation7 + $0x468] sm:$0xf]  ;;  %v5075_v39 = vor.u32 %v6580_v32, %v5074_v31  ;;  %v4372_v21 = vld [vmem:[#allocation7 + $0x18] sm:$0xf0]  ;;  %v6490_v31 = vld [vmem:[#allocation7 + $0x2cc] sm:$0xf] }
  0x91   :  { %1540 = vmatpush.bf16.msra.mxu3 %v4579_v46  ;;  %v6436_v46 = vld [vmem:[#allocation7 + $0x114] sm:$0xf0]  ;;  %v4375_v32 = vor.u32 %v6402_v20, %v4372_v21  ;;  %v6510_v20 = vld [vmem:[#allocation7 + $0x36c] sm:$0xf] }
  0x92   :  { %1566 = vmatpush.bf16.msra.mxu2 %v4835_v42  ;;  %1555 = vmatpush.bf16.msrb.mxu0 %v4675_v3  ;;  %v5138_v42 = vld [vmem:[#allocation7 + $0x608] sm:$0xf]  ;;  %v4499_v62 = vor.u32 %v6436_v46, %v4498_v36  ;;  %v6450_v36 = vld [vmem:[#allocation7 + $0x18c] sm:$0xf]  ;;  %v6576_v46 = vld [vmem:[#allocation7 + $0x574] sm:$0xf0] }
  0x93   :  { %1529 = vmatpush.bf16.msrb.mxu1 %v4419_v0  ;;  %v5139_v59 = vor.u32 %v6596_v43, %v5138_v42  ;;  %v5123_v0 = vor.u32 %v6592_v53, %v5122_v52  ;;  %v4567_v43 = vor.u32 %v6450_v36, %v4564_v37  ;;  %v4500_v36 = vld [vmem:[#allocation7 + $0x118] sm:$0xf0] }
  0x94   :  { %5145 = vmatmul.msk.bf16.vlgmr.msrb.gmra.mxu3 %vm1339_vm0, %v7285_v45 }
  0x95   :  { %1541 = vmatpush.bf16.msra.mxu3 %v4563_v61  ;;  %v4612_v61 = vld [vmem:[#allocation7 + $0x1f8] sm:$0xf0] }
  0x96   :  { %1567 = vmatpush.bf16.msra.mxu2 %v4819_v58  ;;  %1556 = vmatpush.bf16.msrb.mxu0 %v4659_v16  ;;  %v6556_v58 = vld [vmem:[#allocation7 + $0x4d4] sm:$0xf0]  ;;  %v4615_v4 = vor.u32 %v6462_v60, %v4612_v61  ;;  %v4963_v16 = vor.u32 %v6552_v9, %v4962_v8  ;;  %v5042_v60 = vld [vmem:[#allocation7 + $0x548] sm:$0xf] }
  0x97   :  { %1530 = vmatpush.bf16.msrb.mxu1 %v4403_v13  ;;  %v4979_v3 = vor.u32 %v6556_v58, %v4978_v54  ;;  %v6410_v54 = vld [vmem:[#allocation7 + $0x4c] sm:$0xf]  ;;  %v4915_v58 = vor.u32 %v6540_v48, %v4914_v47  ;;  %v6572_v61 = vld [vmem:[#allocation7 + $0x554] sm:$0xf0]  ;;  %v5026_v9 = vld [vmem:[#allocation7 + $0x528] sm:$0xf] }
  0x98   :  { %v6554_v47 = vld [vmem:[#allocation7 + $0x4cc] sm:$0xf]  ;;  %v4980_v48 = vld [vmem:[#allocation7 + $0x4d8] sm:$0xf0] }
  0x99   :  { %1542 = vmatpush.bf16.msra.mxu3 %v4547_v10  ;;  %v6458_v10 = vld [vmem:[#allocation7 + $0x1cc] sm:$0xf] }
  0x9a   :  { %1568 = vmatpush.bf16.msra.mxu2 %v4803_v6  ;;  %1557 = vmatpush.bf16.msrb.mxu0 %v4643_v29  ;;  %v6588_v6 = vld [vmem:[#allocation7 + $0x5d4] sm:$0xf0]  ;;  %v4599_v17 = vor.u32 %v6458_v10, %v4596_v11  ;;  %v4882_v11 = vld [vmem:[#allocation7 + $0x408] sm:$0xf] }
  0x9b   :  { %1531 = vmatpush.bf16.msrb.mxu1 %v4387_v25  ;;  %v5107_v13 = vor.u32 %v6588_v6, %v5106_v5  ;;  %v4388_v5 = vld [vmem:[#allocation7 + $0x38] sm:$0xf0]  ;;  %v6568_v10 = vld [vmem:[#allocation7 + $0x534] sm:$0xf0] }
  0x9d   :  { %1543 = vmatpush.bf16.msra.mxu3 %v4531_v22  ;;  %v6454_v22 = vld [vmem:[#allocation7 + $0x1ac] sm:$0xf] }
  0x9e   :  { %1569 = vmatpush.bf16.msra.mxu2 %v4787_v19  ;;  %1558 = vmatpush.bf16.msrb.mxu0 %v4627_v50  ;;  %v6584_v19 = vld [vmem:[#allocation7 + $0x5b4] sm:$0xf0]  ;;  %v4583_v29 = vor.u32 %v6454_v22, %v4580_v23  ;;  %v4548_v50 = vld [vmem:[#allocation7 + $0x178] sm:$0xf0] }
  0x9f   :  { %1532 = vmatpush.bf16.msrb.mxu1 %v4371_v44  ;;  %v5091_v25 = vor.u32 %v6584_v19, %v5090_v18  ;;  %v5058_v44 = vld [vmem:[#allocation7 + $0x568] sm:$0xf]  ;;  %v5027_v18 = vor.u32 %v6568_v10, %v5026_v9  ;;  %v4820_v10 = vld [vmem:[#allocation7 + $0x398] sm:$0xf0] }
  0xa0   :  { %v5059_v53 = vor.u32 %v6576_v46, %v5058_v44  ;;  %v5010_v19 = vld [vmem:[#allocation7 + $0x508] sm:$0xf]  ;;  %v4852_v46 = vld [vmem:[#allocation7 + $0x3d8] sm:$0xf0] }
  0xa1   :  { %1544 = vmatpush.bf16.msra.mxu3 %v4515_v40  ;;  %1559 = vmatmul.bf16.vlgmr.msrb.gmra.mxu0 %v7273_v51  ;;  %v6414_v40 = vld [vmem:[#allocation7 + $0x6c] sm:$0xf] }
  0xa2   :  { %1570 = vmatpush.bf16.msra.mxu2 %v4771_v34  ;;  %1610 = vmatpush.bf16.msra.mxu0 %v5139_v59  ;;  %v6544_v34 = vld [vmem:[#allocation7 + $0x474] sm:$0xf0]  ;;  %v4423_v52 = vor.u32 %v6414_v40, %v4420_v41 }
  0xa3   :  { %1577 = vmatpush.bf16.msra.mxu1 %v4995_v49  ;;  %v4931_v42 = vor.u32 %v6544_v34, %v4930_v33  ;;  %v6446_v49 = vld [vmem:[#allocation7 + $0x16c] sm:$0xf]  ;;  %v4724_v33 = vld [vmem:[#allocation7 + $0x2d8] sm:$0xf0] }
  0xa4   :  { %1533 = vmatmul.bf16.vlgmr.msrb.gmra.mxu1 %v7275_v55  ;;  %v4551_v59 = vor.u32 %v6446_v49, %v4548_v50  ;;  %v6434_v34 = vld [vmem:[#allocation7 + $0x10c] sm:$0xf] }
  0xa5   :  { %1545 = vmatpush.bf16.msra.mxu3 %v4499_v62  ;;  %v4898_v62 = vld [vmem:[#allocation7 + $0x428] sm:$0xf]  ;;  %v4503_v44 = vor.u32 %v6434_v34, %v4500_v36  ;;  %v6486_v50 = vld [vmem:[#allocation7 + $0x2ac] sm:$0xf] }
  0xa6   :  { %1571 = vmatpush.bf16.msra.mxu2 %v4755_v56  ;;  %1629 = vmatpush.bf16.msrb.mxu0 %v4615_v4  ;;  %v4404_v56 = vld [vmem:[#allocation7 + $0x58] sm:$0xf0]  ;;  %v6406_v4 = vld [vmem:[#allocation7 + $0x2c] sm:$0xf] }
  0xa7   :  { %1578 = vmatpush.bf16.msra.mxu1 %v4979_v3  ;;  %v4407_v2 = vor.u32 %v6410_v54, %v4404_v56  ;;  %v5043_v3 = vor.u32 %v6572_v61, %v5042_v60  ;;  %v4391_v15 = vor.u32 %v6406_v4, %v4388_v5  ;;  %v5108_v54 = vld [vmem:[#allocation7 + $0x5d8] sm:$0xf0]  ;;  %v6506_v34 = vld [vmem:[#allocation7 + $0x34c] sm:$0xf] }
  0xa8   :  { %1546 = vmatmul.bf16.vlgmr.msra.gmra.mxu3 %v7281_v7  ;;  %v4836_v61 = vld [vmem:[#allocation7 + $0x3b8] sm:$0xf0] }
  0xa9   :  { %1590 = vmatpush.bf16.msrb.mxu3 %v5123_v0  ;;  %1572 = vmatmul.bf16.vlgmr.msra.gmra.mxu2 %v7277_v57  ;;  %v6442_v0 = vld [vmem:[#allocation7 + $0x14c] sm:$0xf]  ;;  %v5092_v4 = vld [vmem:[#allocation7 + $0x5b8] sm:$0xf0] }
  0xaa   :  { %1616 = vmatpush.bf16.msrb.mxu2 %v4487_v63  ;;  %1630 = vmatpush.bf16.msrb.mxu0 %v4599_v17  ;;  %v6536_v63 = vld [vmem:[#allocation7 + $0x434] sm:$0xf0]  ;;  %v4535_v8 = vor.u32 %v6442_v0, %v4532_v1  ;;  %v4740_v17 = vld [vmem:[#allocation7 + $0x2f8] sm:$0xf0]  ;;  %v6482_v1 = vld [vmem:[#allocation7 + $0x28c] sm:$0xf] }
  0xab   :  { %1579 = vmatpush.bf16.msra.mxu1 %v4963_v16  ;;  %v4899_v6 = vor.u32 %v6536_v63, %v4898_v62  ;;  %v6494_v16 = vld [vmem:[#allocation7 + $0x2ec] sm:$0xf]  ;;  %v4964_v63 = vld [vmem:[#allocation7 + $0x4b8] sm:$0xf0] }
  0xac   :  { %v4743_v27 = vor.u32 %v6494_v16, %v4740_v17  ;;  %v6550_v62 = vld [vmem:[#allocation7 + $0x4ac] sm:$0xf]  ;;  %v5076_v17 = vld [vmem:[#allocation7 + $0x598] sm:$0xf0] }
  0xad   :  { %1591 = vmatpush.bf16.msrb.mxu3 %v5107_v13  ;;  %v6438_v13 = vld [vmem:[#allocation7 + $0x12c] sm:$0xf] }
  0xae   :  { %1617 = vmatpush.bf16.msrb.mxu2 %v4471_v12  ;;  %1631 = vmatpush.bf16.msrb.mxu0 %v4583_v29  ;;  %v6532_v12 = vld [vmem:[#allocation7 + $0x414] sm:$0xf0]  ;;  %v4519_v23 = vor.u32 %v6438_v13, %v4516_v14  ;;  %v4996_v29 = vld [vmem:[#allocation7 + $0x4f8] sm:$0xf0]  ;;  %v6478_v14 = vld [vmem:[#allocation7 + $0x26c] sm:$0xf] }
  0xaf   :  { %1580 = vmatpush.bf16.msra.mxu1 %v4947_v28  ;;  %v4883_v22 = vor.u32 %v6532_v12, %v4882_v11  ;;  %v6558_v28 = vld [vmem:[#allocation7 + $0x4ec] sm:$0xf]  ;;  %v4948_v12 = vld [vmem:[#allocation7 + $0x498] sm:$0xf0] }
  0xb0   :  { %v4999_v41 = vor.u32 %v6558_v28, %v4996_v29  ;;  %v6546_v11 = vld [vmem:[#allocation7 + $0x48c] sm:$0xf]  ;;  %v5060_v29 = vld [vmem:[#allocation7 + $0x578] sm:$0xf0] }
  0xb1   :  { %1592 = vmatpush.bf16.msrb.mxu3 %v5091_v25  ;;  %5146 = vmatmul.msk.bf16.vlgmr.msra.gmra.mxu0 %vm1339_vm0, %v7285_v45  ;;  %v6526_v25 = vld [vmem:[#allocation7 + $0x3ec] sm:$0xf] }
  0xb2   :  { %1618 = vmatpush.bf16.msrb.mxu2 %v4455_v24  ;;  %1632 = vmatpush.bf16.msrb.mxu0 %v4567_v43  ;;  %v6564_v24 = vld [vmem:[#allocation7 + $0x514] sm:$0xf0]  ;;  %v4871_v40 = vor.u32 %v6526_v25, %v4868_v26  ;;  %v4727_v43 = vor.u32 %v6490_v31, %v4724_v33  ;;  %v6474_v26 = vld [vmem:[#allocation7 + $0x24c] sm:$0xf] }
  0xb3   :  { %1581 = vmatpush.bf16.msra.mxu1 %v4931_v42  ;;  %v5011_v37 = vor.u32 %v6564_v24, %v5010_v19  ;;  %v6522_v42 = vld [vmem:[#allocation7 + $0x3cc] sm:$0xf]  ;;  %v4951_v19 = vor.u32 %v6546_v11, %v4948_v12  ;;  %v4932_v24 = vld [vmem:[#allocation7 + $0x478] sm:$0xf0] }
  0xb4   :  { %v4855_v56 = vor.u32 %v6522_v42, %v4852_v46  ;;  %v6574_v28 = vld [vmem:[#allocation7 + $0x56c] sm:$0xf]  ;;  %v4884_v11 = vld [vmem:[#allocation7 + $0x418] sm:$0xf0] }
  0xb5   :  { %1593 = vmatpush.bf16.msrb.mxu3 %v5075_v39  ;;  %v5124_v39 = vld [vmem:[#allocation7 + $0x5f8] sm:$0xf0]  ;;  %v6470_v42 = vld [vmem:[#allocation7 + $0x22c] sm:$0xf] }
  0xb6   :  { %1619 = vmatpush.bf16.msrb.mxu2 %v4439_v38  ;;  %1633 = vmatpush.bf16.msrb.mxu0 %v4551_v59  ;;  %v6590_v38 = vld [vmem:[#allocation7 + $0x5ec] sm:$0xf] }
  0xb7   :  { %1582 = vmatpush.bf16.msra.mxu1 %v4915_v58  ;;  %v5127_v49 = vor.u32 %v6590_v38, %v5124_v39  ;;  %v4983_v58 = vor.u32 %v6554_v47, %v4980_v48  ;;  %v6518_v59 = vld [vmem:[#allocation7 + $0x3ac] sm:$0xf]  ;;  %v4788_v38 = vld [vmem:[#allocation7 + $0x358] sm:$0xf0] }
  0xb8   :  { %v4839_v5 = vor.u32 %v6518_v59, %v4836_v61  ;;  %v6538_v39 = vld [vmem:[#allocation7 + $0x44c] sm:$0xf]  ;;  %v5044_v47 = vld [vmem:[#allocation7 + $0x558] sm:$0xf0]  ;;  %v4791_v48 = vor.u32 %v6506_v34, %v4788_v38  ;;  %v5190_v38 = vld [vmem:[%s8031_s4 + $0x50] sm:$0xf] }
  0xb9   :  { %1594 = vmatpush.bf16.msrb.mxu3 %v5059_v53  ;;  %v6586_v53 = vld [vmem:[#allocation7 + $0x5cc] sm:$0xf] }
  0xba   :  { %1620 = vmatpush.bf16.msrb.mxu2 %v4423_v52  ;;  %1634 = vmatpush.bf16.msrb.mxu0 %v4535_v8  ;;  %v4708_v52 = vld [vmem:[#allocation7 + $0x2b8] sm:$0xf0]  ;;  %v5111_v0 = vor.u32 %v6586_v53, %v5108_v54  ;;  %v6514_v8 = vld [vmem:[#allocation7 + $0x38c] sm:$0xf] }
  0xbb   :  { %1583 = vmatpush.bf16.msra.mxu1 %v4899_v6  ;;  %v4711_v60 = vor.u32 %v6486_v50, %v4708_v52  ;;  %v4967_v6 = vor.u32 %v6550_v62, %v4964_v63  ;;  %v6570_v46 = vld [vmem:[#allocation7 + $0x54c] sm:$0xf]  ;;  %v4772_v53 = vld [vmem:[#allocation7 + $0x338] sm:$0xf0] }
  0xbc   :  { %v6502_v50 = vld [vmem:[#allocation7 + $0x32c] sm:$0xf]  ;;  %v5028_v63 = vld [vmem:[#allocation7 + $0x538] sm:$0xf0] }
  0xbd   :  { %1595 = vmatpush.bf16.msrb.mxu3 %v5043_v3  ;;  %v6582_v3 = vld [vmem:[#allocation7 + $0x5ac] sm:$0xf] }
  0xbe   :  { %1621 = vmatpush.bf16.msrb.mxu2 %v4407_v2  ;;  %1635 = vmatpush.bf16.msrb.mxu0 %v4519_v23  ;;  %v4692_v2 = vld [vmem:[#allocation7 + $0x298] sm:$0xf0]  ;;  %v5095_v13 = vor.u32 %v6582_v3, %v5092_v4  ;;  %v6542_v23 = vld [vmem:[#allocation7 + $0x46c] sm:$0xf]  ;;  %v4775_v4 = vor.u32 %v6502_v50, %v4772_v53  ;;  %v5174_v50 = vld [vmem:[%s8031_s4 + $0x30] sm:$0xf] }
  0xbf   :  { %1584 = vmatpush.bf16.msra.mxu1 %v4883_v22  ;;  %v4695_v9 = vor.u32 %v6482_v1, %v4692_v2  ;;  %v4804_v22 = vld [vmem:[#allocation7 + $0x378] sm:$0xf0]  ;;  %v7315_v25 = vpop.f32.mrf.mxu1  ;;  %v4935_v33 = vor.u32 %v6542_v23, %v4932_v24  ;;  %v6534_v54 = vld [vmem:[#allocation7 + $0x42c] sm:$0xf]  ;;  %v7321_v2 = vld [vmem:[#allocation8] sm:$0xf] }
  0xc0   :  { %v6466_v59 = vld [vmem:[#allocation7 + $0x20c] sm:$0xf]  ;;  %v5140_v1 = vld [vmem:[#allocation7 + $0x618] sm:$0xf0] }
  0xc1   :  { %1596 = vmatpush.bf16.msrb.mxu3 %v5027_v18  ;;  %v4823_v18 = vor.u32 %v6514_v8, %v4820_v10  ;;  %v6566_v61 = vld [vmem:[#allocation7 + $0x52c] sm:$0xf] }
  0xc2   :  { %1622 = vmatpush.bf16.msrb.mxu2 %v4391_v15  ;;  %1585 = vmatmul.bf16.vlgmr.msra.gmra.mxu1 %v7289_v30  ;;  %v4676_v15 = vld [vmem:[#allocation7 + $0x278] sm:$0xf0]  ;;  %v7313_v16 = vpop.f32.mrf.mxu0  ;;  %v6530_v10 = vld [vmem:[#allocation7 + $0x40c] sm:$0xf] }
  0xc3   :  { %1642 = vmatpush.bf16.msrb.mxu1 %v4743_v27  ;;  %1636 = vmatpush.bf16.msrb.mxu0 %v4503_v44  ;;  %v4679_v21 = vor.u32 %v6478_v14, %v4676_v15  ;;  %v4660_v27 = vld [vmem:[#allocation7 + $0x258] sm:$0xf0]  ;;  %v5206_v14 = vld [vmem:[%s8031_s4 + $0x70] sm:$0xf]  ;;  %v6612_v15 = vld [vmem:[%s8031_s4 + $0x74] sm:$0xf0]  ;;  %v4887_v23 = vor.u32 %v6530_v10, %v4884_v11 }
  0xc4   :  { %v4663_v36 = vor.u32 %v6474_v26, %v4660_v27  ;;  %v5207_v24 = vor.u32 %v6612_v15, %v5206_v14  ;;  %v5198_v26 = vld [vmem:[%s8031_s4 + $0x60] sm:$0xf]  ;;  %v6610_v27 = vld [vmem:[%s8031_s4 + $0x64] sm:$0xf0]  ;;  %v6616_v11 = vld [vmem:[%s8031_s4 + $0x94] sm:$0xf0] }
  0xc5   :  { %1597 = vmatpush.bf16.msrb.mxu3 %v5011_v37  ;;  %v5150_v14 = vld [vmem:[%s8031_s4] sm:$0xf]  ;;  %v6598_v15 = vld [vmem:[%s8031_s4 + $0x4] sm:$0xf0] }
  0xc6   :  { %1623 = vmatpush.bf16.msrb.mxu2 %v4375_v32  ;;  %1637 = vmatmul.bf16.vlgmr.msrb.gmra.mxu0 %v7281_v7  ;;  %v4807_v32 = vor.u32 %v6510_v20, %v4804_v22  ;;  %v6628_v20 = vld [vmem:[%s8031_s4 + $0xf4] sm:$0xf0] }
  0xc7   :  { %1643 = vmatpush.bf16.msrb.mxu1 %v4727_v43  ;;  %1681 = vmatpush.bf16.msra.mxu0 %v5127_v49  ;;  %v7317_v31 = vpop.f32.mrf.mxu2  ;;  %v7319_v37 = vpop.f32.mrf.mxu3  ;;  %v4644_v43 = vld [vmem:[#allocation7 + $0x238] sm:$0xf0] }
  0xc8   :  { %1598 = vmatmul.bf16.vlgmr.msrb.gmra.mxu3 %v7291_v35  ;;  %v4647_v52 = vor.u32 %v6470_v42, %v4644_v43  ;;  %v1367_v62 = vpop.f32.mrf.mxu1  ;;  %v6606_v43 = vld [vmem:[%s8031_s4 + $0x44] sm:$0xf0] }
  0xc9   :  { %1655 = vmatpush.bf16.msra.mxu3 %v4871_v40  ;;  %1624 = vmatmul.bf16.vlgmr.msrb.gmra.mxu2 %v7275_v55  ;;  %v6578_v55 = vld [vmem:[#allocation7 + $0x58c] sm:$0xf]  ;;  %v4916_v40 = vld [vmem:[#allocation7 + $0x458] sm:$0xf0] }
  0xca   :  { %1668 = vmatpush.bf16.msra.mxu2 %v4999_v41  ;;  %v5079_v7 = vor.u32 %v6578_v55, %v5076_v17  ;;  %v5063_v41 = vor.u32 %v6574_v28, %v5060_v29  ;;  %v1354_v44 = vpop.f32.mrf.mxu0  ;;  %v4919_v49 = vor.u32 %v6538_v39, %v4916_v40  ;;  %v6562_v55 = vld [vmem:[#allocation7 + $0x50c] sm:$0xf]  ;;  %v5262_v29 = vld [vmem:[%s8031_s4 + $0xe0] sm:$0xf]  ;;  %v6608_v39 = vld [vmem:[%s8031_s4 + $0x54] sm:$0xf0] }
  0xcb   :  { %1644 = vmatpush.bf16.msrb.mxu1 %v4711_v60  ;;  %1682 = vmatpush.bf16.msra.mxu0 %v5111_v0  ;;  %v4628_v60 = vld [vmem:[#allocation7 + $0x218] sm:$0xf0]  ;;  %v6594_v0 = vld [vmem:[#allocation7 + $0x60c] sm:$0xf]  ;;  %v5191_v42 = vor.u32 %v6608_v39, %v5190_v38 }
  0xcc   :  { %v4631_v8 = vor.u32 %v6466_v59, %v4628_v60  ;;  %v5143_v17 = vor.u32 %v6594_v0, %v5140_v1  ;;  %v5166_v60 = vld [vmem:[%s8031_s4 + $0x20] sm:$0xf]  ;;  %v6618_v1 = vld [vmem:[%s8031_s4 + $0xa4] sm:$0xf0] }
  0xcd   :  { %1656 = vmatpush.bf16.msra.mxu3 %v4855_v56  ;;  %v4900_v56 = vld [vmem:[#allocation7 + $0x438] sm:$0xf0] }
  0xce   :  { %1669 = vmatpush.bf16.msra.mxu2 %v4983_v58  ;;  %v5047_v58 = vor.u32 %v6570_v46, %v5044_v47 }
  0xcf   :  { %1645 = vmatpush.bf16.msrb.mxu1 %v4695_v9  ;;  %1683 = vmatpush.bf16.msra.mxu0 %v5095_v13  ;;  %v1380_v3 = vpop.f32.mrf.mxu2  ;;  %v4756_v9 = vld [vmem:[#allocation7 + $0x318] sm:$0xf0]  ;;  %v1393_v12 = vpop.f32.mrf.mxu3  ;;  %v5031_v13 = vor.u32 %v6566_v61, %v5028_v63  ;;  %v6602_v61 = vld [vmem:[%s8031_s4 + $0x24] sm:$0xf0] }
  0xd1   :  { %1657 = vmatpush.bf16.msra.mxu3 %v4839_v5  ;;  %v4903_v5 = vor.u32 %v6534_v54, %v4900_v56  ;;  %v5238_v54 = vld [vmem:[%s8031_s4 + $0xb0] sm:$0xf] }
  0xd2   :  { %1670 = vmatpush.bf16.msra.mxu2 %v4967_v6  ;;  %v6498_v6 = vld [vmem:[#allocation7 + $0x30c] sm:$0xf] }
  0xd3   :  { %1646 = vmatpush.bf16.msrb.mxu1 %v4679_v21  ;;  %1684 = vmatpush.bf16.msra.mxu0 %v5079_v7  ;;  %v351_v21 = vperm.slane %v7321_v2, 0  ;;  %v4759_v22 = vor.u32 %v6498_v6, %v4756_v9  ;;  %v6600_v9 = vld [vmem:[%s8031_s4 + $0x14] sm:$0xf0] }
  0xd5   :  { %1658 = vmatpush.bf16.msra.mxu3 %v4823_v18  ;;  %v5012_v18 = vld [vmem:[#allocation7 + $0x518] sm:$0xf0] }
  0xd6   :  { %1671 = vmatpush.bf16.msra.mxu2 %v4951_v19  ;;  %v5270_v19 = vld [vmem:[%s8031_s4 + $0xf0] sm:$0xf]  ;;  %v5015_v7 = vor.u32 %v6562_v55, %v5012_v18  ;;  %v6611_v55 = vld [vmem:[%s8031_s4 + $0x74] sm:$0xf] }
  0xd7   :  { %1647 = vmatpush.bf16.msrb.mxu1 %v4663_v36  ;;  %1685 = vmatpush.bf16.msra.mxu0 %v5063_v41  ;;  %v5271_v28 = vor.u32 %v6628_v20, %v5270_v19  ;;  %v1430_v34 = vpop.f32.mrf.mxu2  ;;  %v5199_v36 = vor.u32 %v6610_v27, %v5198_v26  ;;  %v5208_v19 = vld [vmem:[%s8031_s4 + $0x78] sm:$0xf0]  ;;  %v5214_v20 = vld [vmem:[%s8031_s4 + $0x80] sm:$0xf] }
  0xd8   :  { %v5211_v27 = vor.u32 %v6611_v55, %v5208_v19  ;;  %v5160_v55 = vld [vmem:[%s8031_s4 + $0x18] sm:$0xf0]  ;;  %v6615_v19 = vld [vmem:[%s8031_s4 + $0x94] sm:$0xf] }
  0xd9   :  { %1659 = vmatpush.bf16.msra.mxu3 %v4807_v32  ;;  %v6626_v32 = vld [vmem:[%s8031_s4 + $0xe4] sm:$0xf0] }
  0xda   :  { %1672 = vmatpush.bf16.msra.mxu2 %v4935_v33  ;;  %v1353_v33 = vadd.f32 %v7313_v16, %v351_v21  ;;  %v5263_v40 = vor.u32 %v6626_v32, %v5262_v29  ;;  %v6624_v16 = vld [vmem:[%s8031_s4 + $0xd4] sm:$0xf0]  ;;  %v6614_v21 = vld [vmem:[%s8031_s4 + $0x84] sm:$0xf0]  ;;  %v6609_v29 = vld [vmem:[%s8031_s4 + $0x64] sm:$0xf] }
  0xdb   :  { %1648 = vmatpush.bf16.msrb.mxu1 %v4647_v52  ;;  %1686 = vmatpush.bf16.msra.mxu0 %v5047_v58  ;;  %v6604_v52 = vld [vmem:[%s8031_s4 + $0x34] sm:$0xf0]  ;;  %v5200_v32 = vld [vmem:[%s8031_s4 + $0x68] sm:$0xf0] }
  0xdc   :  { %v1366_v41 = vadd.f32 %v7315_v25, %v1353_v33  ;;  %v5246_v25 = vld [vmem:[%s8031_s4 + $0xc0] sm:$0xf]  ;;  %v5175_v58 = vor.u32 %v6604_v52, %v5174_v50  ;;  %v5203_v39 = vor.u32 %v6609_v29, %v5200_v32  ;;  %v6642_v52 = vld [vmem:[%s8031_s4 + $0x164] sm:$0xf0]  ;;  %v5302_v29 = vld [vmem:[%s8031_s4 + $0x130] sm:$0xf] }
  0xdd   :  { %1660 = vmatpush.bf16.msra.mxu3 %v4791_v48  ;;  %v5326_v50 = vld [vmem:[%s8031_s4 + $0x160] sm:$0xf]  ;;  %v6636_v32 = vld [vmem:[%s8031_s4 + $0x134] sm:$0xf0] }
  0xde   :  { %1673 = vmatpush.bf16.msra.mxu2 %v4919_v49  ;;  %v1404_v46 = vpop.f32.mrf.mxu0 }
  0xdf   :  { %1649 = vmatpush.bf16.msrb.mxu1 %v4631_v8  ;;  %1687 = vmatpush.bf16.msra.mxu0 %v5031_v13  ;;  %v1432_v48 = vpop.f32.mrf.mxu2  ;;  %v5158_v8 = vld [vmem:[%s8031_s4 + $0x10] sm:$0xf] }
  0xe0   :  { %v5159_v12 = vor.u32 %v6600_v9, %v5158_v8  ;;  %v5318_v9 = vld [vmem:[%s8031_s4 + $0x150] sm:$0xf] }
  0xe1   :  { %1661 = vmatpush.bf16.msra.mxu3 %v4775_v4  ;;  %v1417_v47 = vpop.f32.mrf.mxu1  ;;  %v5167_v4 = vor.u32 %v6602_v61, %v5166_v60  ;;  %v5327_v60 = vor.u32 %v6642_v52, %v5326_v50  ;;  %v6619_v61 = vld [vmem:[%s8031_s4 + $0xb4] sm:$0xf]  ;;  %v6630_v50 = vld [vmem:[%s8031_s4 + $0x104] sm:$0xf0] }
  0xe2   :  { %1674 = vmatpush.bf16.msra.mxu2 %v4903_v5  ;;  %1650 = vmatmul.bf16.vlgmr.msrb.gmra.mxu1 %v7273_v51  ;;  %v5254_v51 = vld [vmem:[%s8031_s4 + $0xd0] sm:$0xf] }
  0xe3   :  { %1701 = vmatpush.bf16.msra.mxu1 %v5143_v17  ;;  %1688 = vmatpush.bf16.msra.mxu0 %v5015_v7  ;;  %v5255_v44 = vor.u32 %v6624_v16, %v5254_v51  ;;  %v5192_v51 = vld [vmem:[%s8031_s4 + $0x58] sm:$0xf0] }
  0xe5   :  { %1662 = vmatpush.bf16.msra.mxu3 %v4759_v22  ;;  %v6627_v22 = vld [vmem:[%s8031_s4 + $0xf4] sm:$0xf] }
  0xe6   :  { %1675 = vmatpush.bf16.msra.mxu2 %v4887_v23  ;;  %1689 = vmatmul.bf16.vlgmr.msra.gmra.mxu0 %v7291_v35  ;;  %v1379_v35 = vadd.f32 %v7317_v31, %v1366_v41  ;;  %v6620_v31 = vld [vmem:[%s8031_s4 + $0xb4] sm:$0xf0]  ;;  %v1406_v0 = vpop.f32.mrf.mxu0  ;;  %v5272_v23 = vld [vmem:[%s8031_s4 + $0xf8] sm:$0xf0]  ;;  %v6623_v41 = vld [vmem:[%s8031_s4 + $0xd4] sm:$0xf] }
  0xe7   :  { %2123 = vmatpush.bf16.msrb.mxu1 %v5271_v28  ;;  %v5239_v62 = vor.u32 %v6620_v31, %v5238_v54  ;;  %v7398_v63 = vpop.f32.mrf.mxu3  ;;  %v5215_v28 = vor.u32 %v6614_v21, %v5214_v20  ;;  %v5275_v33 = vor.u32 %v6627_v22, %v5272_v23  ;;  %v352_v54 = vperm.slane %v7321_v2, 1  ;;  %v5310_v20 = vld [vmem:[%s8031_s4 + $0x140] sm:$0xf]  ;;  %v6638_v21 = vld [vmem:[%s8031_s4 + $0x144] sm:$0xf0] }
  0xe8   :  { %1663 = vmatmul.bf16.vlgmr.msra.gmra.mxu3 %v7277_v57  ;;  %v5182_v57 = vld [vmem:[%s8031_s4 + $0x40] sm:$0xf]  ;;  %v1392_v56 = vadd.f32 %v7319_v37, %v1379_v35  ;;  %v5334_v35 = vld [vmem:[%s8031_s4 + $0x170] sm:$0xf]  ;;  %v5311_v23 = vor.u32 %v6638_v21, %v5310_v20  ;;  %v5304_v20 = vld [vmem:[%s8031_s4 + $0x138] sm:$0xf0] }
  0xe9   :  { %2110 = vmatpush.bf16.msrb.mxu3 %v5207_v24  ;;  %1676 = vmatmul.bf16.vlgmr.msra.gmra.mxu2 %v7289_v30  ;;  %v6622_v30 = vld [vmem:[%s8031_s4 + $0xc4] sm:$0xf0]  ;;  %v5183_v49 = vor.u32 %v6606_v43, %v5182_v57  ;;  %v5230_v37 = vld [vmem:[%s8031_s4 + $0xa0] sm:$0xf]  ;;  %v1419_v3 = vpop.f32.mrf.mxu1  ;;  %v5151_v24 = vor.u32 %v6598_v15, %v5150_v14  ;;  %v6605_v43 = vld [vmem:[%s8031_s4 + $0x44] sm:$0xf] }
  0xea   :  { %v5247_v53 = vor.u32 %v6622_v30, %v5246_v25  ;;  %v1405_v59 = vadd.f32 %v1404_v46, %v1392_v56  ;;  %v5231_v10 = vor.u32 %v6618_v1, %v5230_v37  ;;  %v6621_v25 = vld [vmem:[%s8031_s4 + $0xc4] sm:$0xf]  ;;  %v5248_v30 = vld [vmem:[%s8031_s4 + $0xc8] sm:$0xf0]  ;;  %v6603_v56 = vld [vmem:[%s8031_s4 + $0x34] sm:$0xf]  ;;  %v1444_v37 = vadd.f32 %v7398_v63, %v352_v54 }
  0xeb   :  { %2124 = vmatpush.bf16.msrb.mxu1 %v5263_v40  ;;  %v6607_v40 = vld [vmem:[%s8031_s4 + $0x54] sm:$0xf]  ;;  %v6601_v1 = vld [vmem:[%s8031_s4 + $0x24] sm:$0xf]  ;;  %v5168_v3 = vld [vmem:[%s8031_s4 + $0x28] sm:$0xf0] }
  0xec   :  { %v7408_v5 = vpop.f32.mrf.mxu2  ;;  %v1418_v6 = vadd.f32 %v1417_v47, %v1405_v59  ;;  %v5195_v57 = vor.u32 %v6607_v40, %v5192_v51  ;;  %v6644_v47 = vld [vmem:[%s8031_s4 + $0x174] sm:$0xf0]  ;;  %v5251_v59 = vor.u32 %v6621_v25, %v5248_v30  ;;  %v5232_v63 = vld [vmem:[%s8031_s4 + $0xa8] sm:$0xf0]  ;;  %v6599_v15 = vld [vmem:[%s8031_s4 + $0x14] sm:$0xf] }
  0xed   :  { %2111 = vmatpush.bf16.msrb.mxu3 %v5199_v36  ;;  %v5264_v36 = vld [vmem:[%s8031_s4 + $0xe8] sm:$0xf0]  ;;  %v1457_v14 = vadd.f32 %v7408_v5, %v1444_v37  ;;  %v5224_v5 = vld [vmem:[%s8031_s4 + $0x98] sm:$0xf0]  ;;  %v6634_v40 = vld [vmem:[%s8031_s4 + $0x124] sm:$0xf0] }
  0xee   :  { %v1431_v13 = vadd.f32 %v1430_v34, %v1418_v6  ;;  %v6625_v34 = vld [vmem:[%s8031_s4 + $0xe4] sm:$0xf]  ;;  %v6643_v54 = vld [vmem:[%s8031_s4 + $0x174] sm:$0xf] }
  0xef   :  { %2125 = vmatpush.bf16.msrb.mxu1 %v5255_v44  ;;  %v1445_v18 = vpop.f32.mrf.mxu3  ;;  %v5267_v16 = vor.u32 %v6625_v34, %v5264_v36  ;;  %v5184_v44 = vld [vmem:[%s8031_s4 + $0x48] sm:$0xf0]  ;;  %v6617_v6 = vld [vmem:[%s8031_s4 + $0xa4] sm:$0xf]  ;;  %v5303_v36 = vor.u32 %v6636_v32, %v5302_v29 }
  0xf0   :  { %v1707_v26 = vmax.f32 %v1431_v13, 0.0  ;;  %v5171_v13 = vor.u32 %v6601_v1, %v5168_v3  ;;  %v5235_v18 = vor.u32 %v6617_v6, %v5232_v63  ;;  %v5216_v34 = vld [vmem:[%s8031_s4 + $0x88] sm:$0xf0]  ;;  %v5320_v6 = vld [vmem:[%s8031_s4 + $0x158] sm:$0xf0] }
  0xf1   :  { %2112 = vmatpush.bf16.msrb.mxu3 %v5191_v42  ;;  %v5256_v42 = vld [vmem:[%s8031_s4 + $0xd8] sm:$0xf0]  ;;  %v5390_v63 = vld [vmem:[%s8031_s4 + $0x1e0] sm:$0xf] }
  0xf2   :  { %5147 = vmatmul.msk.bf16.vlgmr.msra.gmra.mxu1 %vm1339_vm0, %v7285_v45  ;;  %v5222_v45 = vld [vmem:[%s8031_s4 + $0x90] sm:$0xf]  ;;  %v7458_v38 = vpack.c.bf16 %v1707_v26, %v1707_v26  ;;  %v5259_v46 = vor.u32 %v6623_v41, %v5256_v42  ;;  %v5152_v26 = vld [vmem:[%s8031_s4 + $0x8] sm:$0xf0] }
  0xf3   :  { %2126 = vmatpush.bf16.msrb.mxu1 %v5247_v53  ;;  %v5223_v17 = vor.u32 %v6616_v11, %v5222_v45  ;;  %v5187_v53 = vor.u32 %v6605_v43, %v5184_v44  ;;  %v5286_v44 = vld [vmem:[%s8031_s4 + $0x110] sm:$0xf] }
  0xf4   :  { %v1458_v7 = vpop.f32.mrf.mxu2 }
  0xf5   :  { %2113 = vmatpush.bf16.msrb.mxu3 %v5183_v49  ;;  %v5335_v49 = vor.u32 %v6644_v47, %v5334_v35  ;;  %v6597_v7 = vld [vmem:[%s8031_s4 + $0x4] sm:$0xf] }
  0xf7   :  { %2127 = vmatpush.bf16.msrb.mxu1 %v5239_v62  ;;  %2136 = vmatpush.bf16.msrb.mxu2 %v5335_v49  ;;  %v5240_v62 = vld [vmem:[%s8031_s4 + $0xb8] sm:$0xf0]  ;;  %v5278_v49 = vld [vmem:[%s8031_s4 + $0x100] sm:$0xf] }
  0xf9   :  { %2114 = vmatpush.bf16.msrb.mxu3 %v5175_v58  ;;  %v5176_v58 = vld [vmem:[%s8031_s4 + $0x38] sm:$0xf0] }
  0xfa   :  { %v5179_v0 = vor.u32 %v6603_v56, %v5176_v58  ;;  %v5328_v58 = vld [vmem:[%s8031_s4 + $0x168] sm:$0xf0] }
  0xfb   :  { %2128 = vmatpush.bf16.msrb.mxu1 %v5231_v10  ;;  %2137 = vmatpush.bf16.msrb.mxu2 %v5327_v60  ;;  %v6640_v10 = vld [vmem:[%s8031_s4 + $0x154] sm:$0xf0] }
  0xfc   :  { %v5319_v11 = vor.u32 %v6640_v10, %v5318_v9  ;;  %v6658_v9 = vld [vmem:[%s8031_s4 + $0x1e4] sm:$0xf0] }
  0xfd   :  { %2115 = vmatpush.bf16.msrb.mxu3 %v5167_v4  ;;  %v5243_v4 = vor.u32 %v6619_v61, %v5240_v62  ;;  %v5391_v10 = vor.u32 %v6658_v9, %v5390_v63  ;;  %v5384_v63 = vld [vmem:[%s8031_s4 + $0x1d8] sm:$0xf0] }
  0xfe   :  { %v1469_v48 = vpop.f32.mrf.mxu0 }
  0xff   :  { %2129 = vmatpush.bf16.msrb.mxu1 %v5223_v17  ;;  %2138 = vmatpush.bf16.msrb.mxu2 %v5319_v11  ;;  %v1470_v22 = vadd.f32 %v1469_v48, %v1457_v14 }
 0x101   :  { %2116 = vmatpush.bf16.msrb.mxu3 %v5159_v12  ;;  %v1482_v31 = vpop.f32.mrf.mxu1 }
 0x102   :  { %v1483_v51 = vadd.f32 %v1482_v31, %v1470_v22  ;;  %v6641_v31 = vld [vmem:[%s8031_s4 + $0x164] sm:$0xf]  ;;  %v5374_v22 = vld [vmem:[%s8031_s4 + $0x1c0] sm:$0xf] }
 0x103   :  { %2130 = vmatpush.bf16.msrb.mxu1 %v5215_v28  ;;  %v6613_v28 = vld [vmem:[%s8031_s4 + $0x84] sm:$0xf]  ;;  %2139 = vmatpush.bf16.msrb.mxu2 %v5311_v23  ;;  %v6654_v23 = vld [vmem:[%s8031_s4 + $0x1c4] sm:$0xf0] }
 0x105   :  { %2117 = vmatpush.bf16.msrb.mxu3 %v5151_v24  ;;  %v5163_v24 = vor.u32 %v6599_v15, %v5160_v55 }
 0x106   :  { %v1471_v45 = vpop.f32.mrf.mxu0 }
 0x107   :  { %2175 = vmatpush.bf16.msra.mxu1 %v5275_v33  ;;  %v1495_v8 = vpop.f32.mrf.mxu3  ;;  %2140 = vmatpush.bf16.msrb.mxu2 %v5303_v36  ;;  %v6631_v36 = vld [vmem:[%s8031_s4 + $0x114] sm:$0xf] }
 0x108   :  { %2118 = vmatmul.bf16.vlgmr.msrb.gmra.mxu3 %v7458_v38  ;;  %v1496_v42 = vadd.f32 %v1495_v8, %v1483_v51 }
 0x109   :  { %2162 = vmatpush.bf16.msra.mxu3 %v5211_v27  ;;  %v1484_v17 = vpop.f32.mrf.mxu1  ;;  %v5227_v27 = vor.u32 %v6615_v19, %v5224_v5  ;;  %v6635_v5 = vld [vmem:[%s8031_s4 + $0x134] sm:$0xf] }
 0x10a   :  { %v5382_v17 = vld [vmem:[%s8031_s4 + $0x1d0] sm:$0xf]  ;;  %v5307_v21 = vor.u32 %v6635_v5, %v5304_v20  ;;  %v6649_v20 = vld [vmem:[%s8031_s4 + $0x1a4] sm:$0xf] }
 0x10b   :  { %2176 = vmatpush.bf16.msra.mxu1 %v5267_v16  ;;  %v5155_v16 = vor.u32 %v6597_v7, %v5152_v26  ;;  %v5375_v7 = vor.u32 %v6654_v23, %v5374_v22  ;;  %v5296_v26 = vld [vmem:[%s8031_s4 + $0x128] sm:$0xf0]  ;;  %v6647_v23 = vld [vmem:[%s8031_s4 + $0x194] sm:$0xf] }
 0x10c   :  { %v1508_v12 = vpop.f32.mrf.mxu2 }
 0x10d   :  { %2163 = vmatpush.bf16.msra.mxu3 %v5203_v39  ;;  %v5294_v39 = vld [vmem:[%s8031_s4 + $0x120] sm:$0xf]  ;;  %v1509_v25 = vadd.f32 %v1508_v12, %v1496_v42  ;;  %v6637_v12 = vld [vmem:[%s8031_s4 + $0x144] sm:$0xf] }
 0x10e   :  { %v5295_v43 = vor.u32 %v6634_v40, %v5294_v39  ;;  %v5288_v39 = vld [vmem:[%s8031_s4 + $0x118] sm:$0xf0]  ;;  %v353_v40 = vperm.slane %v7321_v2, 2 }
 0x10f   :  { %2177 = vmatpush.bf16.msra.mxu1 %v5259_v46  ;;  %v1497_v33 = vpop.f32.mrf.mxu3  ;;  %v6632_v46 = vld [vmem:[%s8031_s4 + $0x114] sm:$0xf0]  ;;  %v5291_v42 = vor.u32 %v6631_v36, %v5288_v39 }
 0x110   :  { %2141 = vmatpush.bf16.msrb.mxu2 %v5295_v43  ;;  %v5287_v30 = vor.u32 %v6632_v46, %v5286_v44  ;;  %v6629_v46 = vld [vmem:[%s8031_s4 + $0x104] sm:$0xf] }
 0x111   :  { %2164 = vmatpush.bf16.msra.mxu3 %v5195_v57  ;;  %v5219_v57 = vor.u32 %v6613_v28, %v5216_v34  ;;  %v6652_v28 = vld [vmem:[%s8031_s4 + $0x1b4] sm:$0xf0] }
 0x113   :  { %2178 = vmatpush.bf16.msra.mxu1 %v5251_v59  ;;  %v7600_v59 = vld [vmem:[%s8031_s4 + $0x1f0] sm:$0x33] }
 0x114   :  { %v1510_v41 = vpop.f32.mrf.mxu2  ;;  %2142 = vmatpush.bf16.msrb.mxu2 %v5287_v30  ;;  %v1971_v60 = vunpack.c.l.b16 %v7600_v59 }
 0x115   :  { %2165 = vmatpush.bf16.msra.mxu3 %v5187_v53  ;;  %v5279_v53 = vor.u32 %v6630_v50, %v5278_v49  ;;  %v6650_v41 = vld [vmem:[%s8031_s4 + $0x1a4] sm:$0xf0] }
 0x116   :  { %v2035_v37 = vpack.c.b16 %v1971_v60, %v1971_v60 }
 0x117   :  { %2179 = vmatpush.bf16.msra.mxu1 %v5243_v4  ;;  %v1521_v35 = vpop.f32.mrf.mxu3  ;;  %v6639_v4 = vld [vmem:[%s8031_s4 + $0x154] sm:$0xf] }
 0x118   :  { %v1522_v47 = vadd.f32 %v1521_v35, %v1509_v25  ;;  %2143 = vmatpush.bf16.msrb.mxu2 %v5279_v53  ;;  %v2105_v3 = vsel %vm2103_vm1, %v2035_v37, 0  ;;  %v5323_v8 = vor.u32 %v6639_v4, %v5320_v6  ;;  %v5280_v25 = vld [vmem:[%s8031_s4 + $0x108] sm:$0xf0] }
 0x119   :  { %2166 = vmatpush.bf16.msra.mxu3 %v5179_v0  ;;  %v5331_v0 = vor.u32 %v6641_v31, %v5328_v58  ;;  %2149 = vmatpush.bf16.msrb.mxu0 %v2105_v3  ;;  %v5283_v35 = vor.u32 %v6629_v46, %v5280_v25 }
 0x11a   :  { %v1708_v48 = vmax.f32 %v1522_v47, 0.0  ;;  %v5350_v47 = vld [vmem:[%s8031_s4 + $0x190] sm:$0xf] }
 0x11b   :  { %2180 = vmatpush.bf16.msra.mxu1 %v5235_v18  ;;  %v6656_v18 = vld [vmem:[%s8031_s4 + $0x1d4] sm:$0xf0] }
 0x11c   :  { %v1712_v52 = vpack.c.bf16 %v1708_v48, %v1708_v48  ;;  %v5383_v19 = vor.u32 %v6656_v18, %v5382_v17  ;;  %v6648_v48 = vld [vmem:[%s8031_s4 + $0x194] sm:$0xf0]  ;;  %v6651_v18 = vld [vmem:[%s8031_s4 + $0x1b4] sm:$0xf] }
 0x11d   :  { %2167 = vmatpush.bf16.msra.mxu3 %v5171_v13  ;;  %2150 = vmatpush.bf16.msrb.mxu0 %v5391_v10  ;;  %v5312_v13 = vld [vmem:[%s8031_s4 + $0x148] sm:$0xf0]  ;;  %v5351_v49 = vor.u32 %v6648_v48, %v5350_v47 }
 0x11e   :  { %2131 = vmatmul.bf16.vlgmr.msrb.gmra.mxu1 %v1712_v52  ;;  %v7603_v62 = vpop.f32.mrf.mxu0  ;;  %v5315_v55 = vor.u32 %v6637_v12, %v5312_v13  ;;  %v6653_v12 = vld [vmem:[%s8031_s4 + $0x1c4] sm:$0xf]  ;;  %v5376_v13 = vld [vmem:[%s8031_s4 + $0x1c8] sm:$0xf0] }
 0x11f   :  { %2181 = vmatpush.bf16.msra.mxu1 %v5227_v27  ;;  %v1523_v61 = vpop.f32.mrf.mxu3  ;;  %v5366_v27 = vld [vmem:[%s8031_s4 + $0x1b0] sm:$0xf] }
 0x120   :  { %v5367_v34 = vor.u32 %v6652_v28, %v5366_v27  ;;  %v6645_v27 = vld [vmem:[%s8031_s4 + $0x184] sm:$0xf]  ;;  %v5344_v28 = vld [vmem:[%s8031_s4 + $0x188] sm:$0xf0] }
 0x121   :  { %2168 = vmatpush.bf16.msra.mxu3 %v5163_v24  ;;  %v1534_v1 = vpop.f32.mrf.mxu1  ;;  %2151 = vmatpush.bf16.msrb.mxu0 %v5383_v19  ;;  %v6633_v24 = vld [vmem:[%s8031_s4 + $0x124] sm:$0xf]  ;;  %v5368_v19 = vld [vmem:[%s8031_s4 + $0x1b8] sm:$0xf0] }
 0x122   :  { %v5299_v33 = vor.u32 %v6633_v24, %v5296_v26  ;;  %v1535_v43 = vadd.f32 %v1534_v1, %v353_v40  ;;  %v5371_v5 = vor.u32 %v6651_v18, %v5368_v19  ;;  %v5352_v24 = vld [vmem:[%s8031_s4 + $0x198] sm:$0xf0]  ;;  %v5498_v18 = vld [vmem:[%s8033_s6 + $0xd0] sm:$0xf0]  ;;  %v5504_v19 = vld [vmem:[%s8033_s6 + $0xc8] sm:$0xf] }
 0x123   :  { %2182 = vmatpush.bf16.msra.mxu1 %v5219_v57  ;;  %v5355_v26 = vor.u32 %v6647_v23, %v5352_v24  ;;  %v5506_v23 = vld [vmem:[%s8033_s6 + $0xd8] sm:$0xf0]  ;;  %v5480_v24 = vld [vmem:[%s8033_s6 + $0xa0] sm:$0xf] }
 0x125   :  { %2169 = vmatpush.bf16.msra.mxu3 %v5155_v16  ;;  %2152 = vmatpush.bf16.msrb.mxu0 %v5375_v7  ;;  %v5358_v16 = vld [vmem:[%s8031_s4 + $0x1a0] sm:$0xf]  ;;  %v354_v7 = vperm.slane %v7321_v2, 3 }
 0x126   :  { %v1562_v11 = vpop.f32.mrf.mxu0  ;;  %v5359_v57 = vor.u32 %v6650_v41, %v5358_v16 }
 0x128   :  { %2170 = vmatmul.bf16.vlgmr.msra.gmra.mxu3 %v7458_v38  ;;  %v5336_v38 = vld [vmem:[%s8031_s4 + $0x178] sm:$0xf0] }
 0x129   :  { %v5339_v56 = vor.u32 %v6643_v54, %v5336_v38  ;;  %v1536_v15 = vpop.f32.mrf.mxu1  ;;  %2153 = vmatpush.bf16.msrb.mxu0 %v5367_v34  ;;  %v5342_v54 = vld [vmem:[%s8031_s4 + $0x180] sm:$0xf]  ;;  %v6646_v38 = vld [vmem:[%s8031_s4 + $0x184] sm:$0xf0] }
 0x12a   :  { %v5343_v31 = vor.u32 %v6646_v38, %v5342_v54  ;;  %v5379_v15 = vor.u32 %v6653_v12, %v5376_v13  ;;  %v5522_v12 = vld [vmem:[%s8033_s6 + $0xf8] sm:$0xf0] }
 0x12b   :  { %2188 = vmatpush.bf16.msra.mxu2 %v5339_v56  ;;  %v1547_v45 = vpop.f32.mrf.mxu3 }
 0x12c   :  { %v1573_v14 = vpop.f32.mrf.mxu2  ;;  %v1548_v30 = vadd.f32 %v1547_v45, %v1535_v43 }
 0x12d   :  { %2154 = vmatpush.bf16.msrb.mxu0 %v5359_v57 }
 0x12e   :  { %2183 = vmatmul.bf16.vlgmr.msra.gmra.mxu1 %v1712_v52  ;;  %v1612_v32 = vpop.f32.mrf.mxu0  ;;  %v1972_v52 = vunpack.c.h.b16 %v7600_v59  ;;  %v1561_v53 = vadd.f32 %v7603_v62, %v1548_v30  ;;  %v6657_v59 = vld [vmem:[%s8031_s4 + $0x1e4] sm:$0xf]  ;;  %v5392_v62 = vld [vmem:[%s8031_s4 + $0x1e8] sm:$0xf0] }
 0x12f   :  { %2189 = vmatpush.bf16.msra.mxu2 %v5331_v0  ;;  %v5395_v1 = vor.u32 %v6657_v59, %v5392_v62 }
 0x130   :  { %v2036_v56 = vpack.c.b16 %v1972_v52, %v1972_v52  ;;  %v1574_v60 = vadd.f32 %v1573_v14, %v1561_v53 }
 0x131   :  { %2155 = vmatpush.bf16.msrb.mxu0 %v5351_v49 }
 0x132   :  { %v2108_v58 = vsel %vm2103_vm1, %v2036_v56, 0 }
 0x133   :  { %2190 = vmatpush.bf16.msra.mxu2 %v5323_v8  ;;  %v1549_v29 = vpop.f32.mrf.mxu3  ;;  %v6655_v8 = vld [vmem:[%s8031_s4 + $0x1d4] sm:$0xf] }
 0x134   :  { %v1575_v51 = vpop.f32.mrf.mxu2  ;;  %v5387_v10 = vor.u32 %v6655_v8, %v5384_v63  ;;  %v5514_v8 = vld [vmem:[%s8033_s6 + $0xf0] sm:$0xf0]  ;;  %v5520_v63 = vld [vmem:[%s8033_s6 + $0xe8] sm:$0xf] }
 0x135   :  { %2156 = vmatpush.bf16.msrb.mxu0 %v5343_v31 }
 0x136   :  { %v1614_v44 = vpop.f32.mrf.mxu0 }
 0x137   :  { %2191 = vmatpush.bf16.msra.mxu2 %v5315_v55 }
 0x139   :  { %2201 = vmatpush.bf16.msra.mxu0 %v2108_v58 }
 0x13b   :  { %2192 = vmatpush.bf16.msra.mxu2 %v5307_v21  ;;  %v5360_v21 = vld [vmem:[%s8031_s4 + $0x1a8] sm:$0xf0] }
 0x13c   :  { %v5363_v22 = vor.u32 %v6649_v20, %v5360_v21 }
 0x13d   :  { %2202 = vmatpush.bf16.msra.mxu0 %v5395_v1  ;;  %v6689_v1 = vld [vmem:[%s8033_s6 + $0xec] sm:$0xf0] }
 0x13f   :  { %2193 = vmatpush.bf16.msra.mxu2 %v5299_v33  ;;  %v1586_v50 = vpop.f32.mrf.mxu1  ;;  %v5347_v33 = vor.u32 %v6645_v27, %v5344_v28  ;;  %v6679_v27 = vld [vmem:[%s8033_s6 + $0xa4] sm:$0xf]  ;;  %v5482_v28 = vld [vmem:[%s8033_s6 + $0xb0] sm:$0xf0] }
 0x140   :  { %v1587_v0 = vadd.f32 %v1586_v50, %v1574_v60  ;;  %v1778_v50 = vld [vmem:[#allocation10] sm:$0x3] }
 0x141   :  { %2203 = vmatpush.bf16.msra.mxu0 %v5387_v10  ;;  %v1780_v52 = vperm.slane %v1778_v50, 0  ;;  %v1781_v60 = vperm.slane %v1778_v50, 1  ;;  %v6673_v50 = vld [vmem:[%s8033_s6 + $0x6c] sm:$0xf0] }
 0x143   :  { %2194 = vmatpush.bf16.msra.mxu2 %v5291_v42  ;;  %v1638_v61 = vpop.f32.mrf.mxu0 }
 0x145   :  { %2204 = vmatpush.bf16.msra.mxu0 %v5379_v15  ;;  %v6685_v15 = vld [vmem:[%s8033_s6 + $0xcc] sm:$0xf0] }
 0x147   :  { %2195 = vmatpush.bf16.msra.mxu2 %v5283_v35  ;;  %v1588_v37 = vpop.f32.mrf.mxu1 }
 0x148   :  { %v5512_v37 = vld [vmem:[%s8033_s6 + $0xe0] sm:$0xf] }
 0x149   :  { %2205 = vmatpush.bf16.msra.mxu0 %v5371_v5  ;;  %v6686_v5 = vld [vmem:[%s8033_s6 + $0xd4] sm:$0xf0] }
 0x14a   :  { %v5505_v21 = vor.u32 %v6686_v5, %v5504_v19 }
 0x14b   :  { %v1599_v3 = vpop.f32.mrf.mxu3  ;;  %v1640_v11 = vpop.f32.mrf.mxu0 }
 0x14c   :  { %v1600_v4 = vadd.f32 %v1599_v3, %v1587_v0  ;;  %v1625_v6 = vpop.f32.mrf.mxu2  ;;  %v6687_v3 = vld [vmem:[%s8033_s6 + $0xe4] sm:$0xf]  ;;  %v6688_v11 = vld [vmem:[%s8033_s6 + $0xec] sm:$0xf] }
 0x14d   :  { %2206 = vmatpush.bf16.msra.mxu0 %v5363_v22  ;;  %v1626_v29 = vadd.f32 %v1625_v6, %v354_v7  ;;  %v5513_v6 = vor.u32 %v6689_v1, %v5512_v37  ;;  %v5517_v10 = vor.u32 %v6687_v3, %v5514_v8  ;;  %v5525_v13 = vor.u32 %v6688_v11, %v5522_v12  ;;  %v6684_v22 = vld [vmem:[%s8033_s6 + $0xcc] sm:$0xf]  ;;  %v5432_v1 = vld [vmem:[%s8033_s6 + $0x40] sm:$0xf]  ;;  %v6669_v3 = vld [vmem:[%s8033_s6 + $0x4c] sm:$0xf0] }
 0x14e   :  { %v1613_v9 = vadd.f32 %v1612_v32, %v1600_v4  ;;  %v5509_v7 = vor.u32 %v6684_v22, %v5506_v23  ;;  %v5433_v8 = vor.u32 %v6669_v3, %v5432_v1  ;;  %v6668_v12 = vld [vmem:[%s8033_s6 + $0x4c] sm:$0xf]  ;;  %v6736_v1 = vld [vmem:[#allocation13 + $0x168] sm:$0xf0] }
 0x14f   :  { %v1639_v34 = vadd.f32 %v1638_v61, %v1626_v29  ;;  %2425 = vmatpush.bf16.msrb.mxu3 %v5513_v6  ;;  %2438 = vmatpush.bf16.msrb.mxu1 %v5517_v10  ;;  %v6667_v6 = vld [vmem:[%s8033_s6 + $0x44] sm:$0xf]  ;;  %v6670_v10 = vld [vmem:[%s8033_s6 + $0x54] sm:$0xf0]  ;;  %v6664_v22 = vld [vmem:[%s8033_s6 + $0x2c] sm:$0xf] }
 0x150   :  { %v1709_v45 = vmax.f32 %v1613_v9, 0.0  ;;  %v6690_v9 = vld [vmem:[%s8033_s6 + $0xf4] sm:$0xf0] }
 0x151   :  { %2207 = vmatpush.bf16.msra.mxu0 %v5355_v26  ;;  %v6681_v26 = vld [vmem:[%s8033_s6 + $0xac] sm:$0xf0] }
 0x152   :  { %v1713_v14 = vpack.c.bf16 %v1709_v45, %v1709_v45  ;;  %v5521_v45 = vor.u32 %v6690_v9, %v5520_v63  ;;  %v5481_v29 = vor.u32 %v6681_v26, %v5480_v24  ;;  %v5434_v63 = vld [vmem:[%s8033_s6 + $0x50] sm:$0xf0]  ;;  %v5440_v9 = vld [vmem:[%s8033_s6 + $0x48] sm:$0xf]  ;;  %v5400_v26 = vld [vmem:[%s8033_s6] sm:$0xf] }
 0x153   :  { %v1601_v55 = vpop.f32.mrf.mxu3  ;;  %v5441_v11 = vor.u32 %v6670_v10, %v5440_v9  ;;  %v6848_v9 = vld [vmem:[#allocation13 + $0x4e8] sm:$0xf0] }
 0x154   :  { %2144 = vmatmul.bf16.vlgmr.msrb.gmra.mxu2 %v1713_v14  ;;  %v1627_v17 = vpop.f32.mrf.mxu2  ;;  %v6683_v55 = vld [vmem:[%s8033_s6 + $0xc4] sm:$0xf] }
 0x155   :  { %2208 = vmatpush.bf16.msra.mxu0 %v5347_v33  ;;  %2451 = vmatpush.bf16.msrb.mxu2 %v5521_v45  ;;  %v5501_v20 = vor.u32 %v6683_v55, %v5498_v18  ;;  %v5488_v33 = vld [vmem:[%s8033_s6 + $0xa8] sm:$0xf]  ;;  %v5437_v45 = vor.u32 %v6667_v6, %v5434_v63  ;;  %v6665_v55 = vld [vmem:[%s8033_s6 + $0x2c] sm:$0xf0]  ;;  %v5418_v18 = vld [vmem:[%s8033_s6 + $0x30] sm:$0xf0] }
 0x156   :  { %v6340_v6 = vld [vmem:[#allocation13 + $0x658] sm:$0xf]  ;;  %v6144_v63 = vld [vmem:[#allocation13 + $0x4d0] sm:$0xf] }
 0x157   :  { %2439 = vmatpush.bf16.msrb.mxu1 %v5501_v20  ;;  %v5424_v20 = vld [vmem:[%s8033_s6 + $0x28] sm:$0xf] }
 0x159   :  { %2452 = vmatpush.bf16.msrb.mxu2 %v5505_v21  ;;  %v6666_v21 = vld [vmem:[%s8033_s6 + $0x34] sm:$0xf0] }
 0x15a   :  { %v5425_v24 = vor.u32 %v6666_v21, %v5424_v20  ;;  %v6312_v20 = vld [vmem:[#allocation13 + $0x620] sm:$0xf]  ;;  %v6890_v21 = vld [vmem:[#allocation13 + $0x638] sm:$0xf0] }
 0x15f   :  { %v1651_v32 = vpop.f32.mrf.mxu1 }
 0x160   :  { %v1652_v39 = vadd.f32 %v1651_v32, %v1639_v34  ;;  %v5485_v32 = vor.u32 %v6679_v27, %v5482_v28  ;;  %v6682_v34 = vld [vmem:[%s8033_s6 + $0xb4] sm:$0xf0]  ;;  %v6661_v27 = vld [vmem:[%s8033_s6 + $0xc] sm:$0xf0] }
 0x162   :  { %2440 = vmatpush.bf16.msrb.mxu1 %v5485_v32  ;;  %v5402_v32 = vld [vmem:[%s8033_s6 + $0x10] sm:$0xf0] }
 0x163   :  { %v1690_v36 = vpop.f32.mrf.mxu0 }
 0x164   :  { %2196 = vmatmul.bf16.vlgmr.msra.gmra.mxu2 %v1713_v14  ;;  %v5496_v14 = vld [vmem:[%s8033_s6 + $0xc0] sm:$0xf] }
 0x165   :  { %v5497_v17 = vor.u32 %v6685_v15, %v5496_v14  ;;  %v5416_v14 = vld [vmem:[%s8033_s6 + $0x20] sm:$0xf] }
 0x166   :  { %v5417_v19 = vor.u32 %v6665_v55, %v5416_v14  ;;  %v5668_v14 = vld [vmem:[#allocation13 + $0x118] sm:$0xf] }
 0x167   :  { %v1653_v2 = vpop.f32.mrf.mxu1  ;;  %2426 = vmatpush.bf16.msrb.mxu3 %v5497_v17  ;;  %v6663_v17 = vld [vmem:[%s8033_s6 + $0x24] sm:$0xf] }
 0x168   :  { %v5489_v2 = vor.u32 %v6682_v34, %v5488_v33  ;;  %v5421_v5 = vor.u32 %v6663_v17, %v5418_v18  ;;  %v5408_v33 = vld [vmem:[%s8033_s6 + $0x8] sm:$0xf]  ;;  %v5401_v34 = vor.u32 %v6661_v27, %v5400_v26  ;;  %v6116_v55 = vld [vmem:[#allocation13 + $0x498] sm:$0xf]  ;;  %v6841_v18 = vld [vmem:[#allocation13 + $0x4b0] sm:$0xf0] }
 0x169   :  { %v6722_v26 = vld [vmem:[#allocation13 + $0xf8] sm:$0xf0]  ;;  %v6088_v27 = vld [vmem:[#allocation13 + $0x460] sm:$0xf] }
 0x16a   :  { %2453 = vmatpush.bf16.msrb.mxu2 %v5489_v2  ;;  %v5410_v2 = vld [vmem:[%s8033_s6 + $0x18] sm:$0xf0] }
 0x16b   :  { %v1664_v40 = vpop.f32.mrf.mxu3  ;;  %v1692_v42 = vpop.f32.mrf.mxu0  ;;  %2427 = vmatpush.bf16.msrb.mxu3 %v5481_v29  ;;  %v6659_v29 = vld [vmem:[%s8033_s6 + $0x4] sm:$0xf] }
 0x16c   :  { %v1665_v51 = vadd.f32 %v1664_v40, %v1652_v39  ;;  %v1677_v16 = vpop.f32.mrf.mxu2  ;;  %v5490_v40 = vld [vmem:[%s8033_s6 + $0xb8] sm:$0xf0]  ;;  %v6675_v42 = vld [vmem:[%s8033_s6 + $0x84] sm:$0xf] }
 0x16e   :  { %v1678_v41 = vadd.f32 %v1677_v16, %v1665_v51  ;;  %v5464_v16 = vld [vmem:[%s8033_s6 + $0x80] sm:$0xf] }
 0x16f   :  { %v1703_v43 = vpop.f32.mrf.mxu1 }
 0x170   :  { %v1691_v57 = vadd.f32 %v1690_v36, %v1678_v41  ;;  %v6680_v36 = vld [vmem:[%s8033_s6 + $0xac] sm:$0xf]  ;;  %v6677_v41 = vld [vmem:[%s8033_s6 + $0x8c] sm:$0xf0] }
 0x171   :  { %v5493_v51 = vor.u32 %v6680_v36, %v5490_v40  ;;  %v6662_v36 = vld [vmem:[%s8033_s6 + $0x14] sm:$0xf0] }
 0x172   :  { %v1704_v44 = vadd.f32 %v1703_v43, %v1691_v57  ;;  %v5465_v57 = vor.u32 %v6677_v41, %v5464_v16  ;;  %v5466_v43 = vld [vmem:[%s8033_s6 + $0x90] sm:$0xf0]  ;;  %v5409_v16 = vor.u32 %v6662_v36, %v5408_v33  ;;  %v6771_v33 = vld [vmem:[#allocation13 + $0x280] sm:$0xf0] }
 0x173   :  { %v1666_v46 = vpop.f32.mrf.mxu3 }
 0x174   :  { %v1679_v25 = vpop.f32.mrf.mxu2  ;;  %v1710_v30 = vmax.f32 %v1704_v44, 0.0  ;;  %v5472_v44 = vld [vmem:[%s8033_s6 + $0x88] sm:$0xf]  ;;  %v6678_v46 = vld [vmem:[%s8033_s6 + $0x94] sm:$0xf0]  ;;  %2428 = vmatpush.bf16.msrb.mxu3 %v5465_v57 }
 0x175   :  { %v5469_v25 = vor.u32 %v6675_v42, %v5466_v43  ;;  %v5948_v43 = vld [vmem:[#allocation13 + $0x348] sm:$0xf] }
 0x176   :  { %v1714_v35 = vpack.c.bf16 %v1710_v30, %v1710_v30  ;;  %v5473_v30 = vor.u32 %v6678_v46, %v5472_v44  ;;  %v6799_v44 = vld [vmem:[#allocation13 + $0x360] sm:$0xf0]  ;;  %v7938_v46 = vld [vmem:[#allocation13 + $0x6c8] sm:$0x33] }
 0x177   :  { %v1705_v47 = vpop.f32.mrf.mxu1  ;;  %2441 = vmatpush.bf16.msrb.mxu1 %v5469_v25  ;;  %v5920_v25 = vld [vmem:[#allocation13 + $0x310] sm:$0xf] }
 0x178   :  { %5396 = vmatmul.msk.bf16.vlgmr.msrb.gmra.mxu0 %vm2099_vm2, %v1714_v35  ;;  %v5474_v47 = vld [vmem:[%s8033_s6 + $0x98] sm:$0xf0]  ;;  %2454 = vmatpush.bf16.msrb.mxu2 %v5473_v30  ;;  %v6792_v30 = vld [vmem:[#allocation13 + $0x328] sm:$0xf0] }
 0x179   :  { %2464 = vmatpush.bf16.msrb.mxu0 %v5525_v13  ;;  %v5442_v13 = vld [vmem:[%s8033_s6 + $0x58] sm:$0xf0] }
 0x17a   :  { %v5445_v15 = vor.u32 %v6668_v12, %v5442_v13  ;;  %v5864_v12 = vld [vmem:[#allocation13 + $0x2a0] sm:$0xf]  ;;  %v6778_v13 = vld [vmem:[#allocation13 + $0x2b8] sm:$0xf0] }
 0x17d   :  { %2465 = vmatpush.bf16.msrb.mxu0 %v5509_v7  ;;  %v5426_v7 = vld [vmem:[%s8033_s6 + $0x38] sm:$0xf0] }
 0x17e   :  { %v5429_v28 = vor.u32 %v6664_v22, %v5426_v7  ;;  %v6117_v22 = vor.u32 %v6841_v18, %v6116_v55  ;;  %v5865_v7 = vor.u32 %v6778_v13, %v5864_v12  ;;  %v5752_v12 = vld [vmem:[#allocation13 + $0x1c0] sm:$0xf]  ;;  %v6750_v13 = vld [vmem:[#allocation13 + $0x1d8] sm:$0xf0] }
 0x17f   :  { %v6200_v55 = vld [vmem:[#allocation13 + $0x540] sm:$0xf] }
 0x180   :  { %v5528_v18 = vld [vmem:[#allocation13] sm:$0xf] }
 0x181   :  { %2466 = vmatpush.bf16.msrb.mxu0 %v5493_v51  ;;  %v5405_v51 = vor.u32 %v6659_v29, %v5402_v32  ;;  %v5836_v32 = vld [vmem:[#allocation13 + $0x268] sm:$0xf] }
 0x188   :  { %5397 = vmatmul.msk.bf16.vlgmr.msra.gmra.mxu0 %vm2099_vm2, %v1714_v35  ;;  %v6676_v35 = vld [vmem:[%s8033_s6 + $0x8c] sm:$0xf] }
 0x18b   :  { %v2119_v48 = vpop.f32.mrf.mxu3 }
 0x18c   :  { %v2120_v53 = vadd.f32 %v2119_v48, %v1780_v52  ;;  %v5477_v48 = vor.u32 %v6676_v35, %v5474_v47  ;;  %v6671_v52 = vld [vmem:[%s8033_s6 + $0x64] sm:$0xf]  ;;  %v6368_v35 = vld [vmem:[#allocation13 + $0x690] sm:$0xf]  ;;  %v5724_v47 = vld [vmem:[#allocation13 + $0x188] sm:$0xf] }
 0x18e   :  { %2467 = vmatpush.bf16.msrb.mxu0 %v5477_v48  ;;  %v6743_v48 = vld [vmem:[#allocation13 + $0x1a0] sm:$0xf0] }
 0x193   :  { %v2121_v49 = vpop.f32.mrf.mxu3 }
 0x194   :  { %v5448_v49 = vld [vmem:[%s8033_s6 + $0x60] sm:$0xf] }
 0x19b   :  { %v2132_v54 = vpop.f32.mrf.mxu1 }
 0x19c   :  { %v7733_v31 = vadd.f32 %v2132_v54, %v2120_v53  ;;  %v5449_v54 = vor.u32 %v6673_v50, %v5448_v49 }
 0x19e   :  { %2429 = vmatpush.bf16.msrb.mxu3 %v5449_v54  ;;  %v6904_v54 = vld [vmem:[#allocation13 + $0x6a8] sm:$0xf0] }
 0x19f   :  { %v6369_v3 = vor.u32 %v6904_v54, %v6368_v35  ;;  %v6032_v54 = vld [vmem:[#allocation13 + $0x3f0] sm:$0xf] }
 0x1a2   :  { %2430 = vmatpush.bf16.msrb.mxu3 %v5433_v8 }
 0x1a3   :  { %v2134_v56 = vpop.f32.mrf.mxu1 }
 0x1a4   :  { %v5456_v56 = vld [vmem:[%s8033_s6 + $0x68] sm:$0xf] }
 0x1a6   :  { %2431 = vmatpush.bf16.msrb.mxu3 %v5417_v19 }
 0x1aa   :  { %2432 = vmatpush.bf16.msrb.mxu3 %v5401_v34  ;;  %v6284_v34 = vld [vmem:[#allocation13 + $0x5e8] sm:$0xf] }
 0x1ab   :  { %v2171_v38 = vpop.f32.mrf.mxu3  ;;  %v2184_v59 = vpop.f32.mrf.mxu1 }
 0x1ac   :  { %v2172_v61 = vadd.f32 %v2171_v38, %v1781_v60  ;;  %v5450_v38 = vld [vmem:[%s8033_s6 + $0x70] sm:$0xf0] }
 0x1ad   :  { %v5453_v60 = vor.u32 %v6671_v52, %v5450_v38  ;;  %v5921_v52 = vor.u32 %v6792_v30, %v5920_v25  ;;  %v5725_v38 = vor.u32 %v6743_v48, %v5724_v47  ;;  %v6256_v30 = vld [vmem:[#allocation13 + $0x5b0] sm:$0xf]  ;;  %v6708_v48 = vld [vmem:[#allocation13 + $0x88] sm:$0xf0] }
 0x1ae   :  { %v7735_v62 = vadd.f32 %v2184_v59, %v2172_v61  ;;  %v6672_v59 = vld [vmem:[%s8033_s6 + $0x6c] sm:$0xf]  ;;  %v5584_v47 = vld [vmem:[#allocation13 + $0x70] sm:$0xf] }
 0x1af   :  { %2442 = vmatpush.bf16.msrb.mxu1 %v5453_v60  ;;  %3911 = vmatpush.bf16.msra.mxu3 %v5725_v38  ;;  %v6820_v38 = vld [vmem:[#allocation13 + $0x408] sm:$0xf0] }
 0x1b3   :  { %v2173_v58 = vpop.f32.mrf.mxu3  ;;  %v2186_v0 = vpop.f32.mrf.mxu1  ;;  %2443 = vmatpush.bf16.msrb.mxu1 %v5437_v45  ;;  %v6897_v45 = vld [vmem:[#allocation13 + $0x670] sm:$0xf0] }
 0x1b4   :  { %v6674_v58 = vld [vmem:[%s8033_s6 + $0x74] sm:$0xf0]  ;;  %v5458_v0 = vld [vmem:[%s8033_s6 + $0x78] sm:$0xf0] }
 0x1b5   :  { %v5457_v61 = vor.u32 %v6674_v58, %v5456_v56  ;;  %v5461_v37 = vor.u32 %v6672_v59, %v5458_v0  ;;  %v6172_v56 = vld [vmem:[#allocation13 + $0x508] sm:$0xf]  ;;  %v6855_v58 = vld [vmem:[#allocation13 + $0x520] sm:$0xf0]  ;;  %v6785_v59 = vld [vmem:[#allocation13 + $0x2f0] sm:$0xf0] }
 0x1b6   :  { %v6173_v60 = vor.u32 %v6855_v58, %v6172_v56  ;;  %v5780_v56 = vld [vmem:[#allocation13 + $0x1f8] sm:$0xf]  ;;  %v6757_v58 = vld [vmem:[#allocation13 + $0x210] sm:$0xf0] }
 0x1b7   :  { %2455 = vmatpush.bf16.msrb.mxu2 %v5457_v61  ;;  %2468 = vmatpush.bf16.msrb.mxu0 %v5461_v37  ;;  %v5892_v61 = vld [vmem:[#allocation13 + $0x2d8] sm:$0xf]  ;;  %v5696_v37 = vld [vmem:[#allocation13 + $0x150] sm:$0xf] }
 0x1b8   :  { %2444 = vmatpush.bf16.msrb.mxu1 %v5421_v5  ;;  %v5697_v8 = vor.u32 %v6736_v1, %v5696_v37  ;;  %v5893_v10 = vor.u32 %v6785_v59, %v5892_v61  ;;  %v6341_v5 = vor.u32 %v6897_v45, %v6340_v6  ;;  %v5585_v61 = vor.u32 %v6708_v48, %v5584_v47  ;;  %v5556_v1 = vld [vmem:[#allocation13 + $0x38] sm:$0xf] }
 0x1b9   :  { %v6033_v37 = vor.u32 %v6820_v38, %v6032_v54  ;;  %v5781_v6 = vor.u32 %v6757_v58, %v5780_v56  ;;  %v6342_v47 = vld [vmem:[#allocation13 + $0x674] sm:$0xf0]  ;;  %v6838_v54 = vld [vmem:[#allocation13 + $0x49c] sm:$0xf] }
 0x1ba   :  { %3912 = vmatpush.bf16.msra.mxu3 %v5697_v8  ;;  %v6869_v8 = vld [vmem:[#allocation13 + $0x590] sm:$0xf0]  ;;  %v6118_v38 = vld [vmem:[#allocation13 + $0x4b4] sm:$0xf0] }
 0x1bb   :  { %2456 = vmatpush.bf16.msrb.mxu2 %v5441_v11  ;;  %2469 = vmatpush.bf16.msrb.mxu0 %v5445_v15  ;;  %v6145_v11 = vor.u32 %v6848_v9, %v6144_v63  ;;  %v6729_v15 = vld [vmem:[#allocation13 + $0x130] sm:$0xf0]  ;;  %v3440_v63 = vunpack.c.h.b16 %v7938_v46  ;;  %v6004_v9 = vld [vmem:[#allocation13 + $0x3b8] sm:$0xf] }
 0x1bc   :  { %2445 = vmatpush.bf16.msrb.mxu1 %v5405_v51  ;;  %v5669_v17 = vor.u32 %v6729_v15, %v5668_v14  ;;  %v5837_v51 = vor.u32 %v6771_v33, %v5836_v32  ;;  %v6852_v32 = vld [vmem:[#allocation13 + $0x50c] sm:$0xf]  ;;  %v6174_v33 = vld [vmem:[#allocation13 + $0x524] sm:$0xf0] }
 0x1be   :  { %3913 = vmatpush.bf16.msra.mxu3 %v5669_v17 }
 0x1bf   :  { %2457 = vmatpush.bf16.msrb.mxu2 %v5425_v24  ;;  %2470 = vmatpush.bf16.msrb.mxu0 %v5429_v28  ;;  %v6834_v28 = vld [vmem:[#allocation13 + $0x478] sm:$0xf0] }
 0x1c3   :  { %2458 = vmatpush.bf16.msrb.mxu2 %v5409_v16  ;;  %v6883_v16 = vld [vmem:[#allocation13 + $0x600] sm:$0xf0] }
 0x1c4   :  { %v6285_v25 = vor.u32 %v6883_v16, %v6284_v34  ;;  %v6177_v16 = vor.u32 %v6852_v32, %v6174_v33  ;;  %v6866_v33 = vld [vmem:[#allocation13 + $0x57c] sm:$0xf] }
 0x1c7   :  { %3937 = vmatpush.bf16.msra.mxu2 %v6173_v60  ;;  %v2219_v60 = vld [vmem:[#allocation5] sm:$0xff] }
 0x1cb   :  { %3938 = vmatpush.bf16.msra.mxu2 %v6145_v11 }
 0x1cf   :  { %3939 = vmatpush.bf16.msra.mxu2 %v6117_v22  ;;  %v3664_v22 = vpack.c.b16 %v3440_v63, %v3440_v63  ;;  %v6090_v63 = vld [vmem:[#allocation13 + $0x47c] sm:$0xf0] }
 0x1d7   :  { %v7746_v4 = vpop.f32.mrf.mxu2 }
 0x1d8   :  { %v2146_v40 = vadd.f32 %v7746_v4, %v7733_v31  ;;  %v5949_v31 = vor.u32 %v6799_v44, %v5948_v43  ;;  %v3439_v4 = vunpack.c.l.b16 %v7938_v46  ;;  %v5808_v44 = vld [vmem:[#allocation13 + $0x230] sm:$0xf]  ;;  %v6796_v46 = vld [vmem:[#allocation13 + $0x34c] sm:$0xf] }
 0x1da   :  { %3924 = vmatpush.bf16.msra.mxu1 %v5949_v31  ;;  %v3663_v50 = vpack.c.b16 %v3439_v4, %v3439_v4  ;;  %v6764_v31 = vld [vmem:[#allocation13 + $0x248] sm:$0xf0] }
 0x1dc   :  { %v3891_v0 = vsel %vm2103_vm1, %v3663_v50, 0  ;;  %v5809_v50 = vor.u32 %v6764_v31, %v5808_v44  ;;  %v6146_v44 = vld [vmem:[#allocation13 + $0x4ec] sm:$0xf0] }
 0x1de   :  { %3925 = vmatpush.bf16.msra.mxu1 %v5921_v52  ;;  %v6876_v52 = vld [vmem:[#allocation13 + $0x5c8] sm:$0xf0] }
 0x1df   :  { %v2147_v39 = vpop.f32.mrf.mxu2  ;;  %v6257_v59 = vor.u32 %v6876_v52, %v6256_v30  ;;  %v5894_v30 = vld [vmem:[#allocation13 + $0x2f4] sm:$0xf0] }
 0x1e0   :  { %v6660_v39 = vld [vmem:[%s8033_s6 + $0xc] sm:$0xf]  ;;  %v5670_v52 = vld [vmem:[#allocation13 + $0x134] sm:$0xf0] }
 0x1e1   :  { %v5413_v42 = vor.u32 %v6660_v39, %v5410_v2  ;;  %v6089_v39 = vor.u32 %v6834_v28, %v6088_v27  ;;  %v5612_v2 = vld [vmem:[#allocation13 + $0xa8] sm:$0xf]  ;;  %v5753_v27 = vor.u32 %v6750_v13, %v5752_v12  ;;  %v6880_v12 = vld [vmem:[#allocation13 + $0x5ec] sm:$0xf] }
 0x1e2   :  { %3926 = vmatpush.bf16.msra.mxu1 %v5893_v10  ;;  %v6813_v10 = vld [vmem:[#allocation13 + $0x3d0] sm:$0xf0]  ;;  %v6286_v13 = vld [vmem:[#allocation13 + $0x604] sm:$0xf0] }
 0x1e3   :  { %2471 = vmatpush.bf16.msrb.mxu0 %v5413_v42  ;;  %v6827_v42 = vld [vmem:[#allocation13 + $0x440] sm:$0xf0]  ;;  %3940 = vmatpush.bf16.msra.mxu2 %v6089_v39  ;;  %v6005_v17 = vor.u32 %v6813_v10, %v6004_v9 }
 0x1e6   :  { %3927 = vmatpush.bf16.msra.mxu1 %v5865_v7  ;;  %v6740_v7 = vld [vmem:[#allocation13 + $0x18c] sm:$0xf] }
 0x1e7   :  { %v7844_v53 = vpop.f32.mrf.mxu2  ;;  %3950 = vmatpush.bf16.msra.mxu0 %v3891_v0  ;;  %v6228_v0 = vld [vmem:[#allocation13 + $0x578] sm:$0xf] }
 0x1e8   :  { %v2198_v19 = vadd.f32 %v7844_v53, %v7735_v62  ;;  %v6313_v53 = vor.u32 %v6890_v21, %v6312_v20  ;;  %v6229_v15 = vor.u32 %v6869_v8, %v6228_v0  ;;  %v6862_v20 = vld [vmem:[#allocation13 + $0x558] sm:$0xf0]  ;;  %v5950_v21 = vld [vmem:[#allocation13 + $0x364] sm:$0xf0]  ;;  %v6314_v0 = vld [vmem:[#allocation13 + $0x63c] sm:$0xf0] }
 0x1e9   :  { %v6201_v34 = vor.u32 %v6862_v20, %v6200_v55  ;;  %v6831_v8 = vld [vmem:[#allocation13 + $0x464] sm:$0xf]  ;;  %v6258_v20 = vld [vmem:[#allocation13 + $0x5cc] sm:$0xf0] }
 0x1ea   :  { %3928 = vmatpush.bf16.msra.mxu1 %v5837_v51 }
 0x1eb   :  { %3951 = vmatpush.bf16.msra.mxu0 %v6369_v3  ;;  %v6701_v3 = vld [vmem:[#allocation13 + $0x50] sm:$0xf0] }
 0x1ec   :  { %v5557_v14 = vor.u32 %v6701_v3, %v5556_v1  ;;  %v6121_v1 = vor.u32 %v6838_v54, %v6118_v38  ;;  %v6719_v3 = vld [vmem:[#allocation13 + $0xe4] sm:$0xf]  ;;  %v5978_v54 = vld [vmem:[#allocation13 + $0x39c] sm:$0xf0] }
 0x1ee   :  { %3929 = vmatpush.bf16.msra.mxu1 %v5809_v50  ;;  %v6726_v50 = vld [vmem:[#allocation13 + $0x11c] sm:$0xf] }
 0x1ef   :  { %v2199_v23 = vpop.f32.mrf.mxu2  ;;  %3952 = vmatpush.bf16.msra.mxu0 %v6341_v5 }
 0x1f0   :  { %v5640_v23 = vld [vmem:[#allocation13 + $0xe0] sm:$0xf] }
 0x1f1   :  { %v5641_v36 = vor.u32 %v6722_v26, %v5640_v23  ;;  %v5976_v23 = vld [vmem:[#allocation13 + $0x380] sm:$0xf] }
 0x1f2   :  { %3930 = vmatpush.bf16.msra.mxu1 %v5781_v6  ;;  %v5642_v6 = vld [vmem:[#allocation13 + $0xfc] sm:$0xf0] }
 0x1f3   :  { %3914 = vmatpush.bf16.msra.mxu3 %v5641_v36  ;;  %3953 = vmatpush.bf16.msra.mxu0 %v6313_v53  ;;  %v5953_v36 = vor.u32 %v6796_v46, %v5950_v21  ;;  %v5922_v53 = vld [vmem:[#allocation13 + $0x32c] sm:$0xf0] }
 0x1f5   :  { %v2158_v41 = vpop.f32.mrf.mxu0 }
 0x1f6   :  { %v7935_v57 = vadd.f32 %v2158_v41, %v2146_v40  ;;  %v6715_v40 = vld [vmem:[#allocation13 + $0xc0] sm:$0xf0]  ;;  %v6060_v41 = vld [vmem:[#allocation13 + $0x428] sm:$0xf]  ;;  %3931 = vmatpush.bf16.msra.mxu1 %v5753_v27 }
 0x1f7   :  { %v5613_v4 = vor.u32 %v6715_v40, %v5612_v2  ;;  %v6061_v35 = vor.u32 %v6827_v42, %v6060_v41  ;;  %3954 = vmatpush.bf16.msra.mxu0 %v6285_v25  ;;  %v6901_v2 = vld [vmem:[#allocation13 + $0x694] sm:$0xf]  ;;  %v6370_v40 = vld [vmem:[#allocation13 + $0x6ac] sm:$0xf0]  ;;  %v6782_v25 = vld [vmem:[#allocation13 + $0x2dc] sm:$0xf] }
 0x1f8   :  { %2214 = vst [vmem:[#allocation15] sm:$0xff] %v7935_v57  ;;  %v6733_v41 = vld [vmem:[#allocation13 + $0x154] sm:$0xf]  ;;  %v5698_v42 = vld [vmem:[#allocation13 + $0x16c] sm:$0xf0]  ;;  %v5897_v56 = vor.u32 %v6782_v25, %v5894_v30 }
 0x1f9   :  { %3915 = vmatpush.bf16.msra.mxu3 %v5613_v4  ;;  %3941 = vmatpush.bf16.msra.mxu2 %v6061_v35  ;;  %v6373_v4 = vor.u32 %v6901_v2, %v6370_v40  ;;  %v6894_v35 = vld [vmem:[#allocation13 + $0x65c] sm:$0xf]  ;;  %v5701_v48 = vor.u32 %v6733_v41, %v5698_v42  ;;  %v6034_v2 = vld [vmem:[#allocation13 + $0x40c] sm:$0xf0]  ;;  %v6859_v41 = vld [vmem:[#allocation13 + $0x544] sm:$0xf] }
 0x1fa   :  { %v6345_v58 = vor.u32 %v6894_v35, %v6342_v47  ;;  %v6810_v25 = vld [vmem:[#allocation13 + $0x3bc] sm:$0xf]  ;;  %v6006_v35 = vld [vmem:[#allocation13 + $0x3d4] sm:$0xf0] }
 0x1fb   :  { %3955 = vmatpush.bf16.msra.mxu0 %v6257_v59  ;;  %v6887_v59 = vld [vmem:[#allocation13 + $0x624] sm:$0xf]  ;;  %v6009_v47 = vor.u32 %v6810_v25, %v6006_v35  ;;  %v6320_v35 = vld [vmem:[#allocation13 + $0x628] sm:$0xf] }
 0x1fc   :  { %v6317_v10 = vor.u32 %v6887_v59, %v6314_v0 }
 0x1fd   :  { %v2160_v49 = vpop.f32.mrf.mxu0  ;;  %3916 = vmatpush.bf16.msra.mxu3 %v5585_v61  ;;  %3942 = vmatpush.bf16.msra.mxu2 %v6033_v37  ;;  %v5866_v61 = vld [vmem:[#allocation13 + $0x2bc] sm:$0xf0]  ;;  %v5673_v37 = vor.u32 %v6726_v50, %v5670_v52  ;;  %v6803_v52 = vld [vmem:[#allocation13 + $0x384] sm:$0xf] }
 0x1fe   :  { %v5981_v38 = vor.u32 %v6803_v52, %v5978_v54  ;;  %v6730_v52 = vld [vmem:[#allocation13 + $0x138] sm:$0xf0] }
 0x1ff   :  { %3956 = vmatpush.bf16.msra.mxu0 %v6229_v15  ;;  %v6093_v15 = vor.u32 %v6831_v8, %v6090_v63 }
 0x201   :  { %3917 = vmatpush.bf16.msra.mxu3 %v5557_v14  ;;  %3943 = vmatpush.bf16.msra.mxu2 %v6005_v17  ;;  %v5645_v14 = vor.u32 %v6719_v3, %v5642_v6  ;;  %v6289_v17 = vor.u32 %v6880_v12, %v6286_v13  ;;  %v5956_v3 = vld [vmem:[#allocation13 + $0x350] sm:$0xf]  ;;  %v6800_v6 = vld [vmem:[#allocation13 + $0x368] sm:$0xf0] }
 0x202   :  { %v5957_v12 = vor.u32 %v6800_v6, %v5956_v3  ;;  %v5648_v6 = vld [vmem:[#allocation13 + $0xe8] sm:$0xf] }
 0x203   :  { %3957 = vmatpush.bf16.msra.mxu0 %v6201_v34  ;;  %v6230_v34 = vld [vmem:[#allocation13 + $0x594] sm:$0xf0] }
 0x205   :  { %v2210_v24 = vpop.f32.mrf.mxu0 }
 0x206   :  { %v2211_v29 = vadd.f32 %v2210_v24, %v2198_v19  ;;  %v6694_v19 = vld [vmem:[#allocation13 + $0x18] sm:$0xf0] }
 0x207   :  { %v6806_v24 = vld [vmem:[#allocation13 + $0x398] sm:$0xf0]  ;;  %v5529_v28 = vor.u32 %v6694_v19, %v5528_v18  ;;  %v6761_v18 = vld [vmem:[#allocation13 + $0x234] sm:$0xf]  ;;  %v5810_v19 = vld [vmem:[#allocation13 + $0x24c] sm:$0xf0] }
 0x208   :  { %2215 = vst [vmem:[#allocation15 + $0x8] sm:$0xff] %v2211_v29  ;;  %v2216_v62 = vmul.f32 0.5, %v2211_v29  ;;  %v5726_v29 = vld [vmem:[#allocation13 + $0x1a4] sm:$0xf0]  ;;  %v5977_v39 = vor.u32 %v6806_v24, %v5976_v23  ;;  %v5813_v46 = vor.u32 %v6761_v18, %v5810_v19  ;;  %v6824_v24 = vld [vmem:[#allocation13 + $0x42c] sm:$0xf] }
 0x209   :  { %v5729_v51 = vor.u32 %v6740_v7, %v5726_v29  ;;  %3918 = vmatpush.bf16.msra.mxu3 %v5529_v28  ;;  %v5614_v23 = vld [vmem:[#allocation13 + $0xc4] sm:$0xf0]  ;;  %v6754_v28 = vld [vmem:[#allocation13 + $0x1fc] sm:$0xf]  ;;  %v5782_v29 = vld [vmem:[#allocation13 + $0x214] sm:$0xf0] }
 0x20a   :  { %v2217_v43 = vmul.f32 1.442695, %v2216_v62  ;;  %v6789_v62 = vld [vmem:[#allocation13 + $0x314] sm:$0xf]  ;;  %3944 = vmatpush.bf16.msra.mxu2 %v5977_v39  ;;  %v5785_v32 = vor.u32 %v6754_v28, %v5782_v29  ;;  %v6376_v19 = vld [vmem:[#allocation13 + $0x698] sm:$0xf] }
 0x20b   :  { %v5925_v31 = vor.u32 %v6789_v62, %v5922_v53  ;;  %v5586_v62 = vld [vmem:[#allocation13 + $0x8c] sm:$0xf0]  ;;  %v6817_v53 = vld [vmem:[#allocation13 + $0x3f4] sm:$0xf] }
 0x20c   :  { %6921 = vpow2.f32 %v2217_v43  ;;  %v6845_v43 = vld [vmem:[#allocation13 + $0x4d4] sm:$0xf]  ;;  %v6037_v40 = vor.u32 %v6817_v53, %v6034_v2  ;;  %v6898_v53 = vld [vmem:[#allocation13 + $0x678] sm:$0xf0] }
 0x20d   :  { %v2212_v49 = vpop.f32.mrf.mxu0 }
 0x20e   :  { %v6149_v49 = vor.u32 %v6845_v43, %v6146_v44  ;;  %v6202_v43 = vld [vmem:[#allocation13 + $0x55c] sm:$0xf0] }
 0x20f   :  { %v6205_v44 = vor.u32 %v6859_v41, %v6202_v43  ;;  %v6849_v43 = vld [vmem:[#allocation13 + $0x4f0] sm:$0xf0] }
 0x212   :  { %v6922_v45 = vpop.eup %6921 }
 0x213   :  { %v2220_v11 = vmul.f32 %v6922_v45, %v2219_v60  ;;  %v6775_v60 = vld [vmem:[#allocation13 + $0x2a4] sm:$0xf]  ;;  %v6768_v45 = vld [vmem:[#allocation13 + $0x26c] sm:$0xf] }
 0x214   :  { %v5869_v9 = vor.u32 %v6775_v60, %v5866_v61 }
 0x215   :  { %v2221_v5 = vadd.f32 %v2220_v11, %v7935_v57  ;;  %v3894_v57 = vsel %vm2103_vm1, %v3664_v22, 0  ;;  %v5838_v11 = vld [vmem:[#allocation13 + $0x284] sm:$0xf0]  ;;  %v6712_v22 = vld [vmem:[#allocation13 + $0xac] sm:$0xf] }
 0x216   :  { %v5841_v55 = vor.u32 %v6768_v45, %v5838_v11  ;;  %v5617_v7 = vor.u32 %v6712_v22, %v5614_v23  ;;  %v6744_v22 = vld [vmem:[#allocation13 + $0x1a8] sm:$0xf0] }
 0x217   :  { %v2222_v26 = vpack.c.bf16 %v2221_v5, %v2221_v5  ;;  %v6873_v5 = vld [vmem:[#allocation13 + $0x5b4] sm:$0xf] }
 0x218   :  { %v6261_v21 = vor.u32 %v6873_v5, %v6258_v20  ;;  %v6905_v5 = vld [vmem:[#allocation13 + $0x6b0] sm:$0xf0] }
 0x219   :  { %2433 = vmatmul.bf16.vlgmr.msrb.gmra.mxu3 %v2222_v26  ;;  %2446 = vmatmul.bf16.vlgmr.msrb.gmra.mxu1 %v2222_v26 }
 0x21a   :  { %2459 = vmatmul.bf16.vlgmr.msrb.gmra.mxu2 %v2222_v26  ;;  %2472 = vmatmul.bf16.vlgmr.msrb.gmra.mxu0 %v2222_v26  ;;  %v6062_v26 = vld [vmem:[#allocation13 + $0x444] sm:$0xf0] }
 0x21b   :  { %3976 = vmatpush.bf16.msrb.mxu1 %v5953_v36  ;;  %4002 = vmatpush.bf16.msrb.mxu0 %v3894_v57  ;;  %v6065_v27 = vor.u32 %v6824_v24, %v6062_v26  ;;  %v6233_v36 = vor.u32 %v6866_v33, %v6230_v34  ;;  %v6705_v57 = vld [vmem:[#allocation13 + $0x74] sm:$0xf]  ;;  %v6180_v26 = vld [vmem:[#allocation13 + $0x510] sm:$0xf]  ;;  %v5900_v33 = vld [vmem:[#allocation13 + $0x2e0] sm:$0xf] }
 0x21c   :  { %3963 = vmatpush.bf16.msrb.mxu3 %v5729_v51  ;;  %3989 = vmatpush.bf16.msrb.mxu2 %v6177_v16  ;;  %v5589_v39 = vor.u32 %v6705_v57, %v5586_v62  ;;  %v6747_v51 = vld [vmem:[#allocation13 + $0x1c4] sm:$0xf]  ;;  %v5754_v16 = vld [vmem:[#allocation13 + $0x1dc] sm:$0xf0]  ;;  %v6786_v34 = vld [vmem:[#allocation13 + $0x2f8] sm:$0xf0] }
 0x21d   :  { %v5757_v42 = vor.u32 %v6747_v51, %v5754_v16  ;;  %v6348_v62 = vld [vmem:[#allocation13 + $0x660] sm:$0xf]  ;;  %v6737_v51 = vld [vmem:[#allocation13 + $0x170] sm:$0xf0]  ;;  %v5901_v41 = vor.u32 %v6786_v34, %v5900_v33 }
 0x21e   :  { %v6709_v33 = vld [vmem:[#allocation13 + $0x90] sm:$0xf0] }
 0x21f   :  { %3977 = vmatpush.bf16.msrb.mxu1 %v5925_v31  ;;  %4003 = vmatpush.bf16.msrb.mxu0 %v6373_v4  ;;  %v6698_v31 = vld [vmem:[#allocation13 + $0x3c] sm:$0xf]  ;;  %v5558_v4 = vld [vmem:[#allocation13 + $0x54] sm:$0xf0] }
 0x220   :  { %3964 = vmatpush.bf16.msrb.mxu3 %v5701_v48  ;;  %3990 = vmatpush.bf16.msrb.mxu2 %v6149_v49  ;;  %v5561_v30 = vor.u32 %v6698_v31, %v5558_v4  ;;  %v6691_v48 = vld [vmem:[#allocation13 + $0x4] sm:$0xf]  ;;  %v5530_v49 = vld [vmem:[#allocation13 + $0x1c] sm:$0xf0]  ;;  %v5872_v31 = vld [vmem:[#allocation13 + $0x2a8] sm:$0xf] }
 0x221   :  { %v5533_v50 = vor.u32 %v6691_v48, %v5530_v49  ;;  %v6779_v4 = vld [vmem:[#allocation13 + $0x2c0] sm:$0xf0] }
 0x222   :  { %v5873_v54 = vor.u32 %v6779_v4, %v5872_v31  ;;  %v5564_v31 = vld [vmem:[#allocation13 + $0x40] sm:$0xf]  ;;  %v6702_v4 = vld [vmem:[#allocation13 + $0x58] sm:$0xf0] }
 0x223   :  { %3978 = vmatpush.bf16.msrb.mxu1 %v5897_v56  ;;  %4004 = vmatpush.bf16.msrb.mxu0 %v6345_v58  ;;  %v2255_v56 = vld [vmem:[#allocation11] sm:$0xf]  ;;  %v7947_v58 = vld [vmem:[#allocation13 + $0x6d0] sm:$0x33] }
 0x224   :  { %3965 = vmatpush.bf16.msrb.mxu3 %v5673_v37  ;;  %3991 = vmatpush.bf16.msrb.mxu2 %v6121_v1  ;;  %v2258_v60 = vperm.slane %v2255_v56, 1  ;;  %v2260_v61 = vperm.slane %v2255_v56, 3  ;;  %v3441_v59 = vunpack.c.l.b16 %v7947_v58  ;;  %v2259_v11 = vperm.slane %v2255_v56, 2 }
 0x226   :  { %v3665_v63 = vpack.c.b16 %v3441_v59, %v3441_v59  ;;  %v6772_v59 = vld [vmem:[#allocation13 + $0x288] sm:$0xf0] }
 0x227   :  { %3979 = vmatpush.bf16.msrb.mxu1 %v5869_v9  ;;  %4005 = vmatpush.bf16.msrb.mxu0 %v6317_v10  ;;  %v2257_v10 = vperm.slane %v2255_v56, 0  ;;  %v6842_v56 = vld [vmem:[#allocation13 + $0x4b8] sm:$0xf0] }
 0x228   :  { %3966 = vmatpush.bf16.msrb.mxu3 %v5645_v14  ;;  %3992 = vmatpush.bf16.msrb.mxu2 %v6093_v15  ;;  %v5928_v14 = vld [vmem:[#allocation13 + $0x318] sm:$0xf]  ;;  %v6793_v15 = vld [vmem:[#allocation13 + $0x330] sm:$0xf0]  ;;  %v3897_v18 = vsel %vm2103_vm1, %v3665_v63, 0 }
 0x22b   :  { %3980 = vmatpush.bf16.msrb.mxu1 %v5841_v55  ;;  %4006 = vmatpush.bf16.msrb.mxu0 %v6289_v17 }
 0x22c   :  { %3967 = vmatpush.bf16.msrb.mxu3 %v5617_v7  ;;  %3993 = vmatpush.bf16.msrb.mxu2 %v6065_v27  ;;  %v5929_v7 = vor.u32 %v6793_v15, %v5928_v14  ;;  %v6856_v27 = vld [vmem:[#allocation13 + $0x528] sm:$0xf0]  ;;  %v6264_v15 = vld [vmem:[#allocation13 + $0x5b8] sm:$0xf] }
 0x22d   :  { %v6181_v2 = vor.u32 %v6856_v27, %v6180_v26  ;;  %v6236_v27 = vld [vmem:[#allocation13 + $0x580] sm:$0xf] }
 0x22f   :  { %3981 = vmatpush.bf16.msrb.mxu1 %v5813_v46  ;;  %4007 = vmatpush.bf16.msrb.mxu0 %v6261_v21  ;;  %v5732_v21 = vld [vmem:[#allocation13 + $0x190] sm:$0xf] }
 0x230   :  { %3968 = vmatpush.bf16.msrb.mxu3 %v5589_v39  ;;  %3994 = vmatpush.bf16.msrb.mxu2 %v6037_v40  ;;  %v5733_v57 = vor.u32 %v6744_v22, %v5732_v21  ;;  %v5704_v40 = vld [vmem:[#allocation13 + $0x158] sm:$0xf]  ;;  %v6828_v21 = vld [vmem:[#allocation13 + $0x448] sm:$0xf0] }
 0x233   :  { %3982 = vmatpush.bf16.msrb.mxu1 %v5785_v32  ;;  %4008 = vmatpush.bf16.msrb.mxu0 %v6233_v36  ;;  %v6377_v32 = vor.u32 %v6905_v5, %v6376_v19  ;;  %v5620_v19 = vld [vmem:[#allocation13 + $0xb0] sm:$0xf]  ;;  %v6716_v5 = vld [vmem:[#allocation13 + $0xc8] sm:$0xf0] }
 0x234   :  { %3969 = vmatpush.bf16.msrb.mxu3 %v5561_v30  ;;  %3995 = vmatpush.bf16.msrb.mxu2 %v6009_v47  ;;  %v5705_v30 = vor.u32 %v6737_v51, %v5704_v40  ;;  %v6891_v47 = vld [vmem:[#allocation13 + $0x640] sm:$0xf0]  ;;  %v5621_v26 = vor.u32 %v6716_v5, %v5620_v19  ;;  %v6208_v40 = vld [vmem:[#allocation13 + $0x548] sm:$0xf]  ;;  %v6734_v19 = vld [vmem:[#allocation13 + $0x15c] sm:$0xf] }
 0x235   :  { %v5706_v5 = vld [vmem:[#allocation13 + $0x174] sm:$0xf0] }
 0x237   :  { %3983 = vmatpush.bf16.msrb.mxu1 %v5757_v42  ;;  %4009 = vmatpush.bf16.msrb.mxu0 %v6205_v44  ;;  %v6152_v42 = vld [vmem:[#allocation13 + $0x4d8] sm:$0xf]  ;;  %v6349_v44 = vor.u32 %v6898_v53, %v6348_v62  ;;  %v5760_v53 = vld [vmem:[#allocation13 + $0x1c8] sm:$0xf] }
 0x238   :  { %3970 = vmatpush.bf16.msrb.mxu3 %v5533_v50  ;;  %3996 = vmatpush.bf16.msrb.mxu2 %v5981_v38  ;;  %v6153_v49 = vor.u32 %v6849_v43, %v6152_v42  ;;  %v5676_v50 = vld [vmem:[#allocation13 + $0x120] sm:$0xf]  ;;  %v6797_v42 = vld [vmem:[#allocation13 + $0x354] sm:$0xf]  ;;  %v5958_v43 = vld [vmem:[#allocation13 + $0x36c] sm:$0xf0] }
 0x239   :  { %v6124_v38 = vld [vmem:[#allocation13 + $0x4a0] sm:$0xf] }
 0x23a   :  { %v6125_v3 = vor.u32 %v6842_v56, %v6124_v38  ;;  %v6902_v38 = vld [vmem:[#allocation13 + $0x69c] sm:$0xf]  ;;  %v6378_v56 = vld [vmem:[#allocation13 + $0x6b4] sm:$0xf0] }
 0x296   :  { %v2447_v0 = vpop.f32.mrf.mxu1 }
 0x297   :  { %v2448_v37 = vadd.f32 %v2447_v0, %v2258_v60  ;;  %v2473_v1 = vpop.f32.mrf.mxu0  ;;  %v6321_v60 = vor.u32 %v6891_v47, %v6320_v35  ;;  %v5677_v0 = vor.u32 %v6730_v52, %v5676_v50  ;;  %v6814_v35 = vld [vmem:[#allocation13 + $0x3d8] sm:$0xf0]  ;;  %v5565_v52 = vor.u32 %v6702_v4, %v5564_v31  ;;  %v6098_v31 = vld [vmem:[#allocation13 + $0x484] sm:$0xf0] }
 0x298   :  { %v2474_v8 = vadd.f32 %v2473_v1, %v2260_v61  ;;  %v5844_v61 = vld [vmem:[#allocation13 + $0x270] sm:$0xf]  ;;  %v6884_v1 = vld [vmem:[#allocation13 + $0x608] sm:$0xf0]  ;;  %v6790_v50 = vld [vmem:[#allocation13 + $0x31c] sm:$0xf] }
 0x299   :  { %v2478_v9 = vmax.f32 %v2448_v37, 0.0  ;;  %v6292_v37 = vld [vmem:[#allocation13 + $0x5f0] sm:$0xf]  ;;  %v5845_v63 = vor.u32 %v6772_v59, %v5844_v61  ;;  %v5536_v61 = vld [vmem:[#allocation13 + $0x8] sm:$0xf] }
 0x29a   :  { %v2480_v45 = vmax.f32 %v2474_v8, 0.0  ;;  %v6723_v8 = vld [vmem:[#allocation13 + $0x100] sm:$0xf0] }
 0x29b   :  { %v7950_v13 = vpack.c.bf16 %v2478_v9, %v2478_v9  ;;  %v6096_v9 = vld [vmem:[#allocation13 + $0x468] sm:$0xf]  ;;  %v5649_v14 = vor.u32 %v6723_v8, %v5648_v6  ;;  %v6695_v59 = vld [vmem:[#allocation13 + $0x20] sm:$0xf0]  ;;  %v6853_v8 = vld [vmem:[#allocation13 + $0x514] sm:$0xf] }
 0x29c   :  { %v7952_v55 = vpack.c.bf16 %v2480_v45, %v2480_v45  ;;  %v2434_v17 = vpop.f32.mrf.mxu3  ;;  %v6293_v45 = vor.u32 %v6884_v1, %v6292_v37  ;;  %v6807_v37 = vld [vmem:[#allocation13 + $0x3a0] sm:$0xf0]  ;;  %v6741_v1 = vld [vmem:[#allocation13 + $0x194] sm:$0xf] }
 0x29d   :  { %v2435_v20 = vadd.f32 %v2434_v17, %v2257_v10  ;;  %v2460_v46 = vpop.f32.mrf.mxu2  ;;  %3932 = vmatmul.bf16.vlgmr.msra.gmra.mxu1 %v7950_v13  ;;  %v6835_v10 = vld [vmem:[#allocation13 + $0x480] sm:$0xf0]  ;;  %v6877_v17 = vld [vmem:[#allocation13 + $0x5d0] sm:$0xf0] }
 0x29e   :  { %v2461_v23 = vadd.f32 %v2460_v46, %v2259_v11  ;;  %6394 = vmatmul.msk.bf16.vlgmr.msra.gmra.mxu0 %vm2099_vm2, %v7952_v55  ;;  %4028 = vmatpush.bf16.msra.mxu1 %v5957_v12  ;;  %v2449_v24 = vpop.f32.mrf.mxu1  ;;  %v5816_v11 = vld [vmem:[#allocation13 + $0x238] sm:$0xf]  ;;  %v6765_v12 = vld [vmem:[#allocation13 + $0x250] sm:$0xf0]  ;;  %v6068_v46 = vld [vmem:[#allocation13 + $0x430] sm:$0xf]  ;;  %v6265_v22 = vor.u32 %v6877_v17, %v6264_v15 }
 0x29f   :  { %v2477_v28 = vmax.f32 %v2435_v20, 0.0  ;;  %4054 = vmatpush.bf16.msra.mxu0 %v3897_v18  ;;  %v2475_v29 = vpop.f32.mrf.mxu0  ;;  %v6097_v18 = vor.u32 %v6835_v10, %v6096_v9  ;;  %v5817_v20 = vor.u32 %v6765_v12, %v5816_v11  ;;  %v6758_v24 = vld [vmem:[#allocation13 + $0x218] sm:$0xf0]  ;;  %v6381_v9 = vor.u32 %v6902_v38, %v6378_v56  ;;  %v5902_v11 = vld [vmem:[#allocation13 + $0x2fc] sm:$0xf0] }
 0x2a0   :  { %v2479_v36 = vmax.f32 %v2461_v23, 0.0  ;;  %v5788_v23 = vld [vmem:[#allocation13 + $0x200] sm:$0xf]  ;;  %v6069_v29 = vor.u32 %v6828_v21, %v6068_v46  ;;  %v5537_v10 = vor.u32 %v6695_v59, %v5536_v61  ;;  %v6895_v15 = vld [vmem:[#allocation13 + $0x664] sm:$0xf] }
 0x2a1   :  { %v7958_v39 = vpack.c.bf16 %v2477_v28, %v2477_v28  ;;  %v6870_v28 = vld [vmem:[#allocation13 + $0x598] sm:$0xf0]  ;;  %v5789_v34 = vor.u32 %v6758_v24, %v5788_v23  ;;  %v6350_v17 = vld [vmem:[#allocation13 + $0x67c] sm:$0xf0]  ;;  %v6154_v21 = vld [vmem:[#allocation13 + $0x4f4] sm:$0xf0] }
 0x2a2   :  { %v7960_v16 = vpack.c.bf16 %v2479_v36, %v2479_v36  ;;  %4029 = vmatpush.bf16.msra.mxu1 %v5929_v7  ;;  %v3442_v7 = vunpack.c.h.b16 %v7947_v58  ;;  %v6040_v36 = vld [vmem:[#allocation13 + $0x3f8] sm:$0xf]  ;;  %v6237_v62 = vor.u32 %v6870_v28, %v6236_v27  ;;  %v6846_v46 = vld [vmem:[#allocation13 + $0x4dc] sm:$0xf]  ;;  %v6776_v23 = vld [vmem:[#allocation13 + $0x2ac] sm:$0xf] }
 0x2a3   :  { %4055 = vmatpush.bf16.msra.mxu0 %v6377_v32  ;;  %3919 = vmatmul.bf16.vlgmr.msra.gmra.mxu3 %v7958_v39  ;;  %v5592_v32 = vld [vmem:[#allocation13 + $0x78] sm:$0xf]  ;;  %v5874_v24 = vld [vmem:[#allocation13 + $0x2c4] sm:$0xf0]  ;;  %v6157_v28 = vor.u32 %v6846_v46, %v6154_v21  ;;  %v6825_v56 = vld [vmem:[#allocation13 + $0x434] sm:$0xf] }
 0x2a4   :  { %3945 = vmatmul.bf16.vlgmr.msra.gmra.mxu2 %v7960_v16  ;;  %4015 = vmatpush.bf16.msra.mxu3 %v5733_v57  ;;  %v2436_v25 = vpop.f32.mrf.mxu3  ;;  %v6821_v57 = vld [vmem:[#allocation13 + $0x410] sm:$0xf0]  ;;  %v3666_v58 = vpack.c.b16 %v3442_v7, %v3442_v7  ;;  %v5593_v51 = vor.u32 %v6709_v33, %v5592_v32  ;;  %v5709_v7 = vor.u32 %v6734_v19, %v5706_v5  ;;  %v6322_v27 = vld [vmem:[#allocation13 + $0x644] sm:$0xf0]  ;;  %v5678_v32 = vld [vmem:[#allocation13 + $0x13c] sm:$0xf0] }
 0x2a5   :  { %4041 = vmatpush.bf16.msra.mxu2 %v6181_v2  ;;  %v2462_v48 = vpop.f32.mrf.mxu2  ;;  %v6751_v2 = vld [vmem:[#allocation13 + $0x1e0] sm:$0xf0]  ;;  %v5877_v33 = vor.u32 %v6776_v23, %v5874_v24  ;;  %v6210_v5 = vld [vmem:[#allocation13 + $0x564] sm:$0xf0]  ;;  %v6801_v46 = vld [vmem:[#allocation13 + $0x370] sm:$0xf0] }
 0x2a6   :  { %4030 = vmatpush.bf16.msra.mxu1 %v5901_v41  ;;  %v6863_v41 = vld [vmem:[#allocation13 + $0x560] sm:$0xf0]  ;;  %v5761_v25 = vor.u32 %v6751_v2, %v5760_v53  ;;  %v5961_v48 = vor.u32 %v6797_v42, %v5958_v43  ;;  %v5846_v53 = vld [vmem:[#allocation13 + $0x28c] sm:$0xf0]  ;;  %v5650_v42 = vld [vmem:[#allocation13 + $0x104] sm:$0xf0] }
 0x2a7   :  { %4056 = vmatpush.bf16.msra.mxu0 %v6349_v44  ;;  %v6041_v44 = vor.u32 %v6821_v57, %v6040_v36  ;;  %v6209_v47 = vor.u32 %v6863_v41, %v6208_v40  ;;  %v6126_v36 = vld [vmem:[#allocation13 + $0x4bc] sm:$0xf0]  ;;  %v6881_v40 = vld [vmem:[#allocation13 + $0x5f4] sm:$0xf]  ;;  %v6720_v41 = vld [vmem:[#allocation13 + $0xec] sm:$0xf] }
 0x2a8   :  { %4016 = vmatpush.bf16.msra.mxu3 %v5705_v30  ;;  %v6012_v30 = vld [vmem:[#allocation13 + $0x3c0] sm:$0xf]  ;;  %v6755_v59 = vld [vmem:[#allocation13 + $0x204] sm:$0xf] }
 0x2a9   :  { %4042 = vmatpush.bf16.msra.mxu2 %v6153_v49  ;;  %v3900_v49 = vsel %vm2103_vm1, %v3666_v58, 0  ;;  %v6294_v58 = vld [vmem:[#allocation13 + $0x60c] sm:$0xf0]  ;;  %v5566_v23 = vld [vmem:[#allocation13 + $0x5c] sm:$0xf0] }
 0x2aa   :  { %4031 = vmatpush.bf16.msra.mxu1 %v5873_v54  ;;  %v5930_v54 = vld [vmem:[#allocation13 + $0x334] sm:$0xf0]  ;;  %v6297_v4 = vor.u32 %v6881_v40, %v6294_v58  ;;  %v6804_v40 = vld [vmem:[#allocation13 + $0x38c] sm:$0xf]  ;;  %v5986_v58 = vld [vmem:[#allocation13 + $0x3a4] sm:$0xf0] }
 0x2ab   :  { %4057 = vmatpush.bf16.msra.mxu0 %v6321_v60  ;;  %v6013_v60 = vor.u32 %v6814_v35, %v6012_v30  ;;  %v5933_v6 = vor.u32 %v6790_v50, %v5930_v54  ;;  %v5818_v30 = vld [vmem:[#allocation13 + $0x254] sm:$0xf0]  ;;  %v5653_v35 = vor.u32 %v6720_v41, %v5650_v42  ;;  %v5622_v54 = vld [vmem:[#allocation13 + $0xcc] sm:$0xf0]  ;;  %v6745_v41 = vld [vmem:[#allocation13 + $0x1b0] sm:$0xf0] }
 0x2ac   :  { %4017 = vmatpush.bf16.msra.mxu3 %v5677_v0  ;;  %v5984_v0 = vld [vmem:[#allocation13 + $0x388] sm:$0xf] }
 0x2ad   :  { %4043 = vmatpush.bf16.msra.mxu2 %v6125_v3  ;;  %3984 = vmatmul.bf16.vlgmr.msrb.gmra.mxu1 %v7950_v13  ;;  %v5734_v3 = vld [vmem:[#allocation13 + $0x1ac] sm:$0xf0]  ;;  %v5985_v12 = vor.u32 %v6807_v37, %v5984_v0  ;;  %v5790_v0 = vld [vmem:[#allocation13 + $0x21c] sm:$0xf0] }
 0x2ae   :  { %6395 = vmatmul.msk.bf16.vlgmr.msrb.gmra.mxu0 %vm2099_vm2, %v7952_v55  ;;  %4032 = vmatpush.bf16.msra.mxu1 %v5845_v63  ;;  %v6182_v63 = vld [vmem:[#allocation13 + $0x52c] sm:$0xf0] }
 0x2af   :  { %4058 = vmatpush.bf16.msra.mxu0 %v6293_v45  ;;  %v6783_v45 = vld [vmem:[#allocation13 + $0x2e4] sm:$0xf] }
 0x2b0   :  { %4018 = vmatpush.bf16.msra.mxu3 %v5649_v14  ;;  %v5737_v14 = vor.u32 %v6741_v1, %v5734_v3  ;;  %v6867_v3 = vld [vmem:[#allocation13 + $0x584] sm:$0xf] }
 0x2b1   :  { %4044 = vmatpush.bf16.msra.mxu2 %v6097_v18  ;;  %v6185_v18 = vor.u32 %v6853_v8, %v6182_v63  ;;  %v6706_v63 = vld [vmem:[#allocation13 + $0x7c] sm:$0xf] }
 0x2b2   :  { %4033 = vmatpush.bf16.msra.mxu1 %v5817_v20  ;;  %v5905_v20 = vor.u32 %v6783_v45, %v5902_v11  ;;  %v6818_v45 = vld [vmem:[#allocation13 + $0x3fc] sm:$0xf]  ;;  %v6042_v11 = vld [vmem:[#allocation13 + $0x414] sm:$0xf0] }
 0x2b3   :  { %4059 = vmatpush.bf16.msra.mxu0 %v6265_v22  ;;  %3971 = vmatmul.bf16.vlgmr.msrb.gmra.mxu3 %v7958_v39  ;;  %v6353_v22 = vor.u32 %v6895_v15, %v6350_v17  ;;  %v5762_v15 = vld [vmem:[#allocation13 + $0x1e4] sm:$0xf0]  ;;  %v6860_v17 = vld [vmem:[#allocation13 + $0x54c] sm:$0xf]  ;;  %v6045_v21 = vor.u32 %v6818_v45, %v6042_v11  ;;  %v6843_v11 = vld [vmem:[#allocation13 + $0x4c0] sm:$0xf0] }
 0x2b4   :  { %3997 = vmatmul.bf16.vlgmr.msrb.gmra.mxu2 %v7960_v16  ;;  %4019 = vmatpush.bf16.msra.mxu3 %v5621_v26  ;;  %v6888_v26 = vld [vmem:[#allocation13 + $0x62c] sm:$0xf]  ;;  %v6132_v45 = vld [vmem:[#allocation13 + $0x4a8] sm:$0xf] }
 0x2b5   :  { %4045 = vmatpush.bf16.msra.mxu2 %v6069_v29  ;;  %v6727_v29 = vld [vmem:[#allocation13 + $0x124] sm:$0xf]  ;;  %v6325_v57 = vor.u32 %v6888_v26, %v6322_v27  ;;  %v6014_v26 = vld [vmem:[#allocation13 + $0x3dc] sm:$0xf0]  ;;  %v6213_v27 = vor.u32 %v6860_v17, %v6210_v5  ;;  %v6133_v5 = vor.u32 %v6843_v11, %v6132_v45 }
 0x2b6   :  { %4034 = vmatpush.bf16.msra.mxu1 %v5789_v34  ;;  %v6839_v34 = vld [vmem:[#allocation13 + $0x4a4] sm:$0xf]  ;;  %v5681_v2 = vor.u32 %v6727_v29, %v5678_v32  ;;  %v5936_v32 = vld [vmem:[#allocation13 + $0x320] sm:$0xf] }
 0x2b7   :  { %4060 = vmatpush.bf16.msra.mxu0 %v6237_v62  ;;  %v6769_v62 = vld [vmem:[#allocation13 + $0x274] sm:$0xf]  ;;  %v6903_v45 = vld [vmem:[#allocation13 + $0x6a4] sm:$0xf]  ;;  %v6386_v11 = vld [vmem:[#allocation13 + $0x6bc] sm:$0xf0] }
 0x2b8   :  { %4020 = vmatpush.bf16.msra.mxu3 %v5593_v51  ;;  %v6129_v51 = vor.u32 %v6839_v34, %v6126_v36  ;;  %v5849_v43 = vor.u32 %v6769_v62, %v5846_v53  ;;  %v6794_v34 = vld [vmem:[#allocation13 + $0x338] sm:$0xf0]  ;;  %v6384_v36 = vld [vmem:[#allocation13 + $0x6a0] sm:$0xf]  ;;  %v6692_v53 = vld [vmem:[#allocation13 + $0xc] sm:$0xf] }
 0x2b9   :  { %4046 = vmatpush.bf16.msra.mxu2 %v6041_v44  ;;  %v6832_v44 = vld [vmem:[#allocation13 + $0x46c] sm:$0xf]  ;;  %v5937_v42 = vor.u32 %v6794_v34, %v5936_v32  ;;  %v6717_v34 = vld [vmem:[#allocation13 + $0xd0] sm:$0xf0] }
 0x2ba   :  { %4035 = vmatpush.bf16.msra.mxu1 %v5761_v25  ;;  %v6762_v25 = vld [vmem:[#allocation13 + $0x23c] sm:$0xf]  ;;  %v6101_v50 = vor.u32 %v6832_v44, %v6098_v31  ;;  %v6857_v44 = vld [vmem:[#allocation13 + $0x530] sm:$0xf0] }
 0x2bb   :  { %4061 = vmatpush.bf16.msra.mxu0 %v6209_v47  ;;  %v6874_v47 = vld [vmem:[#allocation13 + $0x5bc] sm:$0xf]  ;;  %v5821_v38 = vor.u32 %v6762_v25, %v5818_v30  ;;  %v5908_v25 = vld [vmem:[#allocation13 + $0x2e8] sm:$0xf]  ;;  %v6787_v30 = vld [vmem:[#allocation13 + $0x300] sm:$0xf0] }
 0x2bc   :  { %4021 = vmatpush.bf16.msra.mxu3 %v5565_v52  ;;  %v6713_v52 = vld [vmem:[#allocation13 + $0xb4] sm:$0xf] }
 0x2bd   :  { %4047 = vmatpush.bf16.msra.mxu2 %v6013_v60  ;;  %4036 = vmatmul.bf16.vlgmr.msra.gmra.mxu1 %v7950_v13  ;;  %v6070_v60 = vld [vmem:[#allocation13 + $0x44c] sm:$0xf0]  ;;  %v5625_v1 = vor.u32 %v6713_v52, %v5622_v54  ;;  %v5712_v54 = vld [vmem:[#allocation13 + $0x160] sm:$0xf] }
 0x2be   :  { %4080 = vmatpush.bf16.msrb.mxu1 %v5961_v48  ;;  %6396 = vmatmul.msk.bf16.vlgmr.msra.gmra.mxu0 %vm2099_vm2, %v7952_v55  ;;  %v6266_v48 = vld [vmem:[#allocation13 + $0x5d4] sm:$0xf0]  ;;  %v6073_v8 = vor.u32 %v6825_v56, %v6070_v60  ;;  %v5909_v56 = vor.u32 %v6787_v30, %v5908_v25  ;;  %v6160_v60 = vld [vmem:[#allocation13 + $0x4e0] sm:$0xf]  ;;  %v6822_v30 = vld [vmem:[#allocation13 + $0x418] sm:$0xf0] }
 0x2bf   :  { %4106 = vmatpush.bf16.msrb.mxu0 %v3900_v49  ;;  %v7976_v49 = vld [vmem:[#allocation13 + $0x6d8] sm:$0x33]  ;;  %v6269_v61 = vor.u32 %v6874_v47, %v6266_v48  ;;  %v6356_v48 = vld [vmem:[#allocation13 + $0x668] sm:$0xf]  ;;  %v6048_v25 = vld [vmem:[#allocation13 + $0x400] sm:$0xf] }
 0x2c0   :  { %4022 = vmatpush.bf16.msra.mxu3 %v5537_v10  ;;  %v3443_v37 = vunpack.c.l.b16 %v7976_v49  ;;  %v5793_v10 = vor.u32 %v6755_v59, %v5790_v0  ;;  %v5880_v0 = vld [vmem:[#allocation13 + $0x2b0] sm:$0xf] }
 0x2c1   :  { %4048 = vmatpush.bf16.msra.mxu2 %v5985_v12 }
 0x2c2   :  { %4081 = vmatpush.bf16.msrb.mxu1 %v5933_v6  ;;  %v6238_v6 = vld [vmem:[#allocation13 + $0x59c] sm:$0xf0] }
 0x2c3   :  { %4107 = vmatpush.bf16.msrb.mxu0 %v6381_v9  ;;  %4023 = vmatmul.bf16.vlgmr.msra.gmra.mxu3 %v7958_v39  ;;  %v5594_v9 = vld [vmem:[#allocation13 + $0x94] sm:$0xf0]  ;;  %v6241_v12 = vor.u32 %v6867_v3, %v6238_v6  ;;  %v6328_v3 = vld [vmem:[#allocation13 + $0x630] sm:$0xf]  ;;  %v6892_v6 = vld [vmem:[#allocation13 + $0x648] sm:$0xf0] }
 0x2c4   :  { %4067 = vmatpush.bf16.msrb.mxu3 %v5737_v14  ;;  %4049 = vmatmul.bf16.vlgmr.msra.gmra.mxu2 %v7960_v16  ;;  %v6748_v14 = vld [vmem:[#allocation13 + $0x1cc] sm:$0xf]  ;;  %v5597_v19 = vor.u32 %v6706_v63, %v5594_v9  ;;  %v5684_v63 = vld [vmem:[#allocation13 + $0x128] sm:$0xf]  ;;  %v6731_v9 = vld [vmem:[#allocation13 + $0x140] sm:$0xf0] }
 0x2c5   :  { %4093 = vmatpush.bf16.msrb.mxu2 %v6185_v18  ;;  %v3667_v18 = vpack.c.b16 %v3443_v37, %v3443_v37  ;;  %v5765_v24 = vor.u32 %v6748_v14, %v5762_v15  ;;  %v6780_v37 = vld [vmem:[#allocation13 + $0x2c8] sm:$0xf0]  ;;  %v5852_v14 = vld [vmem:[#allocation13 + $0x278] sm:$0xf]  ;;  %v6773_v15 = vld [vmem:[#allocation13 + $0x290] sm:$0xf0]  ;;  %v5685_v17 = vor.u32 %v6731_v9, %v5684_v63 }
 0x2c6   :  { %4082 = vmatpush.bf16.msrb.mxu1 %v5905_v20  ;;  %v5964_v20 = vld [vmem:[#allocation13 + $0x358] sm:$0xf]  ;;  %v6791_v63 = vld [vmem:[#allocation13 + $0x324] sm:$0xf] }
 0x2c7   :  { %4108 = vmatpush.bf16.msrb.mxu0 %v6353_v22  ;;  %v6699_v22 = vld [vmem:[#allocation13 + $0x44] sm:$0xf]  ;;  %v3903_v29 = vsel %vm2103_vm1, %v3667_v18, 0  ;;  %v6300_v18 = vld [vmem:[#allocation13 + $0x5f8] sm:$0xf] }
 0x2c8   :  { %4068 = vmatpush.bf16.msrb.mxu3 %v5709_v7  ;;  %v6811_v7 = vld [vmem:[#allocation13 + $0x3c4] sm:$0xf] }
 0x2c9   :  { %4094 = vmatpush.bf16.msrb.mxu2 %v6157_v28  ;;  %v5965_v28 = vor.u32 %v6801_v46, %v5964_v20  ;;  %v6017_v62 = vor.u32 %v6811_v7, %v6014_v26  ;;  %v5656_v20 = vld [vmem:[#allocation13 + $0xf0] sm:$0xf]  ;;  %v6724_v46 = vld [vmem:[#allocation13 + $0x108] sm:$0xf0]  ;;  %v5824_v7 = vld [vmem:[#allocation13 + $0x240] sm:$0xf] }
 0x2ca   :  { %4083 = vmatpush.bf16.msrb.mxu1 %v5877_v33  ;;  %v5569_v33 = vor.u32 %v6699_v22, %v5566_v23  ;;  %v6104_v22 = vld [vmem:[#allocation13 + $0x470] sm:$0xf]  ;;  %v6836_v23 = vld [vmem:[#allocation13 + $0x488] sm:$0xf0]  ;;  %v6766_v26 = vld [vmem:[#allocation13 + $0x258] sm:$0xf0] }
 0x2cb   :  { %4109 = vmatpush.bf16.msrb.mxu0 %v6325_v57  ;;  %v6906_v57 = vld [vmem:[#allocation13 + $0x6b8] sm:$0xf0]  ;;  %v6105_v32 = vor.u32 %v6836_v23, %v6104_v22  ;;  %v6389_v22 = vor.u32 %v6903_v45, %v6386_v11 }
 0x2cc   :  { %4069 = vmatpush.bf16.msrb.mxu3 %v5681_v2  ;;  %v5538_v2 = vld [vmem:[#allocation13 + $0x24] sm:$0xf0]  ;;  %v6385_v31 = vor.u32 %v6906_v57, %v6384_v36  ;;  %v5825_v36 = vor.u32 %v6766_v26, %v5824_v7  ;;  %v6076_v57 = vld [vmem:[#allocation13 + $0x438] sm:$0xf]  ;;  %v6826_v11 = vld [vmem:[#allocation13 + $0x43c] sm:$0xf] }
 0x2cd   :  { %4095 = vmatpush.bf16.msrb.mxu2 %v6129_v51  ;;  %v5740_v51 = vld [vmem:[#allocation13 + $0x198] sm:$0xf]  ;;  %v5910_v7 = vld [vmem:[#allocation13 + $0x304] sm:$0xf0] }
 0x2ce   :  { %4084 = vmatpush.bf16.msrb.mxu1 %v5849_v43  ;;  %v6188_v43 = vld [vmem:[#allocation13 + $0x518] sm:$0xf]  ;;  %v5741_v47 = vor.u32 %v6745_v41, %v5740_v51  ;;  %v6244_v41 = vld [vmem:[#allocation13 + $0x588] sm:$0xf] }
 0x2cf   :  { %4110 = vmatpush.bf16.msrb.mxu0 %v6297_v4  ;;  %v5541_v4 = vor.u32 %v6692_v53, %v5538_v2  ;;  %v6189_v52 = vor.u32 %v6857_v44, %v6188_v43  ;;  %v5796_v2 = vld [vmem:[#allocation13 + $0x208] sm:$0xf]  ;;  %v5600_v44 = vld [vmem:[#allocation13 + $0x80] sm:$0xf] }
 0x2d0   :  { %4070 = vmatpush.bf16.msrb.mxu3 %v5653_v35  ;;  %v5989_v35 = vor.u32 %v6804_v40, %v5986_v58  ;;  %v6759_v40 = vld [vmem:[#allocation13 + $0x220] sm:$0xf0]  ;;  %v3444_v58 = vunpack.c.h.b16 %v7976_v49 }
 0x2d1   :  { %4096 = vmatpush.bf16.msrb.mxu2 %v6101_v50  ;;  %v6899_v50 = vld [vmem:[#allocation13 + $0x680] sm:$0xf0] }
 0x2d2   :  { %4085 = vmatpush.bf16.msrb.mxu1 %v5821_v38  ;;  %v6738_v38 = vld [vmem:[#allocation13 + $0x178] sm:$0xf0]  ;;  %v6357_v59 = vor.u32 %v6899_v50, %v6356_v48  ;;  %v6752_v48 = vld [vmem:[#allocation13 + $0x1e8] sm:$0xf0]  ;;  %v6216_v50 = vld [vmem:[#allocation13 + $0x550] sm:$0xf] }
 0x2d3   :  { %4111 = vmatpush.bf16.msrb.mxu0 %v6269_v61  ;;  %v6850_v61 = vld [vmem:[#allocation13 + $0x4f8] sm:$0xf0] }
 0x2d4   :  { %4071 = vmatpush.bf16.msrb.mxu3 %v5625_v1  ;;  %v5713_v1 = vor.u32 %v6738_v38, %v5712_v54  ;;  %v6864_v54 = vld [vmem:[#allocation13 + $0x568] sm:$0xf0]  ;;  %v6798_v38 = vld [vmem:[#allocation13 + $0x35c] sm:$0xf] }
 0x2d5   :  { %4097 = vmatpush.bf16.msrb.mxu2 %v6073_v8  ;;  %v6161_v8 = vor.u32 %v6850_v61, %v6160_v60  ;;  %v6049_v60 = vor.u32 %v6822_v30, %v6048_v25  ;;  %v5572_v61 = vld [vmem:[#allocation13 + $0x48] sm:$0xf] }
 0x2d6   :  { %4086 = vmatpush.bf16.msrb.mxu1 %v5793_v10  ;;  %v5881_v10 = vor.u32 %v6780_v37, %v5880_v0  ;;  %v6020_v37 = vld [vmem:[#allocation13 + $0x3c8] sm:$0xf] }
 0x2d7   :  { %4112 = vmatpush.bf16.msrb.mxu0 %v6241_v12  ;;  %v6329_v12 = vor.u32 %v6892_v6, %v6328_v3  ;;  %v6217_v3 = vor.u32 %v6864_v54, %v6216_v50  ;;  %v6134_v25 = vld [vmem:[#allocation13 + $0x4c4] sm:$0xf0]  ;;  %v6882_v50 = vld [vmem:[#allocation13 + $0x5fc] sm:$0xf]  ;;  %v6721_v54 = vld [vmem:[#allocation13 + $0xf4] sm:$0xf] }
 0x2d8   :  { %4072 = vmatpush.bf16.msrb.mxu3 %v5597_v19  ;;  %v6885_v19 = vld [vmem:[#allocation13 + $0x610] sm:$0xf0] }
 0x2d9   :  { %4098 = vmatpush.bf16.msrb.mxu2 %v6045_v21  ;;  %v5853_v21 = vor.u32 %v6773_v15, %v5852_v14  ;;  %v5544_v14 = vld [vmem:[#allocation13 + $0x10] sm:$0xf]  ;;  %v6696_v15 = vld [vmem:[#allocation13 + $0x28] sm:$0xf0] }
 0x2da   :  { %4087 = vmatpush.bf16.msrb.mxu1 %v5765_v24  ;;  %v6301_v24 = vor.u32 %v6885_v19, %v6300_v18  ;;  %v6808_v18 = vld [vmem:[#allocation13 + $0x3a8] sm:$0xf0]  ;;  %v6742_v19 = vld [vmem:[#allocation13 + $0x19c] sm:$0xf]  ;;  %v5545_v23 = vor.u32 %v6696_v15, %v5544_v14 }
 0x2db   :  { %4113 = vmatpush.bf16.msrb.mxu0 %v6213_v27  ;;  %v5657_v27 = vor.u32 %v6724_v46, %v5656_v20  ;;  %v6854_v46 = vld [vmem:[#allocation13 + $0x51c] sm:$0xf]  ;;  %v6756_v15 = vld [vmem:[#allocation13 + $0x20c] sm:$0xf] }
 0x2dc   :  { %4073 = vmatpush.bf16.msrb.mxu3 %v5569_v33  ;;  %v5628_v33 = vld [vmem:[#allocation13 + $0xb8] sm:$0xf] }
 0x2dd   :  { %4099 = vmatpush.bf16.msrb.mxu2 %v6017_v62  ;;  %4088 = vmatmul.bf16.vlgmr.msrb.gmra.mxu1 %v7950_v13  ;;  %v6829_v62 = vld [vmem:[#allocation13 + $0x450] sm:$0xf0]  ;;  %v5629_v51 = vor.u32 %v6717_v34, %v5628_v33  ;;  %v6735_v33 = vld [vmem:[#allocation13 + $0x164] sm:$0xf]  ;;  %v5714_v34 = vld [vmem:[#allocation13 + $0x17c] sm:$0xf0] }
 0x2de   :  { %4132 = vmatpush.bf16.msra.mxu1 %v5965_v28  ;;  %6397 = vmatmul.msk.bf16.vlgmr.msrb.gmra.mxu0 %vm2099_vm2, %v7952_v55  ;;  %v6272_v28 = vld [vmem:[#allocation13 + $0x5c0] sm:$0xf]  ;;  %v6077_v43 = vor.u32 %v6829_v62, %v6076_v57  ;;  %v6847_v57 = vld [vmem:[#allocation13 + $0x4e4] sm:$0xf] }
 0x2df   :  { %4158 = vmatpush.bf16.msra.mxu0 %v3903_v29  ;;  %v6878_v29 = vld [vmem:[#allocation13 + $0x5d8] sm:$0xf0]  ;;  %v6162_v62 = vld [vmem:[#allocation13 + $0x4fc] sm:$0xf0] }
 0x2e0   :  { %4074 = vmatpush.bf16.msrb.mxu3 %v5541_v4  ;;  %v6273_v53 = vor.u32 %v6878_v29, %v6272_v28  ;;  %v5797_v4 = vor.u32 %v6759_v40, %v5796_v2  ;;  %v6896_v28 = vld [vmem:[#allocation13 + $0x66c] sm:$0xf]  ;;  %v6358_v29 = vld [vmem:[#allocation13 + $0x684] sm:$0xf0]  ;;  %v6777_v2 = vld [vmem:[#allocation13 + $0x2b4] sm:$0xf] }
 0x2e1   :  { %4100 = vmatpush.bf16.msrb.mxu2 %v5989_v35  ;;  %v5882_v40 = vld [vmem:[#allocation13 + $0x2cc] sm:$0xf0] }
 0x2e2   :  { %4133 = vmatpush.bf16.msra.mxu1 %v5937_v42  ;;  %v6871_v42 = vld [vmem:[#allocation13 + $0x5a0] sm:$0xf0] }
 0x2e3   :  { %4159 = vmatpush.bf16.msra.mxu0 %v6385_v31  ;;  %4075 = vmatmul.bf16.vlgmr.msrb.gmra.mxu3 %v7958_v39  ;;  %v6710_v31 = vld [vmem:[#allocation13 + $0x98] sm:$0xf0]  ;;  %v6245_v35 = vor.u32 %v6871_v42, %v6244_v41  ;;  %v6330_v41 = vld [vmem:[#allocation13 + $0x64c] sm:$0xf0]  ;;  %v6165_v42 = vor.u32 %v6847_v57, %v6162_v62 }
 0x2e4   :  { %4119 = vmatpush.bf16.msra.mxu3 %v5741_v47  ;;  %4101 = vmatmul.bf16.vlgmr.msrb.gmra.mxu2 %v7960_v16  ;;  %v5768_v47 = vld [vmem:[#allocation13 + $0x1d0] sm:$0xf]  ;;  %v5601_v49 = vor.u32 %v6710_v31, %v5600_v44  ;;  %v5686_v44 = vld [vmem:[#allocation13 + $0x144] sm:$0xf0]  ;;  %v5885_v31 = vor.u32 %v6777_v2, %v5882_v40  ;;  %v6802_v57 = vld [vmem:[#allocation13 + $0x378] sm:$0xf0] }
 0x2e5   :  { %4145 = vmatpush.bf16.msra.mxu2 %v6189_v52  ;;  %v3668_v52 = vpack.c.b16 %v3444_v58, %v3444_v58  ;;  %v5769_v0 = vor.u32 %v6752_v48, %v5768_v47  ;;  %v5717_v58 = vor.u32 %v6735_v33, %v5714_v34  ;;  %v5854_v47 = vld [vmem:[#allocation13 + $0x294] sm:$0xf0]  ;;  %v6218_v34 = vld [vmem:[#allocation13 + $0x56c] sm:$0xf0]  ;;  %v5574_v2 = vld [vmem:[#allocation13 + $0x64] sm:$0xf0] }
 0x2e6   :  { %4134 = vmatpush.bf16.msra.mxu1 %v5909_v56  ;;  %v5966_v56 = vld [vmem:[#allocation13 + $0x374] sm:$0xf0] }
 0x2e7   :  { %4160 = vmatpush.bf16.msra.mxu0 %v6357_v59  ;;  %v6703_v59 = vld [vmem:[#allocation13 + $0x60] sm:$0xf0]  ;;  %v5969_v6 = vor.u32 %v6798_v38, %v5966_v56  ;;  %v5658_v38 = vld [vmem:[#allocation13 + $0x10c] sm:$0xf0] }
 0x2e8   :  { %4120 = vmatpush.bf16.msra.mxu3 %v5713_v1  ;;  %v6815_v1 = vld [vmem:[#allocation13 + $0x3e0] sm:$0xf0]  ;;  %v5573_v9 = vor.u32 %v6703_v59, %v5572_v61  ;;  %v6106_v61 = vld [vmem:[#allocation13 + $0x48c] sm:$0xf0] }
 0x2e9   :  { %4146 = vmatpush.bf16.msra.mxu2 %v6161_v8  ;;  %v3906_v8 = vsel %vm2103_vm1, %v3668_v52, 0  ;;  %v6302_v52 = vld [vmem:[#allocation13 + $0x614] sm:$0xf0] }
 0x2ea   :  { %4135 = vmatpush.bf16.msra.mxu1 %v5881_v10  ;;  %v5938_v10 = vld [vmem:[#allocation13 + $0x33c] sm:$0xf0]  ;;  %v6305_v59 = vor.u32 %v6882_v50, %v6302_v52  ;;  %v6805_v50 = vld [vmem:[#allocation13 + $0x394] sm:$0xf]  ;;  %v5994_v52 = vld [vmem:[#allocation13 + $0x3ac] sm:$0xf0] }
 0x2eb   :  { %4161 = vmatpush.bf16.msra.mxu0 %v6329_v12  ;;  %v6021_v12 = vor.u32 %v6815_v1, %v6020_v37  ;;  %v5941_v20 = vor.u32 %v6791_v63, %v5938_v10  ;;  %v5826_v37 = vld [vmem:[#allocation13 + $0x25c] sm:$0xf0]  ;;  %v5661_v1 = vor.u32 %v6721_v54, %v5658_v38  ;;  %v5630_v10 = vld [vmem:[#allocation13 + $0xd4] sm:$0xf0]  ;;  %v6746_v54 = vld [vmem:[#allocation13 + $0x1b8] sm:$0xf0] }
 0x2ec   :  { %4121 = vmatpush.bf16.msra.mxu3 %v5685_v17  ;;  %v5992_v17 = vld [vmem:[#allocation13 + $0x390] sm:$0xf] }
 0x2ed   :  { %4147 = vmatpush.bf16.msra.mxu2 %v6133_v5  ;;  %v5742_v5 = vld [vmem:[#allocation13 + $0x1b4] sm:$0xf0]  ;;  %v5993_v26 = vor.u32 %v6808_v18, %v5992_v17  ;;  %v5798_v17 = vld [vmem:[#allocation13 + $0x224] sm:$0xf0] }
 0x2ee   :  { %4136 = vmatpush.bf16.msra.mxu1 %v5853_v21  ;;  %v6190_v21 = vld [vmem:[#allocation13 + $0x534] sm:$0xf0] }
 0x2ef   :  { %4162 = vmatpush.bf16.msra.mxu0 %v6301_v24  ;;  %v6784_v24 = vld [vmem:[#allocation13 + $0x2ec] sm:$0xf] }
 0x2f0   :  { %4122 = vmatpush.bf16.msra.mxu3 %v5657_v27  ;;  %v5745_v27 = vor.u32 %v6742_v19, %v5742_v5  ;;  %v6868_v5 = vld [vmem:[#allocation13 + $0x58c] sm:$0xf] }
 0x2f1   :  { %4148 = vmatpush.bf16.msra.mxu2 %v6105_v32  ;;  %v6193_v32 = vor.u32 %v6854_v46, %v6190_v21  ;;  %v6707_v21 = vld [vmem:[#allocation13 + $0x84] sm:$0xf] }
 0x2f2   :  { %4137 = vmatpush.bf16.msra.mxu1 %v5825_v36  ;;  %v5913_v36 = vor.u32 %v6784_v24, %v5910_v7  ;;  %v6819_v24 = vld [vmem:[#allocation13 + $0x404] sm:$0xf]  ;;  %v6050_v7 = vld [vmem:[#allocation13 + $0x41c] sm:$0xf0] }
 0x2f3   :  { %4163 = vmatpush.bf16.msra.mxu0 %v6273_v53  ;;  %v6361_v53 = vor.u32 %v6896_v28, %v6358_v29  ;;  %v5770_v28 = vld [vmem:[#allocation13 + $0x1ec] sm:$0xf0]  ;;  %v6861_v29 = vld [vmem:[#allocation13 + $0x554] sm:$0xf]  ;;  %v6053_v62 = vor.u32 %v6819_v24, %v6050_v7  ;;  %v6844_v7 = vld [vmem:[#allocation13 + $0x4c8] sm:$0xf0] }
 0x2f4   :  { %4123 = vmatpush.bf16.msra.mxu3 %v5629_v51  ;;  %v6889_v51 = vld [vmem:[#allocation13 + $0x634] sm:$0xf]  ;;  %v6140_v24 = vld [vmem:[#allocation13 + $0x4b0] sm:$0xf] }
 0x2f5   :  { %4149 = vmatpush.bf16.msra.mxu2 %v6077_v43  ;;  %v6728_v43 = vld [vmem:[#allocation13 + $0x12c] sm:$0xf]  ;;  %v6333_v30 = vor.u32 %v6889_v51, %v6330_v41  ;;  %v6022_v51 = vld [vmem:[#allocation13 + $0x3e4] sm:$0xf0]  ;;  %v6221_v41 = vor.u32 %v6861_v29, %v6218_v34  ;;  %v6774_v29 = vld [vmem:[#allocation13 + $0x298] sm:$0xf0] }
 0x2f6   :  { %4138 = vmatpush.bf16.msra.mxu1 %v5797_v4  ;;  %v6840_v4 = vld [vmem:[#allocation13 + $0x4ac] sm:$0xf]  ;;  %v5689_v48 = vor.u32 %v6728_v43, %v5686_v44  ;;  %v5944_v44 = vld [vmem:[#allocation13 + $0x328] sm:$0xf]  ;;  %v6886_v34 = vld [vmem:[#allocation13 + $0x618] sm:$0xf0] }
 0x2f7   :  { %4164 = vmatpush.bf16.msra.mxu0 %v6245_v35  ;;  %v6770_v35 = vld [vmem:[#allocation13 + $0x27c] sm:$0xf] }
 0x2f8   :  { %4124 = vmatpush.bf16.msra.mxu3 %v5601_v49  ;;  %v6137_v49 = vor.u32 %v6840_v4, %v6134_v25  ;;  %v5857_v56 = vor.u32 %v6770_v35, %v5854_v47  ;;  %v6795_v4 = vld [vmem:[#allocation13 + $0x340] sm:$0xf0]  ;;  %v6392_v25 = vld [vmem:[#allocation13 + $0x6a8] sm:$0xf]  ;;  %v6693_v47 = vld [vmem:[#allocation13 + $0x14] sm:$0xf] }
 0x2f9   :  { %4150 = vmatpush.bf16.msra.mxu2 %v6049_v60  ;;  %v6833_v60 = vld [vmem:[#allocation13 + $0x474] sm:$0xf]  ;;  %v5945_v38 = vor.u32 %v6795_v4, %v5944_v44  ;;  %v6879_v44 = vld [vmem:[#allocation13 + $0x5e0] sm:$0xf0] }
 0x2fa   :  { %4139 = vmatpush.bf16.msra.mxu1 %v5769_v0  ;;  %v6763_v0 = vld [vmem:[#allocation13 + $0x244] sm:$0xf]  ;;  %v6109_v63 = vor.u32 %v6833_v60, %v6106_v61  ;;  %v6858_v60 = vld [vmem:[#allocation13 + $0x538] sm:$0xf0] }
 0x2fb   :  { %4165 = vmatpush.bf16.msra.mxu0 %v6217_v3  ;;  %v6875_v3 = vld [vmem:[#allocation13 + $0x5c4] sm:$0xf]  ;;  %v5829_v45 = vor.u32 %v6763_v0, %v5826_v37  ;;  %v5916_v0 = vld [vmem:[#allocation13 + $0x2f0] sm:$0xf]  ;;  %v6788_v37 = vld [vmem:[#allocation13 + $0x308] sm:$0xf0] }
 0x2fc   :  { %4125 = vmatpush.bf16.msra.mxu3 %v5573_v9  ;;  %v6714_v9 = vld [vmem:[#allocation13 + $0xbc] sm:$0xf] }
 0x2fd   :  { %4151 = vmatpush.bf16.msra.mxu2 %v6021_v12  ;;  %4140 = vmatmul.bf16.vlgmr.msra.gmra.mxu1 %v7950_v13  ;;  %v6078_v12 = vld [vmem:[#allocation13 + $0x454] sm:$0xf0]  ;;  %v5633_v19 = vor.u32 %v6714_v9, %v5630_v10  ;;  %v5720_v9 = vld [vmem:[#allocation13 + $0x168] sm:$0xf]  ;;  %v6739_v10 = vld [vmem:[#allocation13 + $0x180] sm:$0xf0] }
 0x2fe   :  { %4184 = vmatpush.bf16.msrb.mxu1 %v5969_v6  ;;  %6398 = vmatmul.msk.bf16.vlgmr.msra.gmra.mxu0 %vm2099_vm2, %v7952_v55  ;;  %v6274_v6 = vld [vmem:[#allocation13 + $0x5dc] sm:$0xf0]  ;;  %v6081_v46 = vor.u32 %v6826_v11, %v6078_v12  ;;  %v6168_v11 = vld [vmem:[#allocation13 + $0x4e8] sm:$0xf]  ;;  %v6851_v12 = vld [vmem:[#allocation13 + $0x500] sm:$0xf0] }
 0x2ff   :  { %4210 = vmatpush.bf16.msrb.mxu0 %v3906_v8  ;;  %v2736_v8 = vld [vmem:[#allocation13 + $0x6e0] sm:$0x3]  ;;  %v6277_v14 = vor.u32 %v6875_v3, %v6274_v6  ;;  %v6364_v6 = vld [vmem:[#allocation13 + $0x670] sm:$0xf] }
 0x300   :  { %4126 = vmatpush.bf16.msra.mxu3 %v5545_v23  ;;  %v3445_v18 = vunpack.c.l.b16 %v2736_v8  ;;  %v5801_v23 = vor.u32 %v6756_v15, %v5798_v17  ;;  %v6900_v8 = vld [vmem:[#allocation13 + $0x688] sm:$0xf0]  ;;  %v5888_v15 = vld [vmem:[#allocation13 + $0x2b8] sm:$0xf]  ;;  %v6781_v17 = vld [vmem:[#allocation13 + $0x2d0] sm:$0xf0] }
 0x301   :  { %4152 = vmatpush.bf16.msra.mxu2 %v5993_v26 }
 0x302   :  { %4185 = vmatpush.bf16.msrb.mxu1 %v5941_v20  ;;  %v6246_v20 = vld [vmem:[#allocation13 + $0x5a4] sm:$0xf0] }
 0x303   :  { %4211 = vmatpush.bf16.msrb.mxu0 %v6389_v22  ;;  %4127 = vmatmul.bf16.vlgmr.msra.gmra.mxu3 %v7958_v39  ;;  %v5602_v22 = vld [vmem:[#allocation13 + $0x9c] sm:$0xf0]  ;;  %v6249_v26 = vor.u32 %v6868_v5, %v6246_v20  ;;  %v6893_v5 = vld [vmem:[#allocation13 + $0x650] sm:$0xf0]  ;;  %v6169_v20 = vor.u32 %v6851_v12, %v6168_v11  ;;  %v5776_v11 = vld [vmem:[#allocation13 + $0x1d8] sm:$0xf] }
 0x304   :  { %4171 = vmatpush.bf16.msrb.mxu3 %v5745_v27  ;;  %4153 = vmatmul.bf16.vlgmr.msra.gmra.mxu2 %v7960_v16  ;;  %v6749_v27 = vld [vmem:[#allocation13 + $0x1d4] sm:$0xf]  ;;  %v5605_v33 = vor.u32 %v6707_v21, %v5602_v22  ;;  %v6732_v21 = vld [vmem:[#allocation13 + $0x148] sm:$0xf0] }
 0x305   :  { %4197 = vmatpush.bf16.msrb.mxu2 %v6193_v32  ;;  %v3669_v32 = vpack.c.b16 %v3445_v18, %v3445_v18  ;;  %v5773_v40 = vor.u32 %v6749_v27, %v5770_v28  ;;  %v5721_v18 = vor.u32 %v6739_v10, %v5720_v9  ;;  %v5860_v28 = vld [vmem:[#allocation13 + $0x280] sm:$0xf]  ;;  %v6753_v12 = vld [vmem:[#allocation13 + $0x1f0] sm:$0xf0] }
 0x306   :  { %4186 = vmatpush.bf16.msrb.mxu1 %v5913_v36  ;;  %v5972_v36 = vld [vmem:[#allocation13 + $0x360] sm:$0xf] }
 0x307   :  { %4212 = vmatpush.bf16.msrb.mxu0 %v6361_v53  ;;  %v6700_v53 = vld [vmem:[#allocation13 + $0x4c] sm:$0xf]  ;;  %v3909_v43 = vsel %vm2103_vm1, %v3669_v32, 0 }
 0x308   :  { %4172 = vmatpush.bf16.msrb.mxu3 %v5717_v58  ;;  %v6812_v58 = vld [vmem:[#allocation13 + $0x3cc] sm:$0xf] }
 0x309   :  { %4198 = vmatpush.bf16.msrb.mxu2 %v6165_v42  ;;  %v5973_v42 = vor.u32 %v6802_v57, %v5972_v36  ;;  %v6025_v35 = vor.u32 %v6812_v58, %v6022_v51  ;;  %v6141_v36 = vor.u32 %v6844_v7, %v6140_v24  ;;  %v5664_v57 = vld [vmem:[#allocation13 + $0xf8] sm:$0xf]  ;;  %v5832_v51 = vld [vmem:[#allocation13 + $0x248] sm:$0xf]  ;;  %v6816_v24 = vld [vmem:[#allocation13 + $0x3e8] sm:$0xf0] }
 0x30a   :  { %4187 = vmatpush.bf16.msrb.mxu1 %v5885_v31  ;;  %v5577_v31 = vor.u32 %v6700_v53, %v5574_v2  ;;  %v5861_v53 = vor.u32 %v6774_v29, %v5860_v28  ;;  %v6112_v2 = vld [vmem:[#allocation13 + $0x478] sm:$0xf] }
 0x30b   :  { %4213 = vmatpush.bf16.msrb.mxu0 %v6333_v30  ;;  %v6907_v30 = vld [vmem:[#allocation13 + $0x6c0] sm:$0xf0] }
 0x30c   :  { %4173 = vmatpush.bf16.msrb.mxu3 %v5689_v48  ;;  %v5546_v48 = vld [vmem:[#allocation13 + $0x2c] sm:$0xf0]  ;;  %v6393_v61 = vor.u32 %v6907_v30, %v6392_v25  ;;  %v5636_v25 = vld [vmem:[#allocation13 + $0xc0] sm:$0xf]  ;;  %v6718_v30 = vld [vmem:[#allocation13 + $0xd8] sm:$0xf0] }
 0x30d   :  { %4199 = vmatpush.bf16.msrb.mxu2 %v6137_v49  ;;  %v5748_v49 = vld [vmem:[#allocation13 + $0x1a0] sm:$0xf] }
 0x30e   :  { %4188 = vmatpush.bf16.msrb.mxu1 %v5857_v56  ;;  %v6196_v56 = vld [vmem:[#allocation13 + $0x520] sm:$0xf]  ;;  %v5749_v3 = vor.u32 %v6746_v54, %v5748_v49 }
 0x30f   :  { %4214 = vmatpush.bf16.msrb.mxu0 %v6305_v59  ;;  %v5549_v59 = vor.u32 %v6693_v47, %v5546_v48  ;;  %v6084_v48 = vld [vmem:[#allocation13 + $0x440] sm:$0xf] }
 0x310   :  { %4174 = vmatpush.bf16.msrb.mxu3 %v5661_v1  ;;  %v5997_v1 = vor.u32 %v6805_v50, %v5994_v52  ;;  %v6830_v50 = vld [vmem:[#allocation13 + $0x458] sm:$0xf0] }
 0x311   :  { %4200 = vmatpush.bf16.msrb.mxu2 %v6109_v63  ;;  %v6197_v63 = vor.u32 %v6858_v60, %v6196_v56  ;;  %v6760_v56 = vld [vmem:[#allocation13 + $0x228] sm:$0xf0]  ;;  %v5637_v60 = vor.u32 %v6718_v30, %v5636_v25 }
 0x312   :  { %4189 = vmatpush.bf16.msrb.mxu1 %v5829_v45  ;;  %v5917_v45 = vor.u32 %v6788_v37, %v5916_v0  ;;  %v6085_v0 = vor.u32 %v6830_v50, %v6084_v48  ;;  %v5608_v37 = vld [vmem:[#allocation13 + $0x88] sm:$0xf] }
 0x313   :  { %4215 = vmatpush.bf16.msrb.mxu0 %v6277_v14  ;;  %v6365_v14 = vor.u32 %v6900_v8, %v6364_v6  ;;  %v6056_v8 = vld [vmem:[#allocation13 + $0x408] sm:$0xf] }
 0x314   :  { %4175 = vmatpush.bf16.msrb.mxu3 %v5633_v19  ;;  %v6336_v19 = vld [vmem:[#allocation13 + $0x638] sm:$0xf] }
 0x315   :  { %4201 = vmatpush.bf16.msrb.mxu2 %v6081_v46  ;;  %v5692_v46 = vld [vmem:[#allocation13 + $0x130] sm:$0xf]  ;;  %v6337_v27 = vor.u32 %v6893_v5, %v6336_v19 }
 0x316   :  { %4190 = vmatpush.bf16.msrb.mxu1 %v5801_v23  ;;  %v5889_v23 = vor.u32 %v6781_v17, %v5888_v15  ;;  %v5693_v32 = vor.u32 %v6732_v21, %v5692_v46  ;;  %v6224_v15 = vld [vmem:[#allocation13 + $0x558] sm:$0xf]  ;;  %v6865_v17 = vld [vmem:[#allocation13 + $0x570] sm:$0xf0]  ;;  %v5580_v5 = vld [vmem:[#allocation13 + $0x50] sm:$0xf]  ;;  %v5777_v21 = vor.u32 %v6753_v12, %v5776_v11 }
 0x317   :  { %4216 = vmatpush.bf16.msrb.mxu0 %v6249_v26  ;;  %v6225_v28 = vor.u32 %v6865_v17, %v6224_v15 }
 0x318   :  { %4176 = vmatpush.bf16.msrb.mxu3 %v5605_v33  ;;  %v6308_v33 = vld [vmem:[#allocation13 + $0x600] sm:$0xf] }
 0x319   :  { %4202 = vmatpush.bf16.msrb.mxu2 %v6053_v62  ;;  %v6725_v62 = vld [vmem:[#allocation13 + $0x110] sm:$0xf0]  ;;  %v6309_v58 = vor.u32 %v6886_v34, %v6308_v33 }
 0x31a   :  { %4191 = vmatpush.bf16.msrb.mxu1 %v5773_v40  ;;  %v7997_v22 = vpop.f32.mrf.mxu1  ;;  %v6837_v40 = vld [vmem:[#allocation13 + $0x490] sm:$0xf0] }
 0x31b   :  { %4217 = vmatpush.bf16.msrb.mxu0 %v6221_v41  ;;  %v8000_v26 = vpop.f32.mrf.mxu0  ;;  %v6767_v41 = vld [vmem:[#allocation13 + $0x260] sm:$0xf0]  ;;  %v6113_v4 = vor.u32 %v6837_v40, %v6112_v2  ;;  %v6697_v34 = vld [vmem:[#allocation13 + $0x30] sm:$0xf0] }
 0x31c   :  { %4177 = vmatpush.bf16.msrb.mxu3 %v5577_v31  ;;  %v8005_v31 = vld [vmem:[%s8036_s9] sm:$0xff]  ;;  %v5833_v47 = vor.u32 %v6767_v41, %v5832_v51  ;;  %s7190_s9 = smov [#allocation15]  }
 0x31d   :  { %4203 = vmatpush.bf16.msrb.mxu2 %v6025_v35  ;;  %4192 = vmatmul.bf16.vlgmr.msrb.gmra.mxu1 %v7950_v13  ;;  %v2739_v54 = vperm.slane %v8005_v31, 0  ;;  %s4340_s7 = sshll.u32 %s7190_s9, 4  ;;  %s4341_s7 = int_to_ptr.vmem [resolvable:$true] %s4340_s7 }
 0x31e   :  { %4236 = vmatpush.bf16.msra.mxu1 %v5973_v42  ;;  %6399 = vmatmul.msk.bf16.vlgmr.msrb.gmra.mxu0 %vm2099_vm2, %v7952_v55  ;;  %v5665_v42 = vor.u32 %v6725_v62, %v5664_v57  ;;  %v6000_v57 = vld [vmem:[#allocation13 + $0x398] sm:$0xf]  ;;  %v6809_v62 = vld [vmem:[#allocation13 + $0x3b0] sm:$0xf0]  ;;  %4345 = dma.vmem_to_hbm [thread:$0]  %s4341_s7, 256, %s4343_s21, [#allocation16]  }
 0x31f   :  { %4262 = vmatpush.bf16.msra.mxu0 %v3909_v43  ;;  %v6280_v43 = vld [vmem:[#allocation13 + $0x5c8] sm:$0xf]  ;;  %v6001_v51 = vor.u32 %v6809_v62, %v6000_v57 }
 0x320   :  { %4178 = vmatpush.bf16.msrb.mxu3 %v5549_v59  ;;  %v6281_v49 = vor.u32 %v6879_v44, %v6280_v43  ;;  %v6872_v59 = vld [vmem:[#allocation13 + $0x5a8] sm:$0xf0] }
 0x321   :  { %4204 = vmatpush.bf16.msrb.mxu2 %v5997_v1  ;;  %v6711_v1 = vld [vmem:[#allocation13 + $0xa0] sm:$0xf0] }
 0x322   :  { %4237 = vmatpush.bf16.msra.mxu1 %v5945_v38  ;;  %v3935_v35 = vpop.f32.mrf.mxu1  ;;  %v5804_v38 = vld [vmem:[#allocation13 + $0x210] sm:$0xf] }
 0x323   :  { %4263 = vmatpush.bf16.msra.mxu0 %v6393_v61  ;;  %4179 = vmatmul.bf16.vlgmr.msrb.gmra.mxu3 %v7958_v39  ;;  %v3961_v52 = vpop.f32.mrf.mxu0  ;;  %v6252_v61 = vld [vmem:[#allocation13 + $0x590] sm:$0xf]  ;;  %v5805_v6 = vor.u32 %v6760_v56, %v5804_v38 }
 0x324   :  { %4223 = vmatpush.bf16.msra.mxu3 %v5749_v3  ;;  %4205 = vmatmul.bf16.vlgmr.msrb.gmra.mxu2 %v7960_v16 }
 0x325   :  { %4249 = vmatpush.bf16.msra.mxu2 %v6197_v63  ;;  %v6823_v63 = vld [vmem:[#allocation13 + $0x420] sm:$0xf0] }
 0x326   :  { %4238 = vmatpush.bf16.msra.mxu1 %v5917_v45  ;;  %v3920_v3 = vpop.f32.mrf.mxu3  ;;  %v6253_v45 = vor.u32 %v6872_v59, %v6252_v61  ;;  %v6057_v19 = vor.u32 %v6823_v63, %v6056_v8 }
 0x327   :  { %4264 = vmatpush.bf16.msra.mxu0 %v6365_v14  ;;  %v3921_v9 = vadd.f32 %v3920_v3, %v2739_v54  ;;  %v3946_v10 = vpop.f32.mrf.mxu2  ;;  %v5609_v14 = vor.u32 %v6711_v1, %v5608_v37 }
 0x328   :  { %4224 = vmatpush.bf16.msra.mxu3 %v5721_v18 }
 0x329   :  { %4250 = vmatpush.bf16.msra.mxu2 %v6169_v20  ;;  %v3934_v18 = vadd.f32 %v7997_v22, %v3921_v9  ;;  %v6704_v20 = vld [vmem:[#allocation13 + $0x68] sm:$0xf0]  ;;  %v5552_v22 = vld [vmem:[#allocation13 + $0x18] sm:$0xf] }
 0x32a   :  { %4239 = vmatpush.bf16.msra.mxu1 %v5889_v23  ;;  %v3985_v46 = vpop.f32.mrf.mxu1  ;;  %v6028_v23 = vld [vmem:[#allocation13 + $0x3d0] sm:$0xf]  ;;  %v5581_v29 = vor.u32 %v6704_v20, %v5580_v5  ;;  %v5553_v40 = vor.u32 %v6697_v34, %v5552_v22  ;;  %v2742_v20 = vperm.slane %v8005_v31, 3 }
 0x32b   :  { %4265 = vmatpush.bf16.msra.mxu0 %v6337_v27  ;;  %v3947_v7 = vadd.f32 %v3946_v10, %v3934_v18  ;;  %v4011_v27 = vpop.f32.mrf.mxu0  ;;  %v6029_v33 = vor.u32 %v6816_v24, %v6028_v23 }
 0x32c   :  { %4225 = vmatpush.bf16.msra.mxu3 %v5693_v32 }
 0x32d   :  { %4251 = vmatpush.bf16.msra.mxu2 %v6141_v36  ;;  %v3960_v32 = vadd.f32 %v8000_v26, %v3947_v7 }
 0x32e   :  { %4240 = vmatpush.bf16.msra.mxu1 %v5861_v53  ;;  %v3922_v36 = vpop.f32.mrf.mxu3 }
 0x32f   :  { %4266 = vmatpush.bf16.msra.mxu0 %v6309_v58  ;;  %v4275_v53 = vsub.f32 0.0, %v3960_v32  ;;  %v3948_v2 = vpop.f32.mrf.mxu2 }
 0x330   :  { %4226 = vmatpush.bf16.msra.mxu3 %v5665_v42  ;;  %v2740_v42 = vperm.slane %v8005_v31, 1 }
 0x331   :  { %4252 = vmatpush.bf16.msra.mxu2 %v6113_v4  ;;  %v4282_v58 = vmul.f32 1.442695, %v4275_v53 }
 0x332   :  { %4241 = vmatpush.bf16.msra.mxu1 %v5833_v47  ;;  %v3987_v26 = vpop.f32.mrf.mxu1 }
 0x333   :  { %4267 = vmatpush.bf16.msra.mxu0 %v6281_v49  ;;  %6923 = vpow2.f32 %v4282_v58  ;;  %v4013_v41 = vpop.f32.mrf.mxu0  ;;  %v2743_v58 = vperm.slane %v8005_v31, 4 }
 0x334   :  { %4227 = vmatpush.bf16.msra.mxu3 %v5637_v60 }
 0x335   :  { %4253 = vmatpush.bf16.msra.mxu2 %v6085_v0 }
 0x336   :  { %4242 = vmatpush.bf16.msra.mxu1 %v5805_v6  ;;  %v3972_v43 = vpop.f32.mrf.mxu3 }
 0x337   :  { %4268 = vmatpush.bf16.msra.mxu0 %v6253_v45  ;;  %v3973_v44 = vadd.f32 %v3972_v43, %v2740_v42  ;;  %v3998_v4 = vpop.f32.mrf.mxu2 }
 0x338   :  { %4228 = vmatpush.bf16.msra.mxu3 %v5609_v14 }
 0x339   :  { %4254 = vmatpush.bf16.msra.mxu2 %v6057_v19  ;;  %v6924_v25 = vpop.eup %6923 }
 0x33a   :  { %4243 = vmatpush.bf16.msra.mxu1 %v5777_v21  ;;  %v4296_v30 = vadd.f32 1.0, %v6924_v25  ;;  %v4037_v35 = vpop.f32.mrf.mxu1 }
 0x33b   :  { %4269 = vmatpush.bf16.msra.mxu0 %v6225_v28 }
 0x33c   :  { %4229 = vmatpush.bf16.msra.mxu3 %v5581_v29  ;;  %6925 = vrcp.f32 %v4296_v30 }
 0x33d   :  { %4255 = vmatpush.bf16.msra.mxu2 %v6029_v33  ;;  %4244 = vmatmul.bf16.vlgmr.msra.gmra.mxu1 %v7950_v13  ;;  %v3986_v13 = vadd.f32 %v3985_v46, %v3973_v44 }
 0x33e   :  { %6400 = vmatmul.msk.bf16.vlgmr.msra.gmra.mxu0 %vm2099_vm2, %v7952_v55  ;;  %v4063_v55 = vpop.f32.mrf.mxu0  ;;  %v3974_v50 = vpop.f32.mrf.mxu3 }
 0x33f   :  { %v3999_v47 = vadd.f32 %v3998_v4, %v3986_v13  ;;  %v4000_v49 = vpop.f32.mrf.mxu2 }
 0x340   :  { %4230 = vmatpush.bf16.msra.mxu3 %v5553_v40 }
 0x341   :  { %4256 = vmatpush.bf16.msra.mxu2 %v6001_v51  ;;  %v4012_v48 = vadd.f32 %v4011_v27, %v3999_v47 }
 0x342   :  { %v6926_v38 = vpop.eup %6925  ;;  %v4039_v56 = vpop.f32.mrf.mxu1 }
 0x343   :  { %4231 = vmatmul.bf16.vlgmr.msra.gmra.mxu3 %v7958_v39  ;;  %v4276_v52 = vsub.f32 0.0, %v4012_v48  ;;  %v4310_v60 = vmin.f32 %v6926_v38, 1.0  ;;  %v2741_v39 = vperm.slane %v8005_v31, 2  ;;  %v2744_v38 = vperm.slane %v8005_v31, 5 }
 0x344   :  { %4257 = vmatmul.bf16.vlgmr.msra.gmra.mxu2 %v7960_v16 }
 0x345   :  { %v4284_v54 = vmul.f32 1.442695, %v4276_v52  ;;  %4317 = vst [vmem:[#allocation14] sm:$0xff] %v4310_v60 }
 0x346   :  { %v4065_v61 = vpop.f32.mrf.mxu0  ;;  %v4024_v16 = vpop.f32.mrf.mxu3 }
 0x347   :  { %6927 = vpow2.f32 %v4284_v54  ;;  %v4025_v59 = vadd.f32 %v4024_v16, %v2741_v39  ;;  %v4050_v0 = vpop.f32.mrf.mxu2 }
 0x349   :  { %v4038_v1 = vadd.f32 %v4037_v35, %v4025_v59 }
 0x34b   :  { %v4051_v6 = vadd.f32 %v4050_v0, %v4038_v1 }
 0x34d   :  { %v6928_v37 = vpop.eup %6927  ;;  %v4064_v8 = vadd.f32 %v4063_v55, %v4051_v6 }
 0x34e   :  { %v4297_v3 = vadd.f32 1.0, %v6928_v37  ;;  %v4026_v63 = vpop.f32.mrf.mxu3 }
 0x34f   :  { %v4277_v9 = vsub.f32 0.0, %v4064_v8  ;;  %v4052_v10 = vpop.f32.mrf.mxu2 }
 0x350   :  { %6929 = vrcp.f32 %v4297_v3 }
 0x351   :  { %v4286_v45 = vmul.f32 1.442695, %v4277_v9 }
 0x353   :  { %6931 = vpow2.f32 %v4286_v45 }
 0x356   :  { %v6930_v11 = vpop.eup %6929 }
 0x357   :  { %v4311_v12 = vmin.f32 %v6930_v11, 1.0 }
 0x359   :  { %4318 = vst [vmem:[#allocation14 + $0x8] sm:$0xff] %v4311_v12  ;;  %v6932_v17 = vpop.eup %6931 }
 0x35a   :  { %v4089_v14 = vpop.f32.mrf.mxu1  ;;  %v4298_v18 = vadd.f32 1.0, %v6932_v17 }
 0x35b   :  { %v4115_v15 = vpop.f32.mrf.mxu0 }
 0x35c   :  { %6933 = vrcp.f32 %v4298_v18 }
 0x362   :  { %v4091_v19 = vpop.f32.mrf.mxu1  ;;  %v6934_v46 = vpop.eup %6933 }
 0x363   :  { %v4117_v5 = vpop.f32.mrf.mxu0  ;;  %v4312_v21 = vmin.f32 %v6934_v46, 1.0 }
 0x365   :  { %4319 = vst [vmem:[#allocation14 + $0x10] sm:$0xff] %v4312_v21 }
 0x366   :  { %v4076_v23 = vpop.f32.mrf.mxu3 }
 0x367   :  { %v4077_v24 = vadd.f32 %v4076_v23, %v2742_v20  ;;  %v4102_v7 = vpop.f32.mrf.mxu2 }
 0x369   :  { %v4090_v27 = vadd.f32 %v4089_v14, %v4077_v24  ;;  %v2745_v14 = vperm.slane %v8005_v31, 6 }
 0x36b   :  { %v4103_v28 = vadd.f32 %v4102_v7, %v4090_v27 }
 0x36d   :  { %v4116_v29 = vadd.f32 %v4115_v15, %v4103_v28 }
 0x36e   :  { %v4078_v32 = vpop.f32.mrf.mxu3 }
 0x36f   :  { %v4278_v33 = vsub.f32 0.0, %v4116_v29  ;;  %v4104_v22 = vpop.f32.mrf.mxu2 }
 0x371   :  { %v4288_v34 = vmul.f32 1.442695, %v4278_v33 }
 0x373   :  { %6935 = vpow2.f32 %v4288_v34 }
 0x379   :  { %v6936_v62 = vpop.eup %6935 }
 0x37a   :  { %v4141_v36 = vpop.f32.mrf.mxu1  ;;  %v4299_v53 = vadd.f32 1.0, %v6936_v62 }
 0x37b   :  { %v4167_v57 = vpop.f32.mrf.mxu0 }
 0x37c   :  { %6937 = vrcp.f32 %v4299_v53 }
 0x382   :  { %v4143_v2 = vpop.f32.mrf.mxu1  ;;  %v6938_v51 = vpop.eup %6937 }
 0x383   :  { %v4169_v40 = vpop.f32.mrf.mxu0  ;;  %v4313_v26 = vmin.f32 %v6938_v51, 1.0 }
 0x385   :  { %4320 = vst [vmem:[#allocation14 + $0x18] sm:$0xff] %v4313_v26 }
 0x386   :  { %v4128_v41 = vpop.f32.mrf.mxu3 }
 0x387   :  { %v4129_v42 = vadd.f32 %v4128_v41, %v2743_v58  ;;  %v4154_v43 = vpop.f32.mrf.mxu2 }
 0x389   :  { %v4142_v44 = vadd.f32 %v4141_v36, %v4129_v42 }
 0x38b   :  { %v4155_v4 = vadd.f32 %v4154_v43, %v4142_v44 }
 0x38d   :  { %v4168_v25 = vadd.f32 %v4167_v57, %v4155_v4 }
 0x38e   :  { %v4130_v13 = vpop.f32.mrf.mxu3 }
 0x38f   :  { %v4279_v30 = vsub.f32 0.0, %v4168_v25  ;;  %v4156_v35 = vpop.f32.mrf.mxu2 }
 0x391   :  { %v4290_v47 = vmul.f32 1.442695, %v4279_v30 }
 0x393   :  { %6939 = vpow2.f32 %v4290_v47 }
 0x399   :  { %v6940_v50 = vpop.eup %6939 }
 0x39a   :  { %v4193_v55 = vpop.f32.mrf.mxu1  ;;  %v4300_v52 = vadd.f32 1.0, %v6940_v50 }
 0x39b   :  { %v4219_v48 = vpop.f32.mrf.mxu0 }
 0x39c   :  { %6941 = vrcp.f32 %v4300_v52 }
 0x3a2   :  { %v4195_v49 = vpop.f32.mrf.mxu1  ;;  %v6942_v56 = vpop.eup %6941 }
 0x3a3   :  { %v4221_v54 = vpop.f32.mrf.mxu0  ;;  %v4314_v60 = vmin.f32 %v6942_v56, 1.0 }
 0x3a5   :  { %4321 = vst [vmem:[#allocation14 + $0x20] sm:$0xff] %v4314_v60 }
 0x3a6   :  { %v4180_v61 = vpop.f32.mrf.mxu3 }
 0x3a7   :  { %v4181_v39 = vadd.f32 %v4180_v61, %v2744_v38  ;;  %v4206_v16 = vpop.f32.mrf.mxu2 }
 0x3a9   :  { %v4194_v59 = vadd.f32 %v4193_v55, %v4181_v39 }
 0x3ab   :  { %v4207_v0 = vadd.f32 %v4206_v16, %v4194_v59 }
 0x3ad   :  { %v4220_v37 = vadd.f32 %v4219_v48, %v4207_v0 }
 0x3ae   :  { %v4182_v1 = vpop.f32.mrf.mxu3 }
 0x3af   :  { %v4280_v3 = vsub.f32 0.0, %v4220_v37  ;;  %v4208_v6 = vpop.f32.mrf.mxu2 }
 0x3b1   :  { %v4292_v8 = vmul.f32 1.442695, %v4280_v3 }
 0x3b3   :  { %6943 = vpow2.f32 %v4292_v8 }
 0x3b9   :  { %v6944_v10 = vpop.eup %6943 }
 0x3ba   :  { %v4245_v63 = vpop.f32.mrf.mxu1  ;;  %v4301_v45 = vadd.f32 1.0, %v6944_v10 }
 0x3bb   :  { %v4271_v9 = vpop.f32.mrf.mxu0 }
 0x3bc   :  { %6945 = vrcp.f32 %v4301_v45 }
 0x3c2   :  { %v4247_v11 = vpop.f32.mrf.mxu1  ;;  %v6946_v15 = vpop.eup %6945 }
 0x3c3   :  { %v4273_v12 = vpop.f32.mrf.mxu0  ;;  %v4315_v17 = vmin.f32 %v6946_v15, 1.0 }
 0x3c5   :  { %4322 = vst [vmem:[#allocation14 + $0x28] sm:$0xff] %v4315_v17 }
 0x3c6   :  { %v4232_v18 = vpop.f32.mrf.mxu3 }
 0x3c7   :  { %v4233_v19 = vadd.f32 %v4232_v18, %v2745_v14  ;;  %v4258_v5 = vpop.f32.mrf.mxu2 }
 0x3c9   :  { %v4246_v20 = vadd.f32 %v4245_v63, %v4233_v19 }
 0x3cb   :  { %v4259_v46 = vadd.f32 %v4258_v5, %v4246_v20 }
 0x3cd   :  { %v4272_v21 = vadd.f32 %v4271_v9, %v4259_v46 }
 0x3ce   :  { %v4234_v23 = vpop.f32.mrf.mxu3 }
 0x3cf   :  { %v4281_v24 = vsub.f32 0.0, %v4272_v21  ;;  %v4260_v7 = vpop.f32.mrf.mxu2 }
 0x3d1   :  { %v4294_v27 = vmul.f32 1.442695, %v4281_v24 }
 0x3d3   :  { %6947 = vpow2.f32 %v4294_v27 }
 0x3d9   :  { %v6948_v28 = vpop.eup %6947 }
 0x3da   :  { %v4302_v29 = vadd.f32 1.0, %v6948_v28 }
 0x3dc   :  { %6949 = vrcp.f32 %v4302_v29 }
 0x3e2   :  { %v6950_v31 = vpop.eup %6949 }
 0x3e3   :  { %v4316_v32 = vmin.f32 %v6950_v31, 1.0 }
 0x3e5   :  { %4323 = vst [vmem:[#allocation14 + $0x30] sm:$0xff] %v4316_v32 }
 0x3e6   :  { %4334 = dma.vmem_to_hbm [thread:$0]  %s4330_s0, 896, %s4332_s23, [#allocation4]  }
 0x3e7   :  { %7175 = dma.done.wait [#allocation4], 896  }
 0x3e8   :  { %7176 = vsyncadd [#allocation4], 4294966400 }
 0x3e9   :  { %7177 = dma.done.wait [#allocation16], 256  }
 0x3ea   :  { %7178 = vsyncadd [#allocation16], 4294967040 }
 0x3eb   :  { %4354 = vsyncpa [#allocation3], 1 }
 0x3ec   :  { %4355 = vsyncpa [#allocation6], 1 }
 0x3ed   :  { %4356 = vsyncpa [#allocation9], 1 }
 0x3ee   :  { %4357 = vsyncpa [#allocation12], 1 }
 0x3ef   :  { %4358 = vsyncpa [#allocation4], 1 }
 0x3f0   :  { %4359 = vsyncpa [#allocation16], 1 }

</bundles_post_ra>
